<compile_context>
chip_gen: v7x
topology: tpu7x:2x2x1
jax: 0.10.0
libtpu: 0.0.40
codegen_flags: <defaults>
</compile_context>

<pallas_src>
import functools

import numpy as np
import jax
import jax.numpy as jnp
from jax import lax
from jax.experimental import pallas as pl
from jax.experimental.pallas import tpu as pltpu


# ----------------------------------------------------------------------------- #
# Kernel
# ----------------------------------------------------------------------------- #
def _layernorm(x2, w, b, eps=1e-5):
    mu = jnp.mean(x2, axis=-1, keepdims=True)
    xc = x2 - mu
    var = jnp.mean(xc * xc, axis=-1, keepdims=True)
    return xc * lax.rsqrt(var + eps) * w + b


def _lane_pick(x3, idx):
    # x3[:, :, idx] as a dense (N, N) matrix.  Written as a width-1 lane slice
    # followed by a (trivial) lane reduction: the same reduce-minor-axis pattern
    # that is known to lower cleanly, without the old iota/where/sum select.
    return jnp.sum(x3[:, :, idx:idx + 1], axis=2)


def _triplet_kernel(num_heads,
                    e_ref, et_ref, mask_ref,
                    lnw_ref, lnb_ref,
                    wegin_ref, begin_ref, wegout_ref, begout_ref,
                    wvin_ref, bvin_ref, wvout_ref, bvout_ref,
                    wo_ref, bo_ref,
                    out_ref,
                    va_ref):
    # TODO(synk): attention_dropout > 0 (F.dropout on A_in/A_out) is not implemented.
    _, N, _, E = e_ref.shape
    H = num_heads
    D = E // H
    f32 = jnp.float32

    # LayerNorm on both spatial orientations (e and e^T supplied by the wrapper).
    x = _layernorm(e_ref[...].astype(f32).reshape(N * N, E), lnw_ref[...], lnb_ref[...])
    xt = _layernorm(et_ref[...].astype(f32).reshape(N * N, E), lnw_ref[...], lnb_ref[...])
    mask2 = mask_ref[...].astype(f32).reshape(N, N)          # additive mask over (i, k)

    # Fused head logits (one matmul per orientation).
    #   eg_in  rows (i, k): cols [0:H] = E_in[i,k,h],  [H:2H] = G_in[i,k,h]
    #   eg_out rows (i, k): cols [0:H] = E_out[k,i,h], [H:2H] = G_out[k,i,h]
    eg_in = (jnp.dot(x, wegin_ref[...], preferred_element_type=f32)
             + begin_ref[...]).reshape(N, N, 2 * H)
    eg_out = (jnp.dot(xt, wegout_ref[...], preferred_element_type=f32)
              + begout_ref[...]).reshape(N, N, 2 * H)

    # Fused V projections, head-major channels (col h*D+d).
    #   v_in  rows (j, k): col h*D+d = V_in[j,k,d,h]
    #   v_out rows (j, k): col h*D+d = V_out[k,j,d,h]
    v_in = (jnp.dot(x, wvin_ref[...], preferred_element_type=f32)
            + bvin_ref[...]).reshape(N, N, E)
    v_out = (jnp.dot(xt, wvout_ref[...], preferred_element_type=f32)
             + bvout_ref[...]).reshape(N, N, E)

    # Put the contraction index k on lanes once per slab: v_*_t[j, h*D+d, k].
    v_in_t = jnp.swapaxes(v_in, 1, 2)        # (N_j, E, N_k)
    v_out_t = jnp.swapaxes(v_out, 1, 2)      # (N_j, E, N_k)

    for h in range(H):                        # small static head loop (matmuls only)
        # Gated attention, dense (N_i, N_k) tiles, lane-axis softmax.
        ein_h = _lane_pick(eg_in, h) + mask2
        gin_h = _lane_pick(eg_in, H + h) + mask2
        s_in = ein_h - jnp.max(ein_h, axis=-1, keepdims=True)
        p_in = jnp.exp(s_in)
        a_in = (p_in / jnp.sum(p_in, axis=-1, keepdims=True)) * jax.nn.sigmoid(gin_h)

        eout_h = _lane_pick(eg_out, h)        # = E_out[k, i, h] stored at [i, k]
        gout_h = _lane_pick(eg_out, H + h)
        s_out = eout_h - jnp.max(eout_h, axis=-1, keepdims=True)
        p_out = jnp.exp(s_out)
        a_out = (p_out / jnp.sum(p_out, axis=-1, keepdims=True)) * jax.nn.sigmoid(gout_h)

        # Wide MXU contraction over k:  r[(j,d), i] = sum_k v[(j,d), k] * a[i, k].
        vjdk_in = v_in_t[:, h * D:(h + 1) * D, :].reshape(N * D, N)
        vjdk_out = v_out_t[:, h * D:(h + 1) * D, :].reshape(N * D, N)
        r_in = jnp.dot(vjdk_in, a_in.T, preferred_element_type=f32)    # Va_in[i,j,d,h]
        r_out = jnp.dot(vjdk_out, a_out.T, preferred_element_type=f32)  # Va_out[i,j,d,h]

        # Stash head results head-major; va_ref columns are lin_O input channels.
        va_ref[:, h * D:(h + 1) * D, :] = r_in.reshape(N, D, N)
        va_ref[:, E + h * D:E + (h + 1) * D, :] = r_out.reshape(N, D, N)

    # Fused output projection: one (N*N, 2E) @ (2E, E) matmul.
    va = jnp.swapaxes(va_ref[...], 1, 2).reshape(N * N, 2 * E)   # rows (j, i)
    out = jnp.dot(va, wo_ref[...], preferred_element_type=f32) + bo_ref[...]
    out_ref[...] = out.reshape(1, N, N, E).astype(out_ref.dtype)  # [b, j, i, :]


# ----------------------------------------------------------------------------- #
# Wrapper (parameter plumbing + pallas_call)
# ----------------------------------------------------------------------------- #
def _const_spec(arr):
    nd = arr.ndim
    return pl.BlockSpec(arr.shape, lambda b, _nd=nd: (0,) * _nd)


def _make_kernel_params(p, E, H):
    D = E // H
    W_V, b_V = p['W_V'], p['b_V']          # (E, 2E), (2E,)
    W_EG, b_EG = p['W_EG'], p['b_EG']      # (E, 4H), (4H,)
    W_O, b_O = p['W_O'], p['b_O']          # (2E, E), (E,)

    # Fused E/G logits, split by orientation only (in = E_in|G_in, out = E_out|G_out).
    weg_in = W_EG[:, :2 * H]
    beg_in = b_EG[:2 * H].reshape(1, 2 * H)
    weg_out = W_EG[:, 2 * H:]
    beg_out = b_EG[2 * H:].reshape(1, 2 * H)

    # V projections with head-major output channels: new col h*D+d = old col d*H+h.
    def head_major(w):
        return jnp.transpose(w.reshape(E, D, H), (0, 2, 1)).reshape(E, E)

    def head_major_b(b):
        return jnp.transpose(b.reshape(D, H), (1, 0)).reshape(1, E)

    wv_in = head_major(W_V[:, :E])
    bv_in = head_major_b(b_V[:E])
    wv_out = head_major(W_V[:, E:])
    bv_out = head_major_b(b_V[E:])

    # lin_O rows permuted to the kernel's head-major Va channels:
    #   kernel c = h*D+d (in) / E + h*D+d (out)  <->  torch c = d*2H+h / d*2H+H+h
    WO3 = W_O.reshape(D, 2 * H, E)
    wo_in = jnp.transpose(WO3[:, :H, :], (1, 0, 2)).reshape(E, E)
    wo_out = jnp.transpose(WO3[:, H:, :], (1, 0, 2)).reshape(E, E)
    wo = jnp.concatenate([wo_in, wo_out], axis=0)            # (2E, E)
    bo = b_O.reshape(1, E)

    lnw = p['ln_w'].reshape(1, E)
    lnb = p['ln_b'].reshape(1, E)
    return [lnw, lnb, weg_in, beg_in, weg_out, beg_out,
            wv_in, bv_in, wv_out, bv_out, wo, bo]


def triplet_aggregate_pallas(e, mask, params, num_heads):
    B, N, _, E = e.shape
    assert E % num_heads == 0
    eT = jnp.swapaxes(e, 1, 2)            # spatially transposed edges
    m2 = mask[..., 0]                     # (B, N, N) additive mask
    kps = _make_kernel_params(params, E, num_heads)

    data_specs = [
        pl.BlockSpec((1, N, N, E), lambda b: (b, 0, 0, 0)),
        pl.BlockSpec((1, N, N, E), lambda b: (b, 0, 0, 0)),
        pl.BlockSpec((1, N, N), lambda b: (b, 0, 0)),
    ]

    # Rough per-batch-step VMEM estimate (f32 slabs: x, xt, v_in, v_out, va, out)
    # plus the two input blocks.  Raise the scoped limit only when needed.
    # TODO(synk): for production N (N, E >= 128) add an output-row (i) tile grid
    # axis with the value slabs held in scratch instead of growing the limit.
    est = 4 * N * N * (8 * E + 8 * num_heads) + 2 * N * N * E * e.dtype.itemsize
    cp_kwargs = dict(dimension_semantics=("parallel",))
    if est > (32 << 20):
        cp_kwargs["vmem_limit_bytes"] = min(int(est * 1.5), 96 << 20)

    out = pl.pallas_call(
        functools.partial(_triplet_kernel, num_heads),
        out_shape=jax.ShapeDtypeStruct((B, N, N, E), e.dtype),
        grid=(B,),
        in_specs=data_specs + [_const_spec(w) for w in kps],
        out_specs=pl.BlockSpec((1, N, N, E), lambda b: (b, 0, 0, 0)),
        scratch_shapes=[pltpu.VMEM((N, 2 * E, N), jnp.float32)],
        compiler_params=pltpu.CompilerParams(**cp_kwargs),
    )(e, eT, m2, *kps)
    return jnp.swapaxes(out, 1, 2)        # kernel emitted (B, j, i, E) -> (B, i, j, E)


# ----------------------------------------------------------------------------- #
# Pure-JAX reference (mirrors the PyTorch module) + deterministic params
# ----------------------------------------------------------------------------- #
def _init_params(key, E, H):
    ks = jax.random.split(key, 8)

    def lin(k, fin, fout):
        bound = 1.0 / np.sqrt(fin)
        kw, kb = jax.random.split(k)
        w = jax.random.uniform(kw, (fin, fout), jnp.float32, -bound, bound)
        b = jax.random.uniform(kb, (fout,), jnp.float32, -bound, bound)
        return w, b

    ln_w = 1.0 + 0.1 * jax.random.normal(ks[0], (E,), jnp.float32)
    ln_b = 0.1 * jax.random.normal(ks[1], (E,), jnp.float32)
    W_V, b_V = lin(ks[2], E, 2 * E)
    W_EG, b_EG = lin(ks[3], E, 4 * H)
    W_O, b_O = lin(ks[4], 2 * E, E)
    return dict(ln_w=ln_w, ln_b=ln_b, W_V=W_V, b_V=b_V,
                W_EG=W_EG, b_EG=b_EG, W_O=W_O, b_O=b_O)


def reference(e, mask, p, H):
    B, N, _, E = e.shape
    D = E // H
    with jax.default_matmul_precision("highest"):
        mu = jnp.mean(e, axis=-1, keepdims=True)
        var = jnp.mean((e - mu) ** 2, axis=-1, keepdims=True)
        e_ln = (e - mu) / jnp.sqrt(var + 1e-5) * p['ln_w'] + p['ln_b']

        V = e_ln @ p['W_V'] + p['b_V']
        V_in, V_out = V[..., :E], V[..., E:]
        EG = e_ln @ p['W_EG'] + p['b_EG']
        E_in, G_in, E_out, G_out = jnp.split(EG, 4, axis=-1)
        V_in = V_in.reshape(B, N, N, D, H)
        V_out = V_out.reshape(B, N, N, D, H)

        gates_in = jax.nn.sigmoid(G_in + mask)
        A_in = jax.nn.softmax(E_in + mask, axis=2) * gates_in
        Va_in = jnp.einsum('bikh,bjkdh->bijdh', A_in, V_in)

        gates_out = jax.nn.sigmoid(G_out)
        A_out = jax.nn.softmax(E_out, axis=1) * gates_out
        Va_out = jnp.einsum('bkih,bkjdh->bijdh', A_out, V_out)

        Va = jnp.concatenate([Va_in, Va_out], axis=-1).reshape(B, N, N, 2 * E)
        return Va @ p['W_O'] + p['b_O']


# ----------------------------------------------------------------------------- #
if __name__ == "__main__":
    B, N, E, H = 2, 8, 32, 4          # batch, num_edges, edge_width, num_heads
    key = jax.random.PRNGKey(0)
    k1, k2, k3 = jax.random.split(key, 3)

    e = jax.random.normal(k1, (B, N, N, E), jnp.float32)
    mask = jnp.where(jax.random.uniform(k2, (B, N, N, 1)) < 0.15, -1e4, 0.0).astype(jnp.float32)
    params = _init_params(k3, E, H)

    out = triplet_aggregate_pallas(e, mask, params, H)
    out = jax.block_until_ready(out)

    ref = reference(e, mask, params, H)
    np.testing.assert_allclose(np.asarray(out), np.asarray(ref), rtol=2e-2, atol=2e-2)
    print("KERNEL_OK")
</pallas_src>

<mosaic_0001>
module attributes {stable_mosaic.version = 11 : i64} {
  func.func @_triplet_kernel(%arg0: i32, %arg1: memref<1x8x8x32xf32, #tpu.memory_space<vmem>>, %arg2: memref<1x8x8x32xf32, #tpu.memory_space<vmem>>, %arg3: memref<1x8x8xf32, #tpu.memory_space<vmem>>, %arg4: memref<1x32xf32, #tpu.memory_space<vmem>>, %arg5: memref<1x32xf32, #tpu.memory_space<vmem>>, %arg6: memref<32x8xf32, #tpu.memory_space<vmem>>, %arg7: memref<1x8xf32, #tpu.memory_space<vmem>>, %arg8: memref<32x8xf32, #tpu.memory_space<vmem>>, %arg9: memref<1x8xf32, #tpu.memory_space<vmem>>, %arg10: memref<32x32xf32, #tpu.memory_space<vmem>>, %arg11: memref<1x32xf32, #tpu.memory_space<vmem>>, %arg12: memref<32x32xf32, #tpu.memory_space<vmem>>, %arg13: memref<1x32xf32, #tpu.memory_space<vmem>>, %arg14: memref<64x32xf32, #tpu.memory_space<vmem>>, %arg15: memref<1x32xf32, #tpu.memory_space<vmem>>, %arg16: memref<1x8x8x32xf32, #tpu.memory_space<vmem>>, %arg17: memref<8x64x8xf32, #tpu.memory_space<vmem>>) attributes {dimension_semantics = [#tpu.dimension_semantics<parallel>], iteration_bounds = array<i64: 2>, scalar_prefetch = 0 : i64, scratch_operands = 1 : i64, tpu.core_type = #tpu.core_type<tc>, window_params = [{transform_indices = @transform_0, window_bounds = array<i64: 1, 8, 8, 32>}, {transform_indices = @transform_1, window_bounds = array<i64: 1, 8, 8, 32>}, {transform_indices = @transform_2, window_bounds = array<i64: 1, 8, 8>}, {pipeline_mode = #tpu.pipeline_mode<synchronous>, transform_indices = @transform_3, window_bounds = array<i64: 1, 32>}, {pipeline_mode = #tpu.pipeline_mode<synchronous>, transform_indices = @transform_4, window_bounds = array<i64: 1, 32>}, {pipeline_mode = #tpu.pipeline_mode<synchronous>, transform_indices = @transform_5, window_bounds = array<i64: 32, 8>}, {pipeline_mode = #tpu.pipeline_mode<synchronous>, transform_indices = @transform_6, window_bounds = array<i64: 1, 8>}, {pipeline_mode = #tpu.pipeline_mode<synchronous>, transform_indices = @transform_7, window_bounds = array<i64: 32, 8>}, {pipeline_mode = #tpu.pipeline_mode<synchronous>, transform_indices = @transform_8, window_bounds = array<i64: 1, 8>}, {pipeline_mode = #tpu.pipeline_mode<synchronous>, transform_indices = @transform_9, window_bounds = array<i64: 32, 32>}, {pipeline_mode = #tpu.pipeline_mode<synchronous>, transform_indices = @transform_10, window_bounds = array<i64: 1, 32>}, {pipeline_mode = #tpu.pipeline_mode<synchronous>, transform_indices = @transform_11, window_bounds = array<i64: 32, 32>}, {pipeline_mode = #tpu.pipeline_mode<synchronous>, transform_indices = @transform_12, window_bounds = array<i64: 1, 32>}, {pipeline_mode = #tpu.pipeline_mode<synchronous>, transform_indices = @transform_13, window_bounds = array<i64: 64, 32>}, {pipeline_mode = #tpu.pipeline_mode<synchronous>, transform_indices = @transform_14, window_bounds = array<i64: 1, 32>}, {transform_indices = @transform_15, window_bounds = array<i64: 1, 8, 8, 32>}]} {
    %c0 = arith.constant 0 : index
    %c0_0 = arith.constant 0 : index
    %c0_1 = arith.constant 0 : index
    %c0_2 = arith.constant 0 : index
    %0 = vector.load %arg1[%c0, %c0_0, %c0_1, %c0_2] : memref<1x8x8x32xf32, #tpu.memory_space<vmem>>, vector<1x8x8x32xf32>
    %1 = vector.shape_cast %0 : vector<1x8x8x32xf32> to vector<64x32xf32>
    %c0_3 = arith.constant 0 : index
    %c0_4 = arith.constant 0 : index
    %2 = vector.load %arg4[%c0_3, %c0_4] : memref<1x32xf32, #tpu.memory_space<vmem>>, vector<1x32xf32>
    %c0_5 = arith.constant 0 : index
    %c0_6 = arith.constant 0 : index
    %3 = vector.load %arg5[%c0_5, %c0_6] : memref<1x32xf32, #tpu.memory_space<vmem>>, vector<1x32xf32>
    %cst = arith.constant dense<0.000000e+00> : vector<64xf32>
    %4 = vector.multi_reduction <add>, %1, %cst [1] : vector<64x32xf32> to vector<64xf32>
    %5 = vector.shape_cast %4 : vector<64xf32> to vector<64x1xf32>
    %cst_7 = arith.constant 3.200000e+01 : f32
    %6 = vector.broadcast %cst_7 : f32 to vector<64x1xf32>
    %7 = arith.divf %5, %6 : vector<64x1xf32>
    %8 = vector.broadcast %7 : vector<64x1xf32> to vector<64x32xf32>
    %9 = arith.subf %1, %8 : vector<64x32xf32>
    %10 = arith.mulf %9, %9 : vector<64x32xf32>
    %cst_8 = arith.constant dense<0.000000e+00> : vector<64xf32>
    %11 = vector.multi_reduction <add>, %10, %cst_8 [1] : vector<64x32xf32> to vector<64xf32>
    %12 = vector.shape_cast %11 : vector<64xf32> to vector<64x1xf32>
    %cst_9 = arith.constant 3.200000e+01 : f32
    %13 = vector.broadcast %cst_9 : f32 to vector<64x1xf32>
    %14 = arith.divf %12, %13 : vector<64x1xf32>
    %cst_10 = arith.constant 9.99999974E-6 : f32
    %15 = vector.broadcast %cst_10 : f32 to vector<64x1xf32>
    %16 = arith.addf %14, %15 : vector<64x1xf32>
    %17 = math.rsqrt %16 : vector<64x1xf32>
    %18 = vector.broadcast %17 : vector<64x1xf32> to vector<64x32xf32>
    %19 = arith.mulf %9, %18 : vector<64x32xf32>
    %20 = vector.broadcast %2 : vector<1x32xf32> to vector<64x32xf32>
    %21 = arith.mulf %19, %20 : vector<64x32xf32>
    %22 = vector.broadcast %3 : vector<1x32xf32> to vector<64x32xf32>
    %23 = arith.addf %21, %22 : vector<64x32xf32>
    %c0_11 = arith.constant 0 : index
    %c0_12 = arith.constant 0 : index
    %c0_13 = arith.constant 0 : index
    %c0_14 = arith.constant 0 : index
    %24 = vector.load %arg2[%c0_11, %c0_12, %c0_13, %c0_14] : memref<1x8x8x32xf32, #tpu.memory_space<vmem>>, vector<1x8x8x32xf32>
    %25 = vector.shape_cast %24 : vector<1x8x8x32xf32> to vector<64x32xf32>
    %c0_15 = arith.constant 0 : index
    %c0_16 = arith.constant 0 : index
    %26 = vector.load %arg4[%c0_15, %c0_16] : memref<1x32xf32, #tpu.memory_space<vmem>>, vector<1x32xf32>
    %c0_17 = arith.constant 0 : index
    %c0_18 = arith.constant 0 : index
    %27 = vector.load %arg5[%c0_17, %c0_18] : memref<1x32xf32, #tpu.memory_space<vmem>>, vector<1x32xf32>
    %cst_19 = arith.constant dense<0.000000e+00> : vector<64xf32>
    %28 = vector.multi_reduction <add>, %25, %cst_19 [1] : vector<64x32xf32> to vector<64xf32>
    %29 = vector.shape_cast %28 : vector<64xf32> to vector<64x1xf32>
    %cst_20 = arith.constant 3.200000e+01 : f32
    %30 = vector.broadcast %cst_20 : f32 to vector<64x1xf32>
    %31 = arith.divf %29, %30 : vector<64x1xf32>
    %32 = vector.broadcast %31 : vector<64x1xf32> to vector<64x32xf32>
    %33 = arith.subf %25, %32 : vector<64x32xf32>
    %34 = arith.mulf %33, %33 : vector<64x32xf32>
    %cst_21 = arith.constant dense<0.000000e+00> : vector<64xf32>
    %35 = vector.multi_reduction <add>, %34, %cst_21 [1] : vector<64x32xf32> to vector<64xf32>
    %36 = vector.shape_cast %35 : vector<64xf32> to vector<64x1xf32>
    %cst_22 = arith.constant 3.200000e+01 : f32
    %37 = vector.broadcast %cst_22 : f32 to vector<64x1xf32>
    %38 = arith.divf %36, %37 : vector<64x1xf32>
    %cst_23 = arith.constant 9.99999974E-6 : f32
    %39 = vector.broadcast %cst_23 : f32 to vector<64x1xf32>
    %40 = arith.addf %38, %39 : vector<64x1xf32>
    %41 = math.rsqrt %40 : vector<64x1xf32>
    %42 = vector.broadcast %41 : vector<64x1xf32> to vector<64x32xf32>
    %43 = arith.mulf %33, %42 : vector<64x32xf32>
    %44 = vector.broadcast %26 : vector<1x32xf32> to vector<64x32xf32>
    %45 = arith.mulf %43, %44 : vector<64x32xf32>
    %46 = vector.broadcast %27 : vector<1x32xf32> to vector<64x32xf32>
    %47 = arith.addf %45, %46 : vector<64x32xf32>
    %c0_24 = arith.constant 0 : index
    %c0_25 = arith.constant 0 : index
    %c0_26 = arith.constant 0 : index
    %48 = vector.load %arg3[%c0_24, %c0_25, %c0_26] : memref<1x8x8xf32, #tpu.memory_space<vmem>>, vector<1x8x8xf32>
    %49 = vector.shape_cast %48 : vector<1x8x8xf32> to vector<8x8xf32>
    %c0_27 = arith.constant 0 : index
    %c0_28 = arith.constant 0 : index
    %50 = vector.load %arg6[%c0_27, %c0_28] : memref<32x8xf32, #tpu.memory_space<vmem>>, vector<32x8xf32>
    %cst_29 = arith.constant dense<0.000000e+00> : vector<64x8xf32>
    %51 = tpu.matmul %23, %50, %cst_29 {dimension_numbers = #tpu.dot_dimension_numbers<[1], [0], [0], [1], [0, 0, 1, 1], [], []>} : vector<64x32xf32>, vector<32x8xf32>, vector<64x8xf32> -> vector<64x8xf32>
    %c0_30 = arith.constant 0 : index
    %c0_31 = arith.constant 0 : index
    %52 = vector.load %arg7[%c0_30, %c0_31] : memref<1x8xf32, #tpu.memory_space<vmem>>, vector<1x8xf32>
    %53 = vector.broadcast %52 : vector<1x8xf32> to vector<64x8xf32>
    %54 = arith.addf %51, %53 : vector<64x8xf32>
    %55 = vector.shape_cast %54 : vector<64x8xf32> to vector<8x8x8xf32>
    %c0_32 = arith.constant 0 : index
    %c0_33 = arith.constant 0 : index
    %56 = vector.load %arg8[%c0_32, %c0_33] : memref<32x8xf32, #tpu.memory_space<vmem>>, vector<32x8xf32>
    %cst_34 = arith.constant dense<0.000000e+00> : vector<64x8xf32>
    %57 = tpu.matmul %47, %56, %cst_34 {dimension_numbers = #tpu.dot_dimension_numbers<[1], [0], [0], [1], [0, 0, 1, 1], [], []>} : vector<64x32xf32>, vector<32x8xf32>, vector<64x8xf32> -> vector<64x8xf32>
    %c0_35 = arith.constant 0 : index
    %c0_36 = arith.constant 0 : index
    %58 = vector.load %arg9[%c0_35, %c0_36] : memref<1x8xf32, #tpu.memory_space<vmem>>, vector<1x8xf32>
    %59 = vector.broadcast %58 : vector<1x8xf32> to vector<64x8xf32>
    %60 = arith.addf %57, %59 : vector<64x8xf32>
    %61 = vector.shape_cast %60 : vector<64x8xf32> to vector<8x8x8xf32>
    %c0_37 = arith.constant 0 : index
    %c0_38 = arith.constant 0 : index
    %62 = vector.load %arg10[%c0_37, %c0_38] : memref<32x32xf32, #tpu.memory_space<vmem>>, vector<32x32xf32>
    %cst_39 = arith.constant dense<0.000000e+00> : vector<64x32xf32>
    %63 = tpu.matmul %23, %62, %cst_39 {dimension_numbers = #tpu.dot_dimension_numbers<[1], [0], [0], [1], [0, 0, 1, 1], [], []>} : vector<64x32xf32>, vector<32x32xf32>, vector<64x32xf32> -> vector<64x32xf32>
    %c0_40 = arith.constant 0 : index
    %c0_41 = arith.constant 0 : index
    %64 = vector.load %arg11[%c0_40, %c0_41] : memref<1x32xf32, #tpu.memory_space<vmem>>, vector<1x32xf32>
    %65 = vector.broadcast %64 : vector<1x32xf32> to vector<64x32xf32>
    %66 = arith.addf %63, %65 : vector<64x32xf32>
    %67 = vector.shape_cast %66 : vector<64x32xf32> to vector<8x8x32xf32>
    %c0_42 = arith.constant 0 : index
    %c0_43 = arith.constant 0 : index
    %68 = vector.load %arg12[%c0_42, %c0_43] : memref<32x32xf32, #tpu.memory_space<vmem>>, vector<32x32xf32>
    %cst_44 = arith.constant dense<0.000000e+00> : vector<64x32xf32>
    %69 = tpu.matmul %47, %68, %cst_44 {dimension_numbers = #tpu.dot_dimension_numbers<[1], [0], [0], [1], [0, 0, 1, 1], [], []>} : vector<64x32xf32>, vector<32x32xf32>, vector<64x32xf32> -> vector<64x32xf32>
    %c0_45 = arith.constant 0 : index
    %c0_46 = arith.constant 0 : index
    %70 = vector.load %arg13[%c0_45, %c0_46] : memref<1x32xf32, #tpu.memory_space<vmem>>, vector<1x32xf32>
    %71 = vector.broadcast %70 : vector<1x32xf32> to vector<64x32xf32>
    %72 = arith.addf %69, %71 : vector<64x32xf32>
    %73 = vector.shape_cast %72 : vector<64x32xf32> to vector<8x8x32xf32>
    %74 = tpu.transpose %67, [0, 2, 1] : vector<8x8x32xf32> -> vector<8x32x8xf32>
    %75 = tpu.transpose %73, [0, 2, 1] : vector<8x8x32xf32> -> vector<8x32x8xf32>
    %76 = vector.extract_strided_slice %55 {offsets = [0, 0, 0], sizes = [8, 8, 1], strides = [1, 1, 1]} : vector<8x8x8xf32> to vector<8x8x1xf32>
    %cst_47 = arith.constant dense<0.000000e+00> : vector<8x8xf32>
    %77 = vector.multi_reduction <add>, %76, %cst_47 [2] : vector<8x8x1xf32> to vector<8x8xf32>
    %78 = arith.addf %77, %49 : vector<8x8xf32>
    %79 = vector.extract_strided_slice %55 {offsets = [0, 0, 4], sizes = [8, 8, 1], strides = [1, 1, 1]} : vector<8x8x8xf32> to vector<8x8x1xf32>
    %cst_48 = arith.constant dense<0.000000e+00> : vector<8x8xf32>
    %80 = vector.multi_reduction <add>, %79, %cst_48 [2] : vector<8x8x1xf32> to vector<8x8xf32>
    %81 = arith.addf %80, %49 : vector<8x8xf32>
    %cst_49 = arith.constant dense<0xFF800000> : vector<8xf32>
    %82 = vector.multi_reduction <maximumf>, %78, %cst_49 [1] : vector<8x8xf32> to vector<8xf32>
    %83 = vector.shape_cast %82 : vector<8xf32> to vector<8x1xf32>
    %84 = vector.broadcast %83 : vector<8x1xf32> to vector<8x8xf32>
    %85 = arith.subf %78, %84 : vector<8x8xf32>
    %86 = math.exp %85 : vector<8x8xf32>
    %cst_50 = arith.constant dense<0.000000e+00> : vector<8xf32>
    %87 = vector.multi_reduction <add>, %86, %cst_50 [1] : vector<8x8xf32> to vector<8xf32>
    %88 = vector.shape_cast %87 : vector<8xf32> to vector<8x1xf32>
    %89 = vector.broadcast %88 : vector<8x1xf32> to vector<8x8xf32>
    %90 = arith.divf %86, %89 : vector<8x8xf32>
    %91 = arith.negf %81 : vector<8x8xf32>
    %92 = math.exp %91 : vector<8x8xf32>
    %cst_51 = arith.constant 1.000000e+00 : f32
    %93 = vector.broadcast %cst_51 : f32 to vector<8x8xf32>
    %94 = arith.addf %93, %92 : vector<8x8xf32>
    %95 = arith.divf %93, %94 : vector<8x8xf32>
    %96 = arith.mulf %90, %95 : vector<8x8xf32>
    %97 = vector.extract_strided_slice %61 {offsets = [0, 0, 0], sizes = [8, 8, 1], strides = [1, 1, 1]} : vector<8x8x8xf32> to vector<8x8x1xf32>
    %cst_52 = arith.constant dense<0.000000e+00> : vector<8x8xf32>
    %98 = vector.multi_reduction <add>, %97, %cst_52 [2] : vector<8x8x1xf32> to vector<8x8xf32>
    %99 = vector.extract_strided_slice %61 {offsets = [0, 0, 4], sizes = [8, 8, 1], strides = [1, 1, 1]} : vector<8x8x8xf32> to vector<8x8x1xf32>
    %cst_53 = arith.constant dense<0.000000e+00> : vector<8x8xf32>
    %100 = vector.multi_reduction <add>, %99, %cst_53 [2] : vector<8x8x1xf32> to vector<8x8xf32>
    %cst_54 = arith.constant dense<0xFF800000> : vector<8xf32>
    %101 = vector.multi_reduction <maximumf>, %98, %cst_54 [1] : vector<8x8xf32> to vector<8xf32>
    %102 = vector.shape_cast %101 : vector<8xf32> to vector<8x1xf32>
    %103 = vector.broadcast %102 : vector<8x1xf32> to vector<8x8xf32>
    %104 = arith.subf %98, %103 : vector<8x8xf32>
    %105 = math.exp %104 : vector<8x8xf32>
    %cst_55 = arith.constant dense<0.000000e+00> : vector<8xf32>
    %106 = vector.multi_reduction <add>, %105, %cst_55 [1] : vector<8x8xf32> to vector<8xf32>
    %107 = vector.shape_cast %106 : vector<8xf32> to vector<8x1xf32>
    %108 = vector.broadcast %107 : vector<8x1xf32> to vector<8x8xf32>
    %109 = arith.divf %105, %108 : vector<8x8xf32>
    %110 = arith.negf %100 : vector<8x8xf32>
    %111 = math.exp %110 : vector<8x8xf32>
    %cst_56 = arith.constant 1.000000e+00 : f32
    %112 = vector.broadcast %cst_56 : f32 to vector<8x8xf32>
    %113 = arith.addf %112, %111 : vector<8x8xf32>
    %114 = arith.divf %112, %113 : vector<8x8xf32>
    %115 = arith.mulf %109, %114 : vector<8x8xf32>
    %116 = vector.extract_strided_slice %74 {offsets = [0, 0, 0], sizes = [8, 8, 8], strides = [1, 1, 1]} : vector<8x32x8xf32> to vector<8x8x8xf32>
    %117 = vector.shape_cast %116 : vector<8x8x8xf32> to vector<64x8xf32>
    %118 = vector.extract_strided_slice %75 {offsets = [0, 0, 0], sizes = [8, 8, 8], strides = [1, 1, 1]} : vector<8x32x8xf32> to vector<8x8x8xf32>
    %119 = vector.shape_cast %118 : vector<8x8x8xf32> to vector<64x8xf32>
    %120 = tpu.transpose %96, [1, 0] : vector<8x8xf32> -> vector<8x8xf32>
    %cst_57 = arith.constant dense<0.000000e+00> : vector<64x8xf32>
    %121 = tpu.matmul %117, %120, %cst_57 {dimension_numbers = #tpu.dot_dimension_numbers<[1], [0], [0], [1], [0, 0, 1, 1], [], []>} : vector<64x8xf32>, vector<8x8xf32>, vector<64x8xf32> -> vector<64x8xf32>
    %122 = tpu.transpose %115, [1, 0] : vector<8x8xf32> -> vector<8x8xf32>
    %cst_58 = arith.constant dense<0.000000e+00> : vector<64x8xf32>
    %123 = tpu.matmul %119, %122, %cst_58 {dimension_numbers = #tpu.dot_dimension_numbers<[1], [0], [0], [1], [0, 0, 1, 1], [], []>} : vector<64x8xf32>, vector<8x8xf32>, vector<64x8xf32> -> vector<64x8xf32>
    %124 = vector.shape_cast %121 : vector<64x8xf32> to vector<8x8x8xf32>
    %c0_59 = arith.constant 0 : index
    %c0_60 = arith.constant 0 : index
    %c0_61 = arith.constant 0 : index
    %125 = vector.load %arg17[%c0_59, %c0_60, %c0_61] : memref<8x64x8xf32, #tpu.memory_space<vmem>>, vector<8x8x8xf32>
    tpu.vector_store %arg17[%c0_59, %c0_60, %c0_61], %124 {strides = array<i32>} : memref<8x64x8xf32, #tpu.memory_space<vmem>>, vector<8x8x8xf32>,
    %126 = vector.shape_cast %123 : vector<64x8xf32> to vector<8x8x8xf32>
    %c0_62 = arith.constant 0 : index
    %c32 = arith.constant 32 : index
    %c0_63 = arith.constant 0 : index
    %127 = vector.load %arg17[%c0_62, %c32, %c0_63] : memref<8x64x8xf32, #tpu.memory_space<vmem>>, vector<8x8x8xf32>
    tpu.vector_store %arg17[%c0_62, %c32, %c0_63], %126 {strides = array<i32>} : memref<8x64x8xf32, #tpu.memory_space<vmem>>, vector<8x8x8xf32>,
    %128 = vector.extract_strided_slice %55 {offsets = [0, 0, 1], sizes = [8, 8, 1], strides = [1, 1, 1]} : vector<8x8x8xf32> to vector<8x8x1xf32>
    %cst_64 = arith.constant dense<0.000000e+00> : vector<8x8xf32>
    %129 = vector.multi_reduction <add>, %128, %cst_64 [2] : vector<8x8x1xf32> to vector<8x8xf32>
    %130 = arith.addf %129, %49 : vector<8x8xf32>
    %131 = vector.extract_strided_slice %55 {offsets = [0, 0, 5], sizes = [8, 8, 1], strides = [1, 1, 1]} : vector<8x8x8xf32> to vector<8x8x1xf32>
    %cst_65 = arith.constant dense<0.000000e+00> : vector<8x8xf32>
    %132 = vector.multi_reduction <add>, %131, %cst_65 [2] : vector<8x8x1xf32> to vector<8x8xf32>
    %133 = arith.addf %132, %49 : vector<8x8xf32>
    %cst_66 = arith.constant dense<0xFF800000> : vector<8xf32>
    %134 = vector.multi_reduction <maximumf>, %130, %cst_66 [1] : vector<8x8xf32> to vector<8xf32>
    %135 = vector.shape_cast %134 : vector<8xf32> to vector<8x1xf32>
    %136 = vector.broadcast %135 : vector<8x1xf32> to vector<8x8xf32>
    %137 = arith.subf %130, %136 : vector<8x8xf32>
    %138 = math.exp %137 : vector<8x8xf32>
    %cst_67 = arith.constant dense<0.000000e+00> : vector<8xf32>
    %139 = vector.multi_reduction <add>, %138, %cst_67 [1] : vector<8x8xf32> to vector<8xf32>
    %140 = vector.shape_cast %139 : vector<8xf32> to vector<8x1xf32>
    %141 = vector.broadcast %140 : vector<8x1xf32> to vector<8x8xf32>
    %142 = arith.divf %138, %141 : vector<8x8xf32>
    %143 = arith.negf %133 : vector<8x8xf32>
    %144 = math.exp %143 : vector<8x8xf32>
    %cst_68 = arith.constant 1.000000e+00 : f32
    %145 = vector.broadcast %cst_68 : f32 to vector<8x8xf32>
    %146 = arith.addf %145, %144 : vector<8x8xf32>
    %147 = arith.divf %145, %146 : vector<8x8xf32>
    %148 = arith.mulf %142, %147 : vector<8x8xf32>
    %149 = vector.extract_strided_slice %61 {offsets = [0, 0, 1], sizes = [8, 8, 1], strides = [1, 1, 1]} : vector<8x8x8xf32> to vector<8x8x1xf32>
    %cst_69 = arith.constant dense<0.000000e+00> : vector<8x8xf32>
    %150 = vector.multi_reduction <add>, %149, %cst_69 [2] : vector<8x8x1xf32> to vector<8x8xf32>
    %151 = vector.extract_strided_slice %61 {offsets = [0, 0, 5], sizes = [8, 8, 1], strides = [1, 1, 1]} : vector<8x8x8xf32> to vector<8x8x1xf32>
    %cst_70 = arith.constant dense<0.000000e+00> : vector<8x8xf32>
    %152 = vector.multi_reduction <add>, %151, %cst_70 [2] : vector<8x8x1xf32> to vector<8x8xf32>
    %cst_71 = arith.constant dense<0xFF800000> : vector<8xf32>
    %153 = vector.multi_reduction <maximumf>, %150, %cst_71 [1] : vector<8x8xf32> to vector<8xf32>
    %154 = vector.shape_cast %153 : vector<8xf32> to vector<8x1xf32>
    %155 = vector.broadcast %154 : vector<8x1xf32> to vector<8x8xf32>
    %156 = arith.subf %150, %155 : vector<8x8xf32>
    %157 = math.exp %156 : vector<8x8xf32>
    %cst_72 = arith.constant dense<0.000000e+00> : vector<8xf32>
    %158 = vector.multi_reduction <add>, %157, %cst_72 [1] : vector<8x8xf32> to vector<8xf32>
    %159 = vector.shape_cast %158 : vector<8xf32> to vector<8x1xf32>
    %160 = vector.broadcast %159 : vector<8x1xf32> to vector<8x8xf32>
    %161 = arith.divf %157, %160 : vector<8x8xf32>
    %162 = arith.negf %152 : vector<8x8xf32>
    %163 = math.exp %162 : vector<8x8xf32>
    %cst_73 = arith.constant 1.000000e+00 : f32
    %164 = vector.broadcast %cst_73 : f32 to vector<8x8xf32>
    %165 = arith.addf %164, %163 : vector<8x8xf32>
    %166 = arith.divf %164, %165 : vector<8x8xf32>
    %167 = arith.mulf %161, %166 : vector<8x8xf32>
    %168 = vector.extract_strided_slice %74 {offsets = [0, 8, 0], sizes = [8, 8, 8], strides = [1, 1, 1]} : vector<8x32x8xf32> to vector<8x8x8xf32>
    %169 = vector.shape_cast %168 : vector<8x8x8xf32> to vector<64x8xf32>
    %170 = vector.extract_strided_slice %75 {offsets = [0, 8, 0], sizes = [8, 8, 8], strides = [1, 1, 1]} : vector<8x32x8xf32> to vector<8x8x8xf32>
    %171 = vector.shape_cast %170 : vector<8x8x8xf32> to vector<64x8xf32>
    %172 = tpu.transpose %148, [1, 0] : vector<8x8xf32> -> vector<8x8xf32>
    %cst_74 = arith.constant dense<0.000000e+00> : vector<64x8xf32>
    %173 = tpu.matmul %169, %172, %cst_74 {dimension_numbers = #tpu.dot_dimension_numbers<[1], [0], [0], [1], [0, 0, 1, 1], [], []>} : vector<64x8xf32>, vector<8x8xf32>, vector<64x8xf32> -> vector<64x8xf32>
    %174 = tpu.transpose %167, [1, 0] : vector<8x8xf32> -> vector<8x8xf32>
    %cst_75 = arith.constant dense<0.000000e+00> : vector<64x8xf32>
    %175 = tpu.matmul %171, %174, %cst_75 {dimension_numbers = #tpu.dot_dimension_numbers<[1], [0], [0], [1], [0, 0, 1, 1], [], []>} : vector<64x8xf32>, vector<8x8xf32>, vector<64x8xf32> -> vector<64x8xf32>
    %176 = vector.shape_cast %173 : vector<64x8xf32> to vector<8x8x8xf32>
    %c0_76 = arith.constant 0 : index
    %c8 = arith.constant 8 : index
    %c0_77 = arith.constant 0 : index
    %177 = vector.load %arg17[%c0_76, %c8, %c0_77] : memref<8x64x8xf32, #tpu.memory_space<vmem>>, vector<8x8x8xf32>
    tpu.vector_store %arg17[%c0_76, %c8, %c0_77], %176 {strides = array<i32>} : memref<8x64x8xf32, #tpu.memory_space<vmem>>, vector<8x8x8xf32>,
    %178 = vector.shape_cast %175 : vector<64x8xf32> to vector<8x8x8xf32>
    %c0_78 = arith.constant 0 : index
    %c40 = arith.constant 40 : index
    %c0_79 = arith.constant 0 : index
    %179 = vector.load %arg17[%c0_78, %c40, %c0_79] : memref<8x64x8xf32, #tpu.memory_space<vmem>>, vector<8x8x8xf32>
    tpu.vector_store %arg17[%c0_78, %c40, %c0_79], %178 {strides = array<i32>} : memref<8x64x8xf32, #tpu.memory_space<vmem>>, vector<8x8x8xf32>,
    %180 = vector.extract_strided_slice %55 {offsets = [0, 0, 2], sizes = [8, 8, 1], strides = [1, 1, 1]} : vector<8x8x8xf32> to vector<8x8x1xf32>
    %cst_80 = arith.constant dense<0.000000e+00> : vector<8x8xf32>
    %181 = vector.multi_reduction <add>, %180, %cst_80 [2] : vector<8x8x1xf32> to vector<8x8xf32>
    %182 = arith.addf %181, %49 : vector<8x8xf32>
    %183 = vector.extract_strided_slice %55 {offsets = [0, 0, 6], sizes = [8, 8, 1], strides = [1, 1, 1]} : vector<8x8x8xf32> to vector<8x8x1xf32>
    %cst_81 = arith.constant dense<0.000000e+00> : vector<8x8xf32>
    %184 = vector.multi_reduction <add>, %183, %cst_81 [2] : vector<8x8x1xf32> to vector<8x8xf32>
    %185 = arith.addf %184, %49 : vector<8x8xf32>
    %cst_82 = arith.constant dense<0xFF800000> : vector<8xf32>
    %186 = vector.multi_reduction <maximumf>, %182, %cst_82 [1] : vector<8x8xf32> to vector<8xf32>
    %187 = vector.shape_cast %186 : vector<8xf32> to vector<8x1xf32>
    %188 = vector.broadcast %187 : vector<8x1xf32> to vector<8x8xf32>
    %189 = arith.subf %182, %188 : vector<8x8xf32>
    %190 = math.exp %189 : vector<8x8xf32>
    %cst_83 = arith.constant dense<0.000000e+00> : vector<8xf32>
    %191 = vector.multi_reduction <add>, %190, %cst_83 [1] : vector<8x8xf32> to vector<8xf32>
    %192 = vector.shape_cast %191 : vector<8xf32> to vector<8x1xf32>
    %193 = vector.broadcast %192 : vector<8x1xf32> to vector<8x8xf32>
    %194 = arith.divf %190, %193 : vector<8x8xf32>
    %195 = arith.negf %185 : vector<8x8xf32>
    %196 = math.exp %195 : vector<8x8xf32>
    %cst_84 = arith.constant 1.000000e+00 : f32
    %197 = vector.broadcast %cst_84 : f32 to vector<8x8xf32>
    %198 = arith.addf %197, %196 : vector<8x8xf32>
    %199 = arith.divf %197, %198 : vector<8x8xf32>
    %200 = arith.mulf %194, %199 : vector<8x8xf32>
    %201 = vector.extract_strided_slice %61 {offsets = [0, 0, 2], sizes = [8, 8, 1], strides = [1, 1, 1]} : vector<8x8x8xf32> to vector<8x8x1xf32>
    %cst_85 = arith.constant dense<0.000000e+00> : vector<8x8xf32>
    %202 = vector.multi_reduction <add>, %201, %cst_85 [2] : vector<8x8x1xf32> to vector<8x8xf32>
    %203 = vector.extract_strided_slice %61 {offsets = [0, 0, 6], sizes = [8, 8, 1], strides = [1, 1, 1]} : vector<8x8x8xf32> to vector<8x8x1xf32>
    %cst_86 = arith.constant dense<0.000000e+00> : vector<8x8xf32>
    %204 = vector.multi_reduction <add>, %203, %cst_86 [2] : vector<8x8x1xf32> to vector<8x8xf32>
    %cst_87 = arith.constant dense<0xFF800000> : vector<8xf32>
    %205 = vector.multi_reduction <maximumf>, %202, %cst_87 [1] : vector<8x8xf32> to vector<8xf32>
    %206 = vector.shape_cast %205 : vector<8xf32> to vector<8x1xf32>
    %207 = vector.broadcast %206 : vector<8x1xf32> to vector<8x8xf32>
    %208 = arith.subf %202, %207 : vector<8x8xf32>
    %209 = math.exp %208 : vector<8x8xf32>
    %cst_88 = arith.constant dense<0.000000e+00> : vector<8xf32>
    %210 = vector.multi_reduction <add>, %209, %cst_88 [1] : vector<8x8xf32> to vector<8xf32>
    %211 = vector.shape_cast %210 : vector<8xf32> to vector<8x1xf32>
    %212 = vector.broadcast %211 : vector<8x1xf32> to vector<8x8xf32>
    %213 = arith.divf %209, %212 : vector<8x8xf32>
    %214 = arith.negf %204 : vector<8x8xf32>
    %215 = math.exp %214 : vector<8x8xf32>
    %cst_89 = arith.constant 1.000000e+00 : f32
    %216 = vector.broadcast %cst_89 : f32 to vector<8x8xf32>
    %217 = arith.addf %216, %215 : vector<8x8xf32>
    %218 = arith.divf %216, %217 : vector<8x8xf32>
    %219 = arith.mulf %213, %218 : vector<8x8xf32>
    %220 = vector.extract_strided_slice %74 {offsets = [0, 16, 0], sizes = [8, 8, 8], strides = [1, 1, 1]} : vector<8x32x8xf32> to vector<8x8x8xf32>
    %221 = vector.shape_cast %220 : vector<8x8x8xf32> to vector<64x8xf32>
    %222 = vector.extract_strided_slice %75 {offsets = [0, 16, 0], sizes = [8, 8, 8], strides = [1, 1, 1]} : vector<8x32x8xf32> to vector<8x8x8xf32>
    %223 = vector.shape_cast %222 : vector<8x8x8xf32> to vector<64x8xf32>
    %224 = tpu.transpose %200, [1, 0] : vector<8x8xf32> -> vector<8x8xf32>
    %cst_90 = arith.constant dense<0.000000e+00> : vector<64x8xf32>
    %225 = tpu.matmul %221, %224, %cst_90 {dimension_numbers = #tpu.dot_dimension_numbers<[1], [0], [0], [1], [0, 0, 1, 1], [], []>} : vector<64x8xf32>, vector<8x8xf32>, vector<64x8xf32> -> vector<64x8xf32>
    %226 = tpu.transpose %219, [1, 0] : vector<8x8xf32> -> vector<8x8xf32>
    %cst_91 = arith.constant dense<0.000000e+00> : vector<64x8xf32>
    %227 = tpu.matmul %223, %226, %cst_91 {dimension_numbers = #tpu.dot_dimension_numbers<[1], [0], [0], [1], [0, 0, 1, 1], [], []>} : vector<64x8xf32>, vector<8x8xf32>, vector<64x8xf32> -> vector<64x8xf32>
    %228 = vector.shape_cast %225 : vector<64x8xf32> to vector<8x8x8xf32>
    %c0_92 = arith.constant 0 : index
    %c16 = arith.constant 16 : index
    %c0_93 = arith.constant 0 : index
    %229 = vector.load %arg17[%c0_92, %c16, %c0_93] : memref<8x64x8xf32, #tpu.memory_space<vmem>>, vector<8x8x8xf32>
    tpu.vector_store %arg17[%c0_92, %c16, %c0_93], %228 {strides = array<i32>} : memref<8x64x8xf32, #tpu.memory_space<vmem>>, vector<8x8x8xf32>,
    %230 = vector.shape_cast %227 : vector<64x8xf32> to vector<8x8x8xf32>
    %c0_94 = arith.constant 0 : index
    %c48 = arith.constant 48 : index
    %c0_95 = arith.constant 0 : index
    %231 = vector.load %arg17[%c0_94, %c48, %c0_95] : memref<8x64x8xf32, #tpu.memory_space<vmem>>, vector<8x8x8xf32>
    tpu.vector_store %arg17[%c0_94, %c48, %c0_95], %230 {strides = array<i32>} : memref<8x64x8xf32, #tpu.memory_space<vmem>>, vector<8x8x8xf32>,
    %232 = vector.extract_strided_slice %55 {offsets = [0, 0, 3], sizes = [8, 8, 1], strides = [1, 1, 1]} : vector<8x8x8xf32> to vector<8x8x1xf32>
    %cst_96 = arith.constant dense<0.000000e+00> : vector<8x8xf32>
    %233 = vector.multi_reduction <add>, %232, %cst_96 [2] : vector<8x8x1xf32> to vector<8x8xf32>
    %234 = arith.addf %233, %49 : vector<8x8xf32>
    %235 = vector.extract_strided_slice %55 {offsets = [0, 0, 7], sizes = [8, 8, 1], strides = [1, 1, 1]} : vector<8x8x8xf32> to vector<8x8x1xf32>
    %cst_97 = arith.constant dense<0.000000e+00> : vector<8x8xf32>
    %236 = vector.multi_reduction <add>, %235, %cst_97 [2] : vector<8x8x1xf32> to vector<8x8xf32>
    %237 = arith.addf %236, %49 : vector<8x8xf32>
    %cst_98 = arith.constant dense<0xFF800000> : vector<8xf32>
    %238 = vector.multi_reduction <maximumf>, %234, %cst_98 [1] : vector<8x8xf32> to vector<8xf32>
    %239 = vector.shape_cast %238 : vector<8xf32> to vector<8x1xf32>
    %240 = vector.broadcast %239 : vector<8x1xf32> to vector<8x8xf32>
    %241 = arith.subf %234, %240 : vector<8x8xf32>
    %242 = math.exp %241 : vector<8x8xf32>
    %cst_99 = arith.constant dense<0.000000e+00> : vector<8xf32>
    %243 = vector.multi_reduction <add>, %242, %cst_99 [1] : vector<8x8xf32> to vector<8xf32>
    %244 = vector.shape_cast %243 : vector<8xf32> to vector<8x1xf32>
    %245 = vector.broadcast %244 : vector<8x1xf32> to vector<8x8xf32>
    %246 = arith.divf %242, %245 : vector<8x8xf32>
    %247 = arith.negf %237 : vector<8x8xf32>
    %248 = math.exp %247 : vector<8x8xf32>
    %cst_100 = arith.constant 1.000000e+00 : f32
    %249 = vector.broadcast %cst_100 : f32 to vector<8x8xf32>
    %250 = arith.addf %249, %248 : vector<8x8xf32>
    %251 = arith.divf %249, %250 : vector<8x8xf32>
    %252 = arith.mulf %246, %251 : vector<8x8xf32>
    %253 = vector.extract_strided_slice %61 {offsets = [0, 0, 3], sizes = [8, 8, 1], strides = [1, 1, 1]} : vector<8x8x8xf32> to vector<8x8x1xf32>
    %cst_101 = arith.constant dense<0.000000e+00> : vector<8x8xf32>
    %254 = vector.multi_reduction <add>, %253, %cst_101 [2] : vector<8x8x1xf32> to vector<8x8xf32>
    %255 = vector.extract_strided_slice %61 {offsets = [0, 0, 7], sizes = [8, 8, 1], strides = [1, 1, 1]} : vector<8x8x8xf32> to vector<8x8x1xf32>
    %cst_102 = arith.constant dense<0.000000e+00> : vector<8x8xf32>
    %256 = vector.multi_reduction <add>, %255, %cst_102 [2] : vector<8x8x1xf32> to vector<8x8xf32>
    %cst_103 = arith.constant dense<0xFF800000> : vector<8xf32>
    %257 = vector.multi_reduction <maximumf>, %254, %cst_103 [1] : vector<8x8xf32> to vector<8xf32>
    %258 = vector.shape_cast %257 : vector<8xf32> to vector<8x1xf32>
    %259 = vector.broadcast %258 : vector<8x1xf32> to vector<8x8xf32>
    %260 = arith.subf %254, %259 : vector<8x8xf32>
    %261 = math.exp %260 : vector<8x8xf32>
    %cst_104 = arith.constant dense<0.000000e+00> : vector<8xf32>
    %262 = vector.multi_reduction <add>, %261, %cst_104 [1] : vector<8x8xf32> to vector<8xf32>
    %263 = vector.shape_cast %262 : vector<8xf32> to vector<8x1xf32>
    %264 = vector.broadcast %263 : vector<8x1xf32> to vector<8x8xf32>
    %265 = arith.divf %261, %264 : vector<8x8xf32>
    %266 = arith.negf %256 : vector<8x8xf32>
    %267 = math.exp %266 : vector<8x8xf32>
    %cst_105 = arith.constant 1.000000e+00 : f32
    %268 = vector.broadcast %cst_105 : f32 to vector<8x8xf32>
    %269 = arith.addf %268, %267 : vector<8x8xf32>
    %270 = arith.divf %268, %269 : vector<8x8xf32>
    %271 = arith.mulf %265, %270 : vector<8x8xf32>
    %272 = vector.extract_strided_slice %74 {offsets = [0, 24, 0], sizes = [8, 8, 8], strides = [1, 1, 1]} : vector<8x32x8xf32> to vector<8x8x8xf32>
    %273 = vector.shape_cast %272 : vector<8x8x8xf32> to vector<64x8xf32>
    %274 = vector.extract_strided_slice %75 {offsets = [0, 24, 0], sizes = [8, 8, 8], strides = [1, 1, 1]} : vector<8x32x8xf32> to vector<8x8x8xf32>
    %275 = vector.shape_cast %274 : vector<8x8x8xf32> to vector<64x8xf32>
    %276 = tpu.transpose %252, [1, 0] : vector<8x8xf32> -> vector<8x8xf32>
    %cst_106 = arith.constant dense<0.000000e+00> : vector<64x8xf32>
    %277 = tpu.matmul %273, %276, %cst_106 {dimension_numbers = #tpu.dot_dimension_numbers<[1], [0], [0], [1], [0, 0, 1, 1], [], []>} : vector<64x8xf32>, vector<8x8xf32>, vector<64x8xf32> -> vector<64x8xf32>
    %278 = tpu.transpose %271, [1, 0] : vector<8x8xf32> -> vector<8x8xf32>
    %cst_107 = arith.constant dense<0.000000e+00> : vector<64x8xf32>
    %279 = tpu.matmul %275, %278, %cst_107 {dimension_numbers = #tpu.dot_dimension_numbers<[1], [0], [0], [1], [0, 0, 1, 1], [], []>} : vector<64x8xf32>, vector<8x8xf32>, vector<64x8xf32> -> vector<64x8xf32>
    %280 = vector.shape_cast %277 : vector<64x8xf32> to vector<8x8x8xf32>
    %c0_108 = arith.constant 0 : index
    %c24 = arith.constant 24 : index
    %c0_109 = arith.constant 0 : index
    %281 = vector.load %arg17[%c0_108, %c24, %c0_109] : memref<8x64x8xf32, #tpu.memory_space<vmem>>, vector<8x8x8xf32>
    tpu.vector_store %arg17[%c0_108, %c24, %c0_109], %280 {strides = array<i32>} : memref<8x64x8xf32, #tpu.memory_space<vmem>>, vector<8x8x8xf32>,
    %282 = vector.shape_cast %279 : vector<64x8xf32> to vector<8x8x8xf32>
    %c0_110 = arith.constant 0 : index
    %c56 = arith.constant 56 : index
    %c0_111 = arith.constant 0 : index
    %283 = vector.load %arg17[%c0_110, %c56, %c0_111] : memref<8x64x8xf32, #tpu.memory_space<vmem>>, vector<8x8x8xf32>
    tpu.vector_store %arg17[%c0_110, %c56, %c0_111], %282 {strides = array<i32>} : memref<8x64x8xf32, #tpu.memory_space<vmem>>, vector<8x8x8xf32>,
    %c0_112 = arith.constant 0 : index
    %c0_113 = arith.constant 0 : index
    %c0_114 = arith.constant 0 : index
    %284 = vector.load %arg17[%c0_112, %c0_113, %c0_114] : memref<8x64x8xf32, #tpu.memory_space<vmem>>, vector<8x64x8xf32>
    %285 = tpu.transpose %284, [0, 2, 1] : vector<8x64x8xf32> -> vector<8x8x64xf32>
    %286 = vector.shape_cast %285 : vector<8x8x64xf32> to vector<64x64xf32>
    %c0_115 = arith.constant 0 : index
    %c0_116 = arith.constant 0 : index
    %287 = vector.load %arg14[%c0_115, %c0_116] : memref<64x32xf32, #tpu.memory_space<vmem>>, vector<64x32xf32>
    %cst_117 = arith.constant dense<0.000000e+00> : vector<64x32xf32>
    %288 = tpu.matmul %286, %287, %cst_117 {dimension_numbers = #tpu.dot_dimension_numbers<[1], [0], [0], [1], [0, 0, 1, 1], [], []>} : vector<64x64xf32>, vector<64x32xf32>, vector<64x32xf32> -> vector<64x32xf32>
    %c0_118 = arith.constant 0 : index
    %c0_119 = arith.constant 0 : index
    %289 = vector.load %arg15[%c0_118, %c0_119] : memref<1x32xf32, #tpu.memory_space<vmem>>, vector<1x32xf32>
    %290 = vector.broadcast %289 : vector<1x32xf32> to vector<64x32xf32>
    %291 = arith.addf %288, %290 : vector<64x32xf32>
    %292 = vector.shape_cast %291 : vector<64x32xf32> to vector<1x8x8x32xf32>
    %c0_120 = arith.constant 0 : index
    %c0_121 = arith.constant 0 : index
    %c0_122 = arith.constant 0 : index
    %c0_123 = arith.constant 0 : index
    %293 = vector.load %arg16[%c0_120, %c0_121, %c0_122, %c0_123] : memref<1x8x8x32xf32, #tpu.memory_space<vmem>>, vector<1x8x8x32xf32>
    tpu.vector_store %arg16[%c0_120, %c0_121, %c0_122, %c0_123], %292 {strides = array<i32>} : memref<1x8x8x32xf32, #tpu.memory_space<vmem>>, vector<1x8x8x32xf32>,
    return
  }
  func.func @transform_0(%arg0: i32) -> (i32, i32, i32, i32) {
    %c0_i32 = arith.constant 0 : i32
    %c0_i32_0 = arith.constant 0 : i32
    %c0_i32_1 = arith.constant 0 : i32
    %c0_i32_2 = arith.constant 0 : i32
    return %arg0, %c0_i32, %c0_i32_0, %c0_i32_1 : i32, i32, i32, i32
  }
  func.func @transform_1(%arg0: i32) -> (i32, i32, i32, i32) {
    %c0_i32 = arith.constant 0 : i32
    %c0_i32_0 = arith.constant 0 : i32
    %c0_i32_1 = arith.constant 0 : i32
    %c0_i32_2 = arith.constant 0 : i32
    return %arg0, %c0_i32, %c0_i32_0, %c0_i32_1 : i32, i32, i32, i32
  }
  func.func @transform_2(%arg0: i32) -> (i32, i32, i32) {
    %c0_i32 = arith.constant 0 : i32
    %c0_i32_0 = arith.constant 0 : i32
    %c0_i32_1 = arith.constant 0 : i32
    return %arg0, %c0_i32, %c0_i32_0 : i32, i32, i32
  }
  func.func @transform_3(%arg0: i32) -> (i32, i32) {
    %c0_i32 = arith.constant 0 : i32
    %c0_i32_0 = arith.constant 0 : i32
    %c0_i32_1 = arith.constant 0 : i32
    return %c0_i32, %c0_i32_0 : i32, i32
  }
  func.func @transform_4(%arg0: i32) -> (i32, i32) {
    %c0_i32 = arith.constant 0 : i32
    %c0_i32_0 = arith.constant 0 : i32
    %c0_i32_1 = arith.constant 0 : i32
    return %c0_i32, %c0_i32_0 : i32, i32
  }
  func.func @transform_5(%arg0: i32) -> (i32, i32) {
    %c0_i32 = arith.constant 0 : i32
    %c0_i32_0 = arith.constant 0 : i32
    %c0_i32_1 = arith.constant 0 : i32
    return %c0_i32, %c0_i32_0 : i32, i32
  }
  func.func @transform_6(%arg0: i32) -> (i32, i32) {
    %c0_i32 = arith.constant 0 : i32
    %c0_i32_0 = arith.constant 0 : i32
    %c0_i32_1 = arith.constant 0 : i32
    return %c0_i32, %c0_i32_0 : i32, i32
  }
  func.func @transform_7(%arg0: i32) -> (i32, i32) {
    %c0_i32 = arith.constant 0 : i32
    %c0_i32_0 = arith.constant 0 : i32
    %c0_i32_1 = arith.constant 0 : i32
    return %c0_i32, %c0_i32_0 : i32, i32
  }
  func.func @transform_8(%arg0: i32) -> (i32, i32) {
    %c0_i32 = arith.constant 0 : i32
    %c0_i32_0 = arith.constant 0 : i32
    %c0_i32_1 = arith.constant 0 : i32
    return %c0_i32, %c0_i32_0 : i32, i32
  }
  func.func @transform_9(%arg0: i32) -> (i32, i32) {
    %c0_i32 = arith.constant 0 : i32
    %c0_i32_0 = arith.constant 0 : i32
    %c0_i32_1 = arith.constant 0 : i32
    return %c0_i32, %c0_i32_0 : i32, i32
  }
  func.func @transform_10(%arg0: i32) -> (i32, i32) {
    %c0_i32 = arith.constant 0 : i32
    %c0_i32_0 = arith.constant 0 : i32
    %c0_i32_1 = arith.constant 0 : i32
    return %c0_i32, %c0_i32_0 : i32, i32
  }
  func.func @transform_11(%arg0: i32) -> (i32, i32) {
    %c0_i32 = arith.constant 0 : i32
    %c0_i32_0 = arith.constant 0 : i32
    %c0_i32_1 = arith.constant 0 : i32
    return %c0_i32, %c0_i32_0 : i32, i32
  }
  func.func @transform_12(%arg0: i32) -> (i32, i32) {
    %c0_i32 = arith.constant 0 : i32
    %c0_i32_0 = arith.constant 0 : i32
    %c0_i32_1 = arith.constant 0 : i32
    return %c0_i32, %c0_i32_0 : i32, i32
  }
  func.func @transform_13(%arg0: i32) -> (i32, i32) {
    %c0_i32 = arith.constant 0 : i32
    %c0_i32_0 = arith.constant 0 : i32
    %c0_i32_1 = arith.constant 0 : i32
    return %c0_i32, %c0_i32_0 : i32, i32
  }
  func.func @transform_14(%arg0: i32) -> (i32, i32) {
    %c0_i32 = arith.constant 0 : i32
    %c0_i32_0 = arith.constant 0 : i32
    %c0_i32_1 = arith.constant 0 : i32
    return %c0_i32, %c0_i32_0 : i32, i32
  }
  func.func @transform_15(%arg0: i32) -> (i32, i32, i32, i32) {
    %c0_i32 = arith.constant 0 : i32
    %c0_i32_0 = arith.constant 0 : i32
    %c0_i32_1 = arith.constant 0 : i32
    %c0_i32_2 = arith.constant 0 : i32
    return %arg0, %c0_i32, %c0_i32_0, %c0_i32_1 : i32, i32, i32, i32
  }
}

</mosaic_0001>

<bundles_post_ra>
// kernel: tpu_custom_call.1
= control target key start
LH: loop header
LB: loop body
LE: loop exit
PB: predicated region body
PF: predicated region fallthrough
CT: control target
= control target key end

     0   :  { %s10608_s0 = inlined_call_operand.vmem [shape: f32[2,8,8,32], index: 0, kind: input, shape index: {}]   ;;  %s10609_s1 = inlined_call_operand.hbm [shape: f32[2,8,8,32], index: 1, kind: input, shape index: {}]   ;;  %s10610_s2 = inlined_call_operand.hbm [shape: f32[2,8,8], index: 2, kind: input, shape index: {}]   ;;  %s10611_s3 = inlined_call_operand.vmem [shape: f32[1,32], index: 3, kind: input, shape index: {}]   ;;  %s10612_s4 = inlined_call_operand.vmem [shape: f32[1,32], index: 4, kind: input, shape index: {}]   ;;  %s10613_s5 = inlined_call_operand.vmem [shape: f32[32,8], index: 5, kind: input, shape index: {}]   ;;  %s10614_s6 = inlined_call_operand.hbm [shape: f32[1,8], index: 6, kind: input, shape index: {}]   ;;  %s10615_s7 = inlined_call_operand.vmem [shape: f32[32,8], index: 7, kind: input, shape index: {}]   ;;  %s10616_s8 = inlined_call_operand.vmem [shape: f32[1,8], index: 8, kind: input, shape index: {}]   ;;  %s10617_s9 = inlined_call_operand.vmem [shape: f32[32,32], index: 9, kind: input, shape index: {}]   ;;  %s10618_s10 = inlined_call_operand.vmem [shape: f32[1,32], index: 10, kind: input, shape index: {}]   ;;  %s10619_s11 = inlined_call_operand.hbm [shape: f32[32,32], index: 11, kind: input, shape index: {}]   ;;  %s10620_s12 = inlined_call_operand.vmem [shape: f32[1,32], index: 12, kind: input, shape index: {}]   ;;  %s10621_s13 = inlined_call_operand.vmem [shape: f32[64,32], index: 13, kind: input, shape index: {}]   ;;  %s10622_s14 = inlined_call_operand.vmem [shape: f32[1,32], index: 14, kind: input, shape index: {}]   ;;  %s10623_s15 = inlined_call_operand.hbm [shape: f32[2,8,8,32], index: 15, kind: output, shape index: {}]  }
   0x1   :  { %10722 = sst [smem:[#allocation140_spill]] %s10614_s6 }
   0x2   :  { %10723 = sst [smem:[#allocation141_spill]] %s10616_s8 }
   0x3   :  { %10724 = sst [smem:[#allocation142_spill]] %s10618_s10 }
   0x4   :  { %10725 = sst [smem:[#allocation143_spill]] %s10620_s12 }
   0x5   :  { %10726 = sst [smem:[#allocation144_spill]] %s10621_s13 }
   0x6   :  { %10727 = sst [smem:[#allocation145_spill]] %s10622_s14 }
   0x7   :  { %10728 = sst [smem:[#allocation146_spill]] %s10623_s15 }
   0x8   :  { %20 = vsyncpa [#allocation4], 0 }
   0x9   :  { %22 = vsyncpa [#allocation4 + $0x1], 0 }
   0xa   :  { %23 = vsyncpa [#allocation7], 0 }
   0xb   :  { %25 = vsyncpa [#allocation7 + $0x1], 0 }
   0xc   :  { %26 = vsyncpa [#allocation10], 0 }
   0xd   :  { %27 = vsyncpa [#allocation5], 0 }
   0xe   :  { %29 = vsyncpa [#allocation5 + $0x1], 0  ;;  %s8017_s18 = smov 0   ;;  %s8019_s19 = smov 0  }
   0xf   :  { %s8021_s20 = smov 0   ;;  %s8023_s21 = smov 0  }
  0x10 LB: > { %10729 = sst [smem:[#allocation17_spill]] %s7909_s18  ;;  %s8038_s22 = sadd.s32 4294967295, %s7921_s21   ;;  %s7921_s21 = sphi %s8023_s21, %s11024_s21   ;;  %s7917_s20 = sphi %s8021_s20, %s11026_s20   ;;  %s7913_s19 = sphi %s8019_s19, %s11028_s19   ;;  %s7909_s18 = sphi %s8017_s18, %s11027_s18  }
  0x11   : > { %10730 = sst [smem:[#allocation18_spill]] %s7917_s20  ;;  %s6639_s23 = sadd.s32 4294967294, %s7921_s21  }
  0x12   : > { %s8042_s24 = sadd.s32 1, %s7921_s21   ;;  %s68_s25 = sadd.s32 1, %s7917_s20 }
  0x13   : > { %10731 = sst [smem:[#allocation19_spill]] %s8042_s24  ;;  %s65_s26 = ssub.s32 %s7921_s21, %s8042_s24 }
  0x14   : > { %p75_p0 = scmp.ne.s32.totalorder %s7917_s20, %s7913_s19  ;;  %p66_p1 = scmp.eq.s32.totalorder %s65_s26, 0 }
  0x15   : > { %p76_p2 = scmp.eq.s32.totalorder %s7921_s21, 0  ;;  %p81_p3 = scmp.ne.s32.totalorder %s7913_s19, %s7909_s18 }
  0x16   : > { %p10624_p4 = scmp.eq.s32.totalorder %s8038_s22, 0  ;;  %p383_p7 = scmp.eq.s32.totalorder %s8038_s22, 1 }
  0x17   : > { %s8054_s27 = scalar_select %p66_p1, %s7917_s20, %s68_s25  }
  0x18   : > { %p8056_p5 = por %p76_p2, %p75_p0  ;;  %p8062_p6 = por %p10624_p4, %p81_p3 }
  0x19   : > { %10732 = sst [smem:[#allocation20_spill]] %s8054_s27  ;;  %p389_p8 = scmp.eq.s32.totalorder %s6639_s23, 1 }
  0x1a   : > { %s10734_s29 = scalar_select %p8062_p6, 1, 0 }
  0x1b   : > { %p6640_p9 = scmp.ge.s32.totalorder %s7921_s21, 1  ;;  %p396_p10 = scmp.lt.s32.totalorder %s7921_s21, 3 }
  0x1c   : > { %p8069_p11 = por %p383_p7, %p75_p0  ;;  %p8073_p12 = por %p389_p8, %p81_p3 }
  0x1d   : > { %p8077_p13 = pnand %p6640_p9, %p396_p10  ;;  %s7923_s25 = smov [#allocation8]  }
  0x1e   : > { %s10735_s30 = scalar_select %p8069_p11, 1, 0 }
  0x1f   : > { %s10737_s16 = scalar_select %p8073_p12, 1, 0 }
  0x20   : > { %10736 = sst [smem:[#allocation21_spill]] %s10735_s30  ;;  %p7222_p2 = pneg %p8077_p13 }
  0x21   : > { %10738 = sst [smem:[#allocation22_spill]] %s10737_s16  ;;  %s418_s23 = sshll.u32 %s7923_s25, 4  ;;  %s419_s23 = int_to_ptr.vmem [resolvable:$true] %s418_s23 }
  0x22   : > { %s10739_s17 = scalar_select %p8077_p13, 1, 0 }
  0x23   : > { %p7242_p4 = scmp.lt.s32.totalorder %s7921_s21, 2  ;;  %p10740_p0 = scmp.eq.s32.totalorder %s8038_s22, 0 }
  0x24   : > { %s7924_s24 = smov [#allocation9]   ;;  %s10743_s6 = sld [smem:[#allocation140_spill]] }
  0x25   : > { %p8087_p7 = pnand %p7222_p2, %p10740_p0  ;;  %p8093_p3 = pnand %p7242_p4, %p8056_p5 }
  0x26   : > { %s440_s16 = sshll.u32 %s7924_s24, 4  ;;  %s8097_s16 = int_to_ptr.vmem [resolvable:$true] %s440_s16 }
  0x27   : > { %s10742_s27 = scalar_select %p8093_p3, 1, 0 }
  0x28   : > { %p7729_p9 = pneg %p8087_p7 }
  0x2a   : > { %s7727_s15 = scalar_lea.hbm %s10743_s6, 16 }
  0x2b   : > { %p7728_p8 = scmp.ne.s32.totalorder %s10743_s6, %s7727_s15  ;;  %p7734_p10 = scmp.lt.u32.totalorder %s7727_s15, %s10743_s6 }
  0x2d   : > { %p7730_p4 = pnand %p7729_p9, %p7728_p8 }
  0x2f   : > { %p7731_p5 = pneg %p7730_p4 }
  0x31   : > { %p7736_p2 = pnand %p7734_p10, %p7731_p5 }
  0x33   : > { %7739 = shalt.err (!%p7736_p2)
}
  0x34   : > { %s7740_s24 = scalar_lea.vmem %s419_s23, 16  ;;  %s7747_s14 = scalar_lea.vmem %s419_s23, 32 }
  0x35   : > { %p7741_p0 = scmp.ne.s32.totalorder %s419_s23, %s7740_s24  ;;  %p7748_p11 = scmp.lt.s32.totalorder %s419_s23, %s419_s23 }
  0x36   : > { %p7749_p6 = scmp.lt.s32.totalorder %s7747_s14, %s7740_s24 }
  0x37   : > { %p7743_p1 = pnand %p7741_p0, %p7729_p9 }
  0x38   : > { %p7750_p13 = por %p7749_p6, %p7748_p11 }
  0x39   : > { %p7744_p12 = pneg %p7743_p1 }
  0x3b   : > { %p7751_p3 = pnand %p7750_p13, %p7744_p12 }
  0x3d   : > { %7754 = shalt.err (!%p7751_p3)
}
  0x3e   : > { %7225 = dma.hbm_to_vmem [thread:$0]  (!%p8087_p7), %s10743_s6, 16, %s419_s23, [#allocation7]  }
  0x3f   : > { %s8122_s15 = sand.u32 1, %s7917_s20   ;;  %s7755_s28 = scalar_lea.hbm %s10619_s11, 512 }
  0x40   : > { %p7756_p6 = scmp.ne.s32.totalorder %s10619_s11, %s7755_s28  ;;  %p7762_p13 = scmp.lt.u32.totalorder %s7755_s28, %s10619_s11 }
  0x42   : > { %p7758_p11 = pnand %p7756_p6, %p7729_p9 }
  0x44   : > { %p7759_p12 = pneg %p7758_p11 }
  0x46   : > { %p7764_p1 = pnand %p7762_p13, %p7759_p12 }
  0x48   : > { %7767 = shalt.err (!%p7764_p1)
}
  0x49   : > { %s7768_s23 = scalar_lea.vmem %s8097_s16, 512  ;;  %p7776_p5 = scmp.lt.s32.totalorder %s8097_s16, %s8097_s16 }
  0x4a   : > { %p7769_p3 = scmp.ne.s32.totalorder %s8097_s16, %s7768_s23  ;;  %p7777_p10 = scmp.lt.s32.totalorder %s7768_s23, %s7768_s23 }
  0x4c   : > { %p7771_p8 = pnand %p7769_p3, %p7729_p9  ;;  %p7778_p2 = por %p7777_p10, %p7776_p5 }
  0x4e   : > { %p7772_p4 = pneg %p7771_p8 }
  0x50   : > { %p7779_p0 = pnand %p7778_p2, %p7772_p4 }
  0x52   : > { %7782 = shalt.err (!%p7779_p0)
}
  0x53   : > { %s7925_s8 = smov 128   ;;  %s7926_s12 = smov 8  }
  0x54   : > { %7228 = dma.hbm_to_vmem [thread:$0]  (!%p8087_p7), %s10619_s11, 512, %s8097_s16, [#allocation10], %s7925_s8, %s7925_s8, %s7926_s12  }
  0x55   : > { %s6644_s30 = sshll.u32 %s8122_s15, 6  ;;  %s6797_s25 = sshll.u32 %s7921_s21, 10 }
  0x56   : > { %s8157_s14 = scalar_lea.hbm %s10609_s1, %s6797_s25  ;;  %s475_s23 = scalar_lea.vmem [#allocation3], %s6644_s30 }
  0x57   : > { %s482_s26 = sshll.u32 %s475_s23, 4  ;;  %s492_s6 = sand.u32 1, %s7921_s21   ;;  %s8159_s26 = int_to_ptr.vmem [resolvable:$true] %s482_s26 }
  0x58   : > { %s472_s20 = scalar_lea.sflag [#allocation4], %s8122_s15  ;;  %s7783_s10 = scalar_lea.hbm %s8157_s14, 1024 }
  0x59   : > { %p7784_p9 = scmp.ne.s32.totalorder %s8157_s14, %s7783_s10  ;;  %p10744_p7 = scmp.ne.s32.totalorder %s10742_s27, 0 }
  0x5a   : > { %s7788_s13 = scalar_lea.hbm %s10609_s1, 2048  ;;  %p7789_p13 = scmp.lt.u32.totalorder %s8157_s14, %s10609_s1 }
  0x5b   : > { %p7785_p6 = pneg %p10744_p7  ;;  %p7790_p1 = scmp.lt.u32.totalorder %s7788_s13, %s7783_s10 }
  0x5c   : > { %p7792_p8 = scmp.lt.u32.totalorder %s7783_s10, %s8157_s14 }
  0x5d   : > { %p7786_p11 = pnand %p7785_p6, %p7784_p9  ;;  %p7791_p3 = por %p7790_p1, %p7789_p13 }
  0x5f   : > { %p7787_p12 = pneg %p7786_p11  ;;  %p7793_p4 = por %p7792_p8, %p7791_p3 }
  0x61   : > { %p7794_p5 = pnand %p7793_p4, %p7787_p12 }
  0x63   : > { %7797 = shalt.err (!%p7794_p5)
}
  0x64   : > { %s7798_s30 = scalar_lea.vmem %s8159_s26, 1024  ;;  %s7927_s24 = smov [#allocation3]  }
  0x65   : > { %p7799_p10 = scmp.ne.s32.totalorder %s8159_s26, %s7798_s30  ;;  %s7803_s23 = sshll.u32 %s7927_s24, 4  ;;  %s7804_s23 = int_to_ptr.vmem [resolvable:$false] %s7803_s23 }
  0x66   : > { %s7805_s16 = scalar_lea.vmem %s7804_s23, 2048  ;;  %p7806_p9 = scmp.lt.s32.totalorder %s8159_s26, %s7804_s23 }
  0x67   : > { %p7801_p2 = pnand %p7799_p10, %p7785_p6  ;;  %p7807_p11 = scmp.lt.s32.totalorder %s7805_s16, %s7798_s30 }
  0x69   : > { %p7802_p0 = pneg %p7801_p2  ;;  %p7808_p13 = por %p7807_p11, %p7806_p9 }
  0x6b   : > { %p7809_p1 = pnand %p7808_p13, %p7802_p0 }
  0x6d   : > { %7812 = shalt.err (!%p7809_p1)
}
  0x6e   : > { %7232 = dma.hbm_to_vmem [thread:$0]  (!%p10744_p7), %s8157_s14, 1024, %s8159_s26, %s472_s20, %s7925_s8, %s7925_s8, %s7926_s12  }
  0x6f   : > { %s6647_s10 = sshll.u32 %s8122_s15, 3  ;;  %s6648_s18 = sshll.u32 %s7921_s21, 7 }
  0x70   : > { %s8198_s28 = scalar_lea.hbm %s10610_s2, %s6648_s18  ;;  %s496_s30 = scalar_lea.vmem [#allocation6], %s6647_s10 }
  0x71   : > { %s503_s24 = sshll.u32 %s496_s30, 4  ;;  %s493_s23 = scalar_lea.sflag [#allocation7], %s492_s6  ;;  %s504_s24 = int_to_ptr.vmem [resolvable:$true] %s503_s24 }
  0x72   : > { %s7813_s16 = scalar_lea.hbm %s8198_s28, 128  ;;  %s7818_s8 = scalar_lea.hbm %s10610_s2, 256 }
  0x73   : > { %p7814_p12 = scmp.ne.s32.totalorder %s8198_s28, %s7813_s16  ;;  %p7819_p4 = scmp.lt.u32.totalorder %s8198_s28, %s10610_s2 }
  0x74   : > { %p7820_p5 = scmp.lt.u32.totalorder %s7818_s8, %s7813_s16  ;;  %p7822_p2 = scmp.lt.u32.totalorder %s7813_s16, %s8198_s28 }
  0x75   : > { %p7816_p3 = pnand %p7814_p12, %p7785_p6 }
  0x76   : > { %p7821_p10 = por %p7820_p5, %p7819_p4 }
  0x77   : > { %p7817_p8 = pneg %p7816_p3 }
  0x78   : > { %p7823_p0 = por %p7822_p2, %p7821_p10 }
  0x7a   : > { %p7824_p9 = pnand %p7823_p0, %p7817_p8 }
  0x7c   : > { %7827 = shalt.err (!%p7824_p9)
}
  0x7d   : > { %s7828_s6 = scalar_lea.vmem %s504_s24, 128  ;;  %s7928_s26 = smov [#allocation6]  }
  0x7e   : > { %p7829_p11 = scmp.ne.s32.totalorder %s504_s24, %s7828_s6  ;;  %s7833_s10 = sshll.u32 %s7928_s26, 4  ;;  %s7834_s10 = int_to_ptr.vmem [resolvable:$false] %s7833_s10 }
  0x7f   : > { %s7835_s18 = scalar_lea.vmem %s7834_s10, 256  ;;  %p7836_p12 = scmp.lt.s32.totalorder %s504_s24, %s7834_s10 }
  0x80   : > { %p7831_p13 = pnand %p7829_p11, %p7785_p6  ;;  %p7837_p3 = scmp.lt.s32.totalorder %s7835_s18, %s7828_s6 }
  0x82   : > { %p7832_p1 = pneg %p7831_p13  ;;  %p7838_p4 = por %p7837_p3, %p7836_p12 }
  0x84   : > { %p7839_p5 = pnand %p7838_p4, %p7832_p1 }
  0x86   : > { %7842 = shalt.err (!%p7839_p5)
}
  0x87   : > { %7235 = dma.hbm_to_vmem [thread:$0]  (!%p10744_p7), %s8198_s28, 128, %s504_s24, %s493_s23  }
  0x88   : > { %p10745_p8 = scmp.ne.s32.totalorder %s10739_s17, 0 }
  0x8a   : > { %512 = sbr.rel (%p10745_p8) target bundleno = 2947 (0xb83), region = 80 }
  0x91   : > { %s8224_s13 = sand.u32 1, %s7913_s19   ;;  %p10746_p6 = scmp.ne.s32.totalorder %s10734_s29, 0 }
  0x92   : > { %s6650_s25 = sshll.u32 %s8224_s13, 6  ;;  %s515_s30 = scalar_lea.sflag [#allocation4], %s8224_s13 }
  0x93   : > { %s8230_s16 = scalar_lea.vmem [#allocation3], %s6650_s25 }
  0x94   : > { %7888 = dma.done.wait (%p10746_p6), %s515_s30, 1024  }
  0x95   : > { %7890 = vsyncadd (%p10746_p6), %s515_s30, 4294966272  ;;  %s523_s27 = sand.u32 1, %s8038_s22   ;;  %s6651_s17 = sshll.u32 %s8224_s13, 3 }
  0x96   : > { %s524_s28 = scalar_lea.sflag [#allocation7], %s523_s27  ;;  %s8238_s24 = scalar_lea.vmem [#allocation6], %s6651_s17 }
  0x97   : > { %7892 = dma.done.wait (%p10746_p6), %s524_s28, 128  }
  0x98   : > { %7894 = vsyncadd (%p10746_p6), %s524_s28, 4294967168  ;;  %p10747_p7 = scmp.eq.s32.totalorder %s8038_s22, 0 }
  0x9a   : > { %7896 = dma.done.wait (%p10747_p7), [#allocation7], 16   ;;  %p10748_p10 = pmov %p10747_p7 }
  0x9b   : > { %p10749_p2 = pmov %p10747_p7 }
  0x9c   : > { %7898 = vsyncadd (%p10748_p10), [#allocation7], 4294967280 }
  0x9d   : > { %7900 = dma.done.wait (%p10749_p2), [#allocation10], 512   ;;  %p10750_p0 = pmov %p10749_p2 }
  0x9e   : > { %p592_p9 = scmp.lt.s32.totalorder %s8038_s22, 1  ;;  %v1903_v0 = vlaneseq  ;;  %vm607_vm0 = vcmask 261120   ;;  %v8295_v20 = vld [vmem:[%s8230_s16] sm:$0xff]  ;;  %v8298_v21 = vld [vmem:[%s8230_s16 + $0x8] sm:$0xff]  ;;  %v8305_v24 = vld [vmem:[%s8230_s16 + $0x10] sm:$0xff]  ;;  %s10762_s6 = sld [smem:[#allocation143_spill]] }
  0x9f   : > { %7902 = vsyncadd (%p10750_p0), [#allocation10], 4294966784  ;;  %v749_v22 = vsel %vm607_vm0, %v8295_v20, 0.0  ;;  %v752_v23 = vsel %vm607_vm0, %v8298_v21, 0.0  ;;  %v8308_v25 = vld [vmem:[%s8230_s16 + $0x18] sm:$0xff]  ;;  %v755_v26 = vsel %vm607_vm0, %v8305_v24, 0.0 }
  0xa0   : > { %s593_s23 = scalar_select %p592_p9, %s8038_s22, 1  ;;  %v8254_v1 = vshrl.u32 %v1903_v0, 7  ;;  %v2008_v2 = vand.u32 127, %v1903_v0  ;;  %v758_v27 = vsel %vm607_vm0, %v8308_v25, 0.0  ;;  %v8315_v28 = vld [vmem:[%s8230_s16 + $0x20] sm:$0xff]  ;;  %v8318_v29 = vld [vmem:[%s8230_s16 + $0x28] sm:$0xff] }
  0xa1   : > { %v761_v30 = vsel %vm607_vm0, %v8315_v28, 0.0  ;;  %v764_v31 = vsel %vm607_vm0, %v8318_v29, 0.0  ;;  %v8325_v32 = vld [vmem:[%s8230_s16 + $0x30] sm:$0xff]  ;;  %v8328_v33 = vld [vmem:[%s8230_s16 + $0x38] sm:$0xff]  ;;  %v869_v37 = vld [vmem:[%s8238_s24] sm:$0xff]  ;;  %vm2041_vm1 = vcmask 1041409  }
  0xa2   : > { %s6798_s29 = sshll.u32 %s593_s23, 6  ;;  %v8257_v3 = vsub.s32 %v2008_v2, %v8254_v1  ;;  %v767_v34 = vsel %vm607_vm0, %v8325_v32, 0.0  ;;  %v770_v35 = vsel %vm607_vm0, %v8328_v33, 0.0  ;;  %v8335_v36 = vsub.s32 1, %v8254_v1  ;;  %s7933_s26 = smov 124  }
  0xa3   : > { %s596_s8 = scalar_lea.vmem %s10608_s0, %s6798_s29  ;;  %v8340_v39 = vsub.s32 2, %v8254_v1  ;;  %v8343_v40 = vsub.s32 0, %v8254_v1  ;;  %v8347_v42 = vsub.s32 3, %v8254_v1  ;;  %v8351_v44 = vsub.s32 4, %v8254_v1  ;;  %s10759_s29 = sld [smem:[#allocation142_spill]] }
  0xa4   : > { %v8262_v4 = vld [vmem:[%s596_s8] sm:$0xff]  ;;  %v8264_v5 = vld [vmem:[%s596_s8 + $0x10] sm:$0xff]  ;;  %v8266_v6 = vld [vmem:[%s596_s8 + $0x8] sm:$0xff]  ;;  %10751 = vst [vmem:[#allocation23_spill] sm:$0xff] %v8335_v36  ;;  %v1913_v38 = vrot.slane %v869_v37, %v8335_v36  ;;  %v8355_v46 = vsub.s32 5, %v8254_v1  ;;  %v8359_v48 = vsub.s32 6, %v8254_v1 }
  0xa5   : > { %v608_v7 = vsel %vm607_vm0, %v8262_v4, 0.0  ;;  %v614_v8 = vsel %vm607_vm0, %v8264_v5, 0.0  ;;  %v8272_v9 = vld [vmem:[%s596_s8 + $0x18] sm:$0xff]  ;;  %v611_v10 = vsel %vm607_vm0, %v8266_v6, 0.0  ;;  %v8278_v12 = vld [vmem:[%s596_s8 + $0x20] sm:$0xff]  ;;  %v8280_v13 = vld [vmem:[%s596_s8 + $0x28] sm:$0xff]  ;;  %v1920_v41 = vrot.slane %v869_v37, %v8340_v39 }
  0xa6   : > { %609 = vadd.xlane.f32.xlu0 %v608_v7  ;;  %615 = vadd.xlane.f32.xlu1 %v614_v8  ;;  %v617_v11 = vsel %vm607_vm0, %v8272_v9, 0.0  ;;  %v620_v14 = vsel %vm607_vm0, %v8278_v12, 0.0  ;;  %v623_v15 = vsel %vm607_vm0, %v8280_v13, 0.0  ;;  %v8286_v16 = vld [vmem:[%s596_s8 + $0x30] sm:$0xff]  ;;  %v8288_v17 = vld [vmem:[%s596_s8 + $0x38] sm:$0xff]  ;;  %10752 = vst [vmem:[#allocation24_spill] sm:$0xff] %v8340_v39  ;;  %v1906_v43 = vrot.slane %v869_v37, %v8343_v40 }
  0xa7   : > { %v626_v18 = vsel %vm607_vm0, %v8286_v16, 0.0  ;;  %v629_v19 = vsel %vm607_vm0, %v8288_v17, 0.0  ;;  %10753 = vst [vmem:[#allocation25_spill] sm:$0xff] %v8343_v40  ;;  %10754 = vst [vmem:[#allocation26_spill] sm:$0xff] %v8347_v42  ;;  %v1927_v45 = vrot.slane %v869_v37, %v8347_v42  ;;  %v1934_v47 = vrot.slane %v869_v37, %v8351_v44  ;;  %s10760_s8 = sld [smem:[#allocation141_spill]]  ;;  %s11015_s30 = sld [smem:[#allocation144_spill]] }
  0xa8   : > { %10755 = vst [vmem:[#allocation27_spill] sm:$0xff] %v8351_v44  ;;  %10756 = vst [vmem:[#allocation28_spill] sm:$0xff] %v8355_v46  ;;  %v1941_v49 = vrot.slane %v869_v37, %v8355_v46  ;;  %v8363_v50 = vsub.s32 7, %v8254_v1  ;;  %v1948_v51 = vrot.slane %v869_v37, %v8359_v48  ;;  %vm2043_vm2 = vcmask 1042434   ;;  %s11016_s16 = sld [smem:[#allocation145_spill]]  ;;  %s591_s27 = scalar_lea.vmem [#allocation11], %s6650_s25 }
  0xa9   : > { %10757 = vst [vmem:[#allocation29_spill] sm:$0xff] %v8359_v48  ;;  %vm2045_vm3 = vcmask 1043459   ;;  %v10764_v36 = vmov 3   ;;  %vm2047_vm4 = vcmask 1044484   ;;  %vm2049_vm5 = vcmask 1045509   ;;  %s11017_s17 = sld [smem:[#allocation21_spill]] }
  0xaa   : > { %612 = vadd.xlane.f32.xlu0 %v611_v10  ;;  %618 = vadd.xlane.f32.xlu1 %v617_v11  ;;  %10758 = vst [vmem:[#allocation30_spill] sm:$0xff] %v8363_v50  ;;  %v1955_v52 = vrot.slane %v869_v37, %v8363_v50  ;;  %vm2051_vm6 = vcmask 1046534   ;;  %vm2053_vm7 = vcmask 1047559   ;;  %vm2056_vm8 = vcmask 64512   ;;  %s6799_s25 = sshll.u32 %s8038_s22, 10  ;;  %s6512_s28 = sshll.u32 %s591_s27, 4  ;;  %s10562_s28 = int_to_ptr.vmem [resolvable:$true] %s6512_s28 }
  0xab   : > { %vm6360_vm9 = vcmask 523264   ;;  %s6499_s22 = scalar_lea.sflag [#allocation5], %s8224_s13  ;;  %s7843_s15 = scalar_lea.vmem %s10562_s28, 1024 }
  0xac   : > { %p7844_p11 = scmp.ne.s32.totalorder %s10562_s28, %s7843_s15 }
  0xae   : > { %621 = vadd.xlane.f32.xlu0 %v620_v14  ;;  %624 = vadd.xlane.f32.xlu1 %v623_v15 }
  0xaf   : > { %p11019_p13 = scmp.ne.s32.totalorder %s11017_s17, 0 }
  0xb1   : > { %p7845_p1 = pnand %p7844_p11, %p11019_p13 }
  0xb2   : > { %627 = vadd.xlane.f32.xlu0 %v626_v18  ;;  %630 = vadd.xlane.f32.xlu1 %v629_v19 }
  0xb3   : > { %p7846_p12 = pneg %p7845_p1 }
  0xb6   : > { %750 = vadd.xlane.f32.xlu0 %v749_v22  ;;  %753 = vadd.xlane.f32.xlu1 %v752_v23 }
  0xba   : > { %756 = vadd.xlane.f32.xlu0 %v755_v26  ;;  %759 = vadd.xlane.f32.xlu1 %v758_v27 }
  0xbe   : > { %762 = vadd.xlane.f32.xlu0 %v761_v30  ;;  %765 = vadd.xlane.f32.xlu1 %v764_v31 }
  0xc2   : > { %768 = vadd.xlane.f32.xlu0 %v767_v34  ;;  %771 = vadd.xlane.f32.xlu1 %v770_v35 }
  0xd3   : > { %1915 = vbcast.lane.b32.xlu1 %v1913_v38, 256 }
  0xd7   : > { %1922 = vbcast.lane.b32.xlu1 %v1920_v41, 256 }
  0xd8   : > { %1908 = vbcast.lane.b32.xlu0 %v1906_v43, 256 }
  0xdb   : > { %1929 = vbcast.lane.b32.xlu1 %v1927_v45, 256 }
  0xdc   : > { %1936 = vbcast.lane.b32.xlu0 %v1934_v47, 256 }
  0xdf   : > { %1943 = vbcast.lane.b32.xlu1 %v1941_v49, 256 }
  0xe0   : > { %1950 = vbcast.lane.b32.xlu0 %v1948_v51, 256 }
  0xe3   : > { %1957 = vbcast.lane.b32.xlu1 %v1955_v52, 256 }
 0x133   : > { %v610_v53 = vpop.xlane.xlu0 %609  ;;  %v616_v54 = vpop.xlane.xlu1 %615 }
 0x134   : > { %v633_v55 = vmul.f32 0.03125, %v610_v53  ;;  %v635_v56 = vmul.f32 0.03125, %v616_v54 }
 0x136   : > { %v8368_v57 = vsub.f32 %v8262_v4, %v633_v55  ;;  %v8371_v58 = vsub.f32 %v8264_v5, %v635_v56 }
 0x137   : > { %v613_v59 = vpop.xlane.xlu0 %612  ;;  %v619_v60 = vpop.xlane.xlu1 %618 }
 0x138   : > { %v634_v61 = vmul.f32 0.03125, %v613_v59  ;;  %v636_v62 = vmul.f32 0.03125, %v619_v60  ;;  %v649_v63 = vmul.f32 %v8368_v57, %v8368_v57  ;;  %v651_v0 = vmul.f32 %v8371_v58, %v8371_v58 }
 0x13a   : > { %v8378_v1 = vsub.f32 %v8266_v6, %v634_v61  ;;  %v8381_v2 = vsub.f32 %v8272_v9, %v636_v62  ;;  %v657_v4 = vsel %vm607_vm0, %v649_v63, 0.0  ;;  %v663_v8 = vsel %vm607_vm0, %v651_v0, 0.0 }
 0x13b   : > { %658 = vadd.xlane.f32.xlu0 %v657_v4  ;;  %v622_v5 = vpop.xlane.xlu0 %621  ;;  %v625_v7 = vpop.xlane.xlu1 %624 }
 0x13c   : > { %v637_v10 = vmul.f32 0.03125, %v622_v5  ;;  %v638_v11 = vmul.f32 0.03125, %v625_v7  ;;  %v650_v14 = vmul.f32 %v8378_v1, %v8378_v1  ;;  %v652_v15 = vmul.f32 %v8381_v2, %v8381_v2 }
 0x13e   : > { %v8390_v6 = vsub.f32 %v8278_v12, %v637_v10  ;;  %v8393_v9 = vsub.f32 %v8280_v13, %v638_v11  ;;  %v660_v18 = vsel %vm607_vm0, %v650_v14, 0.0  ;;  %v666_v23 = vsel %vm607_vm0, %v652_v15, 0.0 }
 0x13f   : > { %664 = vadd.xlane.f32.xlu0 %v663_v8  ;;  %661 = vadd.xlane.f32.xlu1 %v660_v18  ;;  %v628_v19 = vpop.xlane.xlu0 %627  ;;  %v631_v22 = vpop.xlane.xlu1 %630 }
 0x140   : > { %v639_v26 = vmul.f32 0.03125, %v628_v19  ;;  %v640_v27 = vmul.f32 0.03125, %v631_v22  ;;  %v653_v30 = vmul.f32 %v8390_v6, %v8390_v6  ;;  %v654_v12 = vmul.f32 %v8393_v9, %v8393_v9 }
 0x142   : > { %v8402_v31 = vsub.f32 %v8286_v16, %v639_v26  ;;  %v8405_v13 = vsub.f32 %v8288_v17, %v640_v27  ;;  %v669_v34 = vsel %vm607_vm0, %v653_v30, 0.0  ;;  %v672_v38 = vsel %vm607_vm0, %v654_v12, 0.0 }
 0x143   : > { %667 = vadd.xlane.f32.xlu1 %v666_v23  ;;  %670 = vadd.xlane.f32.xlu0 %v669_v34  ;;  %v751_v35 = vpop.xlane.xlu0 %750  ;;  %v754_v37 = vpop.xlane.xlu1 %753  ;;  %v871_v34 = vld [vmem:[%s10613_s5 + $0x8] sm:$0xff] }
 0x144   : > { %v773_v41 = vmul.f32 0.03125, %v751_v35  ;;  %v774_v43 = vmul.f32 0.03125, %v754_v37  ;;  %v655_v45 = vmul.f32 %v8402_v31, %v8402_v31  ;;  %v656_v16 = vmul.f32 %v8405_v13, %v8405_v13  ;;  %v872_v37 = vld [vmem:[%s10613_s5 + $0x10] sm:$0xff] }
 0x146   : > { %v8414_v47 = vsub.f32 %v8295_v20, %v773_v41  ;;  %v8417_v17 = vsub.f32 %v8298_v21, %v774_v43  ;;  %v675_v49 = vsel %vm607_vm0, %v655_v45, 0.0  ;;  %v678_v53 = vsel %vm607_vm0, %v656_v16, 0.0  ;;  %v1150_v43 = vld [vmem:[%s10617_s9] sm:$0xff]  ;;  %v1151_v45 = vld [vmem:[%s10617_s9 + $0x8] sm:$0xff] }
 0x147   : > { %673 = vadd.xlane.f32.xlu1 %v672_v38  ;;  %676 = vadd.xlane.f32.xlu0 %v675_v49  ;;  %v757_v51 = vpop.xlane.xlu0 %756  ;;  %v760_v52 = vpop.xlane.xlu1 %759  ;;  %v873_v38 = vld [vmem:[%s10613_s5 + $0x18] sm:$0xff]  ;;  %v8481_v16 = vpack.c.bf16 %v1151_v45, %v1150_v43  ;;  %v1010_v49 = vld [vmem:[%s10615_s7] sm:$0xff] }
 0x148   : > { %v775_v54 = vmul.f32 0.03125, %v757_v51  ;;  %v776_v55 = vmul.f32 0.03125, %v760_v52  ;;  %v789_v56 = vmul.f32 %v8414_v47, %v8414_v47  ;;  %v790_v20 = vmul.f32 %v8417_v17, %v8417_v17  ;;  %v1011_v51 = vld [vmem:[%s10615_s7 + $0x8] sm:$0xff] }
 0x149   : > { %v7160_v41 = vpack.c.bf16 %v873_v38, %v872_v37  ;;  %v8490_v52 = vpack.c.bf16 %v1011_v51, %v1010_v49  ;;  %v8512_v37 = vld [vmem:[%s10611_s3] ss:$0 sm:$0xff] }
 0x14a   : > { %v8426_v59 = vsub.f32 %v8305_v24, %v775_v54  ;;  %v8429_v21 = vsub.f32 %v8308_v25, %v776_v55  ;;  %v797_v60 = vsel %vm607_vm0, %v789_v56, 0.0  ;;  %v800_v63 = vsel %vm607_vm0, %v790_v20, 0.0  ;;  %v8518_v51 = vld [vmem:[%s10612_s4] ss:$0 sm:$0xff] }
 0x14b   : > { %679 = vadd.xlane.f32.xlu1 %v678_v53  ;;  %798 = vadd.xlane.f32.xlu0 %v797_v60  ;;  %v763_v61 = vpop.xlane.xlu0 %762  ;;  %v766_v62 = vpop.xlane.xlu1 %765 }
 0x14c   : > { %v777_v0 = vmul.f32 0.03125, %v763_v61  ;;  %v778_v4 = vmul.f32 0.03125, %v766_v62  ;;  %v791_v5 = vmul.f32 %v8426_v59, %v8426_v59  ;;  %v792_v24 = vmul.f32 %v8429_v21, %v8429_v21 }
 0x14e   : > { %v8438_v7 = vsub.f32 %v8315_v28, %v777_v0  ;;  %v8441_v25 = vsub.f32 %v8318_v29, %v778_v4  ;;  %v803_v8 = vsel %vm607_vm0, %v791_v5, 0.0  ;;  %v806_v14 = vsel %vm607_vm0, %v792_v24, 0.0 }
 0x14f   : > { %801 = vadd.xlane.f32.xlu1 %v800_v63  ;;  %804 = vadd.xlane.f32.xlu0 %v803_v8  ;;  %v769_v10 = vpop.xlane.xlu0 %768  ;;  %v772_v11 = vpop.xlane.xlu1 %771 }
 0x150   : > { %v779_v15 = vmul.f32 0.03125, %v769_v10  ;;  %v780_v18 = vmul.f32 0.03125, %v772_v11  ;;  %v793_v19 = vmul.f32 %v8438_v7, %v8438_v7  ;;  %v794_v28 = vmul.f32 %v8441_v25, %v8441_v25 }
 0x152   : > { %v8450_v22 = vsub.f32 %v8325_v32, %v779_v15  ;;  %v8453_v29 = vsub.f32 %v8328_v33, %v780_v18  ;;  %v809_v23 = vsel %vm607_vm0, %v793_v19, 0.0  ;;  %v812_v26 = vsel %vm607_vm0, %v794_v28, 0.0  ;;  %v870_v33 = vld [vmem:[%s10613_s5] sm:$0xff] }
 0x153   : > { %807 = vadd.xlane.f32.xlu1 %v806_v14  ;;  %810 = vadd.xlane.f32.xlu0 %v809_v23  ;;  %v7156_v35 = vpack.c.bf16 %v871_v34, %v870_v33  ;;  %v8493_v53 = vpop.permute.xlu1 %1915  ;;  %v8497_v55 = vpop.permute.xlu0 %1908 }
 0x154   : > { %v795_v27 = vmul.f32 %v8450_v22, %v8450_v22  ;;  %v796_v30 = vmul.f32 %v8453_v29, %v8453_v29 }
 0x155   : > { %7157 = vmatprep.subr.bf16.mxu0 %v7156_v35  ;;  %7204 = vmatprep.subr.bf16.mxu1 %v7156_v35 }
 0x156   : > { %v815_v12 = vsel %vm607_vm0, %v795_v27, 0.0  ;;  %v818_v32 = vsel %vm607_vm0, %v796_v30, 0.0  ;;  %7159 = vmatpush3.bf16.msra.mxu0 %v7156_v35  ;;  %7206 = vmatpush3.bf16.msra.mxu1 %v7156_v35 }
 0x157   : > { %813 = vadd.xlane.f32.xlu1 %v812_v26  ;;  %816 = vadd.xlane.f32.xlu0 %v815_v12  ;;  %v8495_v54 = vpop.permute.xlu1 %1922  ;;  %v8501_v20 = vpop.permute.xlu0 %1936 }
 0x158   : > { %7161 = vmatprep.subr.bf16.mxu0 %v7160_v41  ;;  %7205 = vmatprep.subr.bf16.mxu1 %v7160_v41 }
 0x15a   : > { %7163 = vmatpush3.bf16.msra.mxu0 %v7160_v41  ;;  %7207 = vmatpush3.bf16.msra.mxu1 %v7160_v41 }
 0x15b   : > { %819 = vadd.xlane.f32.xlu1 %v818_v32  ;;  %7173 = vmatprep.subr.bf16.mxu0 %v8481_v16  ;;  %v8499_v56 = vpop.permute.xlu1 %1929  ;;  %v8505_v61 = vpop.permute.xlu0 %1950 }
 0x15c   : > { %7165 = vmatprep.subr.bf16.mxu1 %v8490_v52 }
 0x15f   : > { %v8503_v60 = vpop.permute.xlu1 %1943 }
 0x163   : > { %v8507_v62 = vpop.permute.xlu1 %1957 }
 0x1c8   : > { %v659_v63 = vpop.xlane.xlu0 %658 }
 0x1c9   : > { %v681_v0 = vmul.f32 0.03125, %v659_v63 }
 0x1cb   : > { %v689_v4 = vadd.f32 1e-05, %v681_v0 }
 0x1cc   : > { %v662_v5 = vpop.xlane.xlu1 %661  ;;  %v665_v24 = vpop.xlane.xlu0 %664 }
 0x1cd   : > { %7375 = vrsqrt.f32 %v689_v4  ;;  %v682_v8 = vmul.f32 0.03125, %v662_v5  ;;  %v683_v10 = vmul.f32 0.03125, %v665_v24 }
 0x1cf   : > { %v690_v11 = vadd.f32 1e-05, %v682_v8  ;;  %v691_v14 = vadd.f32 1e-05, %v683_v10 }
 0x1d0   : > { %v668_v15 = vpop.xlane.xlu1 %667  ;;  %v671_v18 = vpop.xlane.xlu0 %670 }
 0x1d1   : > { %7377 = vrsqrt.f32 %v690_v11  ;;  %v684_v19 = vmul.f32 0.03125, %v668_v15  ;;  %v685_v28 = vmul.f32 0.03125, %v671_v18 }
 0x1d2   : > { %7379 = vrsqrt.f32 %v691_v14 }
 0x1d3   : > { %v692_v23 = vadd.f32 1e-05, %v684_v19  ;;  %v693_v26 = vadd.f32 1e-05, %v685_v28  ;;  %v1152_v19 = vld [vmem:[%s10617_s9 + $0x10] sm:$0xff]  ;;  %v1153_v28 = vld [vmem:[%s10617_s9 + $0x18] sm:$0xff] }
 0x1d4   : > { %v674_v27 = vpop.xlane.xlu1 %673  ;;  %v677_v30 = vpop.xlane.xlu0 %676 }
 0x1d5   : > { %7381 = vrsqrt.f32 %v692_v23  ;;  %v686_v12 = vmul.f32 0.03125, %v674_v27  ;;  %v687_v32 = vmul.f32 0.03125, %v677_v30 }
 0x1d6   : > { %7383 = vrsqrt.f32 %v693_v26 }
 0x1d7   : > { %v7376_v33 = vpop.eup %7375  ;;  %v694_v34 = vadd.f32 1e-05, %v686_v12  ;;  %v695_v35 = vadd.f32 1e-05, %v687_v32 }
 0x1d8   : > { %v680_v38 = vpop.xlane.xlu1 %679  ;;  %v799_v41 = vpop.xlane.xlu0 %798  ;;  %v705_v43 = vmul.f32 %v7376_v33, %v8368_v57 }
 0x1d9   : > { %7385 = vrsqrt.f32 %v694_v34  ;;  %v688_v45 = vmul.f32 0.03125, %v680_v38  ;;  %v821_v49 = vmul.f32 0.03125, %v799_v41 }
 0x1da   : > { %7387 = vrsqrt.f32 %v695_v35  ;;  %v719_v63 = vmul.f32 %v8512_v37, %v705_v43  ;;  %v7176_v35 = vpack.c.bf16 %v1153_v28, %v1152_v19 }
 0x1db   : > { %v7378_v0 = vpop.eup %7377  ;;  %v696_v4 = vadd.f32 1e-05, %v688_v45  ;;  %v829_v5 = vadd.f32 1e-05, %v821_v49 }
 0x1dc   : > { %v7380_v24 = vpop.eup %7379  ;;  %v802_v8 = vpop.xlane.xlu1 %801  ;;  %v733_v11 = vadd.f32 %v8518_v51, %v719_v63  ;;  %v706_v57 = vmul.f32 %v7378_v0, %v8378_v1 }
 0x1dd   : > { %v805_v10 = vpop.xlane.xlu0 %804  ;;  %7389 = vrsqrt.f32 %v696_v4  ;;  %v822_v14 = vmul.f32 0.03125, %v802_v8  ;;  %v707_v18 = vmul.f32 %v7380_v24, %v8371_v58 }
 0x1de   : > { %v823_v15 = vmul.f32 0.03125, %v805_v10  ;;  %7391 = vrsqrt.f32 %v829_v5  ;;  %6944 = vmatprep.mubr.msk.f32.mxu0 %vm607_vm0, %v733_v11  ;;  %v720_v23 = vmul.f32 %v8512_v37, %v706_v57 }
 0x1df   : > { %v7382_v26 = vpop.eup %7381  ;;  %v830_v1 = vadd.f32 1e-05, %v822_v14  ;;  %v721_v30 = vmul.f32 %v8512_v37, %v707_v18  ;;  %v1012_v18 = vld [vmem:[%s10615_s7 + $0x10] sm:$0xff] }
 0x1e0   : > { %v831_v27 = vadd.f32 1e-05, %v823_v15  ;;  %v7384_v12 = vpop.eup %7383  ;;  %v808_v58 = vpop.xlane.xlu1 %807  ;;  %v734_v33 = vadd.f32 %v8518_v51, %v720_v23  ;;  %v708_v34 = vmul.f32 %v7382_v26, %v8381_v2 }
 0x1e1   : > { %v811_v32 = vpop.xlane.xlu0 %810  ;;  %7393 = vrsqrt.f32 %v830_v1  ;;  %v824_v38 = vmul.f32 0.03125, %v808_v58  ;;  %v735_v43 = vadd.f32 %v8518_v51, %v721_v30  ;;  %v709_v49 = vmul.f32 %v7384_v12, %v8390_v6 }
 0x1e2   : > { %v825_v41 = vmul.f32 0.03125, %v811_v32  ;;  %7395 = vrsqrt.f32 %v831_v27  ;;  %6945 = vmatmul.mubr.msk.f32.vlgmr.msra.gmra.mrb[0].mxu0 %vm607_vm0, %v734_v33  ;;  %v722_v45 = vmul.f32 %v8512_v37, %v708_v34 }
 0x1e3   : > { %v7386_v63 = vpop.eup %7385  ;;  %v832_v0 = vadd.f32 1e-05, %v824_v38  ;;  %6947 = vmatprep.mubr.msk.f32.mxu0 %vm607_vm0, %v735_v43  ;;  %7175 = vmatpush3.bf16.msra.mxu0 %v8481_v16  ;;  %v723_v10 = vmul.f32 %v8512_v37, %v709_v49  ;;  %v1013_v16 = vld [vmem:[%s10615_s7 + $0x18] sm:$0xff] }
 0x1e4   : > { %v833_v4 = vadd.f32 1e-05, %v825_v41  ;;  %v7388_v2 = vpop.eup %7387  ;;  %v814_v5 = vpop.xlane.xlu1 %813  ;;  %v736_v8 = vadd.f32 %v8518_v51, %v722_v45  ;;  %7177 = vmatprep.subr.bf16.mxu0 %v7176_v35  ;;  %v710_v57 = vmul.f32 %v7386_v63, %v8393_v9  ;;  %v7168_v58 = vpack.c.bf16 %v1013_v16, %v1012_v18  ;;  %v1267_v41 = vld [vmem:[#allocation9 + $0x8] sm:$0xff] }
 0x1e5   : > { %v817_v24 = vpop.xlane.xlu0 %816  ;;  %7397 = vrsqrt.f32 %v832_v0  ;;  %v826_v14 = vmul.f32 0.03125, %v814_v5  ;;  %v711_v15 = vmul.f32 %v7388_v2, %v8402_v31  ;;  %v737_v19 = vadd.f32 %v8518_v51, %v723_v10 }
 0x1e6   : > { %v827_v6 = vmul.f32 0.03125, %v817_v24  ;;  %7399 = vrsqrt.f32 %v833_v4  ;;  %6948 = vmatmul.mubr.msk.f32.gmra.mrb[2].mxu0 %vm607_vm0, %v736_v8  ;;  %v724_v9 = vmul.f32 %v8512_v37, %v710_v57  ;;  %v1269_v24 = vld [vmem:[#allocation9 + $0x18] sm:$0xff] }
 0x1e7   : > { %v7390_v28 = vpop.eup %7389  ;;  %v834_v23 = vadd.f32 1e-05, %v826_v14  ;;  %7179 = vmatpush3.bf16.msra.mxu0 %v7176_v35  ;;  %6984 = vmatprep.mubr.msk.f32.mxu0 %vm607_vm0, %v733_v11  ;;  %v725_v31 = vmul.f32 %v8512_v37, %v711_v15  ;;  %v1266_v35 = vld [vmem:[#allocation9] sm:$0xff] }
 0x1e8   : > { %v835_v26 = vadd.f32 1e-05, %v827_v6  ;;  %v7392_v1 = vpop.eup %7391  ;;  %6950 = vmatprep.mubr.msk.f32.mxu1 %vm607_vm0, %v737_v19  ;;  %v820_v27 = vpop.xlane.xlu1 %819  ;;  %v738_v30 = vadd.f32 %v8518_v51, %v724_v9  ;;  %v712_v12 = vmul.f32 %v7390_v28, %v8405_v13  ;;  %v7180_v4 = vpack.c.bf16 %v1267_v41, %v1266_v35 }
 0x1e9   : > { %7401 = vrsqrt.f32 %v834_v23  ;;  %v828_v32 = vmul.f32 0.03125, %v820_v27  ;;  %v739_v34 = vadd.f32 %v8518_v51, %v725_v31  ;;  %v845_v38 = vmul.f32 %v7392_v1, %v8414_v47 }
 0x1ea   : > { %7403 = vrsqrt.f32 %v835_v26  ;;  %6951 = vmatmul.mubr.msk.f32.vlgmr.msra.gmra.mrb[0].mxu1 %vm607_vm0, %v738_v30  ;;  %6985 = vmatmul.mubr.msk.f32.vlgmr.msra.gmra.mrb[4].mxu0 %vm607_vm0, %v734_v33  ;;  %v726_v11 = vmul.f32 %v8512_v37, %v712_v12 }
 0x1eb   : > { %v7394_v45 = vpop.eup %7393  ;;  %v836_v49 = vadd.f32 1e-05, %v828_v32  ;;  %6953 = vmatprep.mubr.msk.f32.mxu1 %vm607_vm0, %v739_v34  ;;  %7167 = vmatpush3.bf16.msra.mxu1 %v8490_v52  ;;  %v853_v13 = vmul.f32 %v8512_v37, %v845_v38  ;;  %v1268_v52 = vld [vmem:[#allocation9 + $0x10] sm:$0xff] }
 0x1ec   : > { %v7396_v63 = vpop.eup %7395  ;;  %v846_v47 = vmul.f32 %v7394_v45, %v8417_v17  ;;  %6987 = vmatprep.mubr.msk.f32.mxu0 %vm607_vm0, %v735_v43  ;;  %v740_v0 = vadd.f32 %v8518_v51, %v726_v11  ;;  %7169 = vmatprep.subr.bf16.mxu1 %v7168_v58  ;;  %v7184_v6 = vpack.c.bf16 %v1269_v24, %v1268_v52  ;;  %v8656_v52 = vld [vmem:[%s10760_s8] ss:$0 sm:$0xff]  ;;  %s7934_s8 = smov [#allocation11]  }
 0x1ed   : > { %7405 = vrsqrt.f32 %v836_v49  ;;  %v861_v33 = vadd.f32 %v8518_v51, %v853_v13  ;;  %v847_v2 = vmul.f32 %v7396_v63, %v8426_v59  ;;  %v10638_v63 = vmov 1   ;;  %s7847_s12 = sshll.u32 %s7934_s8, 4  ;;  %s7848_s12 = int_to_ptr.vmem [resolvable:$false] %s7847_s12 }
 0x1ee   : > { %v854_v5 = vmul.f32 %v8512_v37, %v846_v47  ;;  %6954 = vmatmul.mubr.msk.f32.gmra.mrb[2].mxu1 %vm607_vm0, %v740_v0  ;;  %6988 = vmatmul.mubr.msk.f32.gmra.mrb[6].mxu0 %vm607_vm0, %v736_v8  ;;  %v8639_v47 = vld [vmem:[%s10759_s29] ss:$0 sm:$0xff]  ;;  %s11018_s29 = sld [smem:[#allocation146_spill]]  ;;  %s7849_s14 = scalar_lea.vmem %s7848_s12, 2048 }
 0x1ef   : > { %v7398_v17 = vpop.eup %7397  ;;  %7171 = vmatpush3.bf16.msra.mxu1 %v7168_v58  ;;  %6964 = vmatprep.mubr.msk.f32.mxu1 %vm607_vm0, %v861_v33  ;;  %v855_v43 = vmul.f32 %v8512_v37, %v847_v2  ;;  %p7850_p3 = scmp.lt.s32.totalorder %s10562_s28, %s7848_s12  ;;  %p7851_p4 = scmp.lt.s32.totalorder %s7849_s14, %s7843_s15 }
 0x1f0   : > { %v7400_v10 = vpop.eup %7399  ;;  %6990 = vmatprep.mubr.msk.f32.mxu0 %vm607_vm0, %v737_v19  ;;  %v862_v57 = vadd.f32 %v8518_v51, %v854_v5  ;;  %v848_v59 = vmul.f32 %v7398_v17, %v8429_v21  ;;  %7181 = vmatprep.subr.bf16.mxu1 %v7180_v4 }
 0x1f1   : > { %v863_v14 = vadd.f32 %v8518_v51, %v855_v43  ;;  %v849_v8 = vmul.f32 %v7400_v10, %v8438_v7  ;;  %p7852_p5 = por %p7851_p4, %p7850_p3 }
 0x1f2   : > { %6965 = vmatmul.mubr.msk.f32.vlgmr.msra.gmra.mrb[4].mxu1 %vm607_vm0, %v862_v57  ;;  %6991 = vmatmul.mubr.msk.f32.gmra.mrb[8].mxu0 %vm607_vm0, %v738_v30  ;;  %v856_v15 = vmul.f32 %v8512_v37, %v848_v59 }
 0x1f3   : > { %v7402_v18 = vpop.eup %7401  ;;  %6967 = vmatprep.mubr.msk.f32.mxu1 %vm607_vm0, %v863_v14  ;;  %6993 = vmatprep.mubr.msk.f32.mxu0 %vm607_vm0, %v739_v34  ;;  %v857_v16 = vmul.f32 %v8512_v37, %v849_v8  ;;  %p7853_p8 = pnand %p7852_p5, %p7846_p12 }
 0x1f4   : > { %v7404_v21 = vpop.eup %7403  ;;  %v864_v19 = vadd.f32 %v8518_v51, %v856_v15  ;;  %v850_v9 = vmul.f32 %v7402_v18, %v8441_v25  ;;  %7183 = vmatpush3.bf16.msra.mxu1 %v7180_v4  ;;  %s10560_s20 = scalar_lea.hbm %s11018_s29, %s6799_s25 }
 0x1f5   : > { %v865_v7 = vadd.f32 %v8518_v51, %v857_v16  ;;  %v851_v28 = vmul.f32 %v7404_v21, %v8450_v22  ;;  %7185 = vmatprep.subr.bf16.mxu1 %v7184_v6 }
 0x1f6   : > { %6968 = vmatmul.mubr.msk.f32.gmra.mrb[6].mxu1 %vm607_vm0, %v864_v19  ;;  %6994 = vmatmul.mubr.msk.f32.gmra.mrb[10].mxu0 %vm607_vm0, %v740_v0  ;;  %v858_v23 = vmul.f32 %v8512_v37, %v850_v9 }
 0x1f7   : > { %v7406_v26 = vpop.eup %7405  ;;  %6970 = vmatprep.mubr.msk.f32.mxu1 %vm607_vm0, %v865_v7  ;;  %v859_v31 = vmul.f32 %v8512_v37, %v851_v28 }
 0x1f8   : > { %v866_v1 = vadd.f32 %v8518_v51, %v858_v23  ;;  %v852_v25 = vmul.f32 %v7406_v26, %v8453_v29  ;;  %7187 = vmatpush3.bf16.msra.mxu1 %v7184_v6  ;;  %v10650_v29 = vmov 0   ;;  %v10640_v23 = vmov 3  }
 0x1f9   : > { %v867_v27 = vadd.f32 %v8518_v51, %v859_v31  ;;  %7290 = vset.pattern.permute.xlu1 %v10650_v29  ;;  %7291 = vset.pattern.permute.xlu0 %v10650_v29 }
 0x1fa   : > { %6971 = vmatmul.mubr.msk.f32.gmra.mrb[8].mxu1 %vm607_vm0, %v866_v1  ;;  %v860_v22 = vmul.f32 %v8512_v37, %v852_v25  ;;  %v8615_v37 = vld [vmem:[#allocation8] ss:$0 sm:$0xff] }
 0x1fb   : > { %6973 = vmatprep.mubr.msk.f32.mxu1 %vm607_vm0, %v867_v27 }
 0x1fc   : > { %v868_v30 = vadd.f32 %v8518_v51, %v860_v22 }
 0x1fe   : > { %6974 = vmatmul.mubr.msk.f32.gmra.mrb[10].mxu1 %vm607_vm0, %v868_v30 }
 0x1ff   : > { %7004 = vmatprep.mubr.msk.f32.mxu1 %vm607_vm0, %v861_v33 }
 0x202   : > { %7005 = vmatmul.mubr.msk.f32.vlgmr.msra.gmra.mrb[12].mxu1 %vm607_vm0, %v862_v57  ;;  %v10658_v57 = vmov 2  }
 0x203   : > { %7007 = vmatprep.mubr.msk.f32.mxu1 %vm607_vm0, %v863_v14 }
 0x206   : > { %7008 = vmatmul.mubr.msk.f32.gmra.mrb[14].mxu1 %vm607_vm0, %v864_v19 }
 0x207   : > { %7010 = vmatprep.mubr.msk.f32.mxu1 %vm607_vm0, %v865_v7 }
 0x20a   : > { %7011 = vmatmul.mubr.msk.f32.gmra.mrb[16].mxu1 %vm607_vm0, %v866_v1 }
 0x20b   : > { %7013 = vmatprep.mubr.msk.f32.mxu1 %vm607_vm0, %v867_v27 }
 0x20e   : > { %7014 = vmatmul.mubr.msk.f32.gmra.mrb[18].mxu1 %vm607_vm0, %v868_v30 }
 0x2b5   : > { %v6946_v51 = vpop.f32.mrb[0].mxu0 }
 0x2b6   : > { %v977_v12 = vadd.f32 %v6946_v51, %v8615_v37  ;;  %v971_v58 = vpop.f32.mrb[1].mxu0 }
 0x2b7   : > { %v972_v9 = vadd.f32 %v8615_v37, %v971_v58 }
 0x2b8   : > { %v8619_v32 = vadd.f32 %v8493_v53, %v977_v12 }
 0x2b9   : > { %v8621_v34 = vpop.f32.mrb[2].mxu0  ;;  %v8693_v25 = vadd.f32 %v8497_v55, %v972_v9 }
 0x2ba   : > { %1987 = vperm.xlu1 %7290, %v8619_v32   ;;  %v981_v38 = vpop.f32.mrb[3].mxu0 }
 0x2bb   : > { %v8625_v35 = vadd.f32 %v8615_v37, %v981_v38 }
 0x2bd   : > { %v6952_v41 = vpop.f32.mrb[0].mxu1  ;;  %v8627_v11 = vpop.f32.mrb[4].mxu0 }
 0x2be   : > { %v997_v45 = vadd.f32 %v6952_v41, %v8615_v37  ;;  %v991_v49 = vpop.f32.mrb[1].mxu1  ;;  %v8630_v13 = vpop.f32.mrb[5].mxu0  ;;  %7293 = vset.pattern.permute.xlu1 %v10638_v63 }
 0x2bf   : > { %v992_v27 = vadd.f32 %v8615_v37, %v991_v49 }
 0x2c0   : > { %v8634_v53 = vadd.f32 %v8503_v60, %v997_v45 }
 0x2c1   : > { %v8641_v0 = vpop.f32.mrb[2].mxu1  ;;  %v6989_v4 = vpop.f32.mrb[6].mxu0  ;;  %v8707_v55 = vadd.f32 %v8501_v20, %v992_v27  ;;  %v8723_v20 = vld [vmem:[%s10762_s6] ss:$0 sm:$0xff] }
 0x2c2   : > { %v8644_v33 = vadd.f32 %v6989_v4, %v8639_v47  ;;  %v1237_v2 = vpop.f32.mrb[7].mxu0  ;;  %3149 = vperm.xlu1 %7293, %v8634_v53   ;;  %1999 = vperm.xlu0 %7291, %v8634_v53   ;;  %v8648_v5 = vpop.f32.mrb[3].mxu1 }
 0x2c3   : > { %v8651_v60 = vadd.f32 %v8639_v47, %v1237_v2 }
 0x2c5   : > { %v8658_v24 = vpop.f32.mrb[4].mxu1  ;;  %v6992_v17 = vpop.f32.mrb[8].mxu0 }
 0x2c6   : > { %v8661_v43 = vadd.f32 %v6992_v17, %v8639_v47  ;;  %v1247_v10 = vpop.f32.mrb[9].mxu0  ;;  %7294 = vset.pattern.permute.xlu1 %v10658_v57  ;;  %7292 = vset.pattern.permute.xlu0 %v10638_v63  ;;  %v1111_v59 = vpop.f32.mrb[5].mxu1 }
 0x2c7   : > { %v8666_v14 = vadd.f32 %v8639_v47, %v1247_v10  ;;  %v8669_v8 = vadd.f32 %v8656_v52, %v1111_v59  ;;  %4101 = vperm.xlu1 %7294, %v8619_v32   ;;  %3137 = vperm.xlu0 %7292, %v8619_v32   ;;  %v987_v59 = vadd.f32 %v8621_v34, %v8615_v37 }
 0x2c8   : > { %v1007_v34 = vadd.f32 %v8641_v0, %v8615_v37  ;;  %v8783_v0 = vadd.f32 %v8495_v54, %v8625_v35  ;;  %v1228_v54 = vadd.f32 %v8639_v47, %v8630_v13 }
 0x2c9   : > { %v6969_v6 = vpop.f32.mrb[6].mxu1  ;;  %v6995_v15 = vpop.f32.mrb[10].mxu0  ;;  %v8750_v9 = vadd.f32 %v8499_v56, %v987_v59  ;;  %v1002_v56 = vadd.f32 %v8615_v37, %v8648_v5  ;;  %v8787_v37 = vadd.f32 %v8658_v24, %v8656_v52 }
 0x2ca   : > { %v8674_v18 = vadd.f32 %v6969_v6, %v8656_v52  ;;  %v8677_v16 = vadd.f32 %v6995_v15, %v8639_v47  ;;  %v1121_v21 = vpop.f32.mrb[7].mxu1  ;;  %v1257_v19 = vpop.f32.mrb[11].mxu0 }
 0x2cb   : > { %v8681_v7 = vadd.f32 %v8656_v52, %v1121_v21  ;;  %v8684_v28 = vadd.f32 %v8639_v47, %v1257_v19  ;;  %4113 = vperm.xlu1 %7294, %v8634_v53   ;;  %7296 = vset.pattern.permute.xlu0 %v10640_v23 }
 0x2cc   : > { %5077 = vperm.xlu0 %7296, %v8634_v53  }
 0x2cd   : > { %v6972_v26 = vpop.f32.mrb[8].mxu1 }
 0x2ce   : > { %v8690_v31 = vadd.f32 %v6972_v26, %v8656_v52  ;;  %v1131_v1 = vpop.f32.mrb[9].mxu1 }
 0x2cf   : > { %v8697_v22 = vadd.f32 %v8656_v52, %v1131_v1  ;;  %7295 = vset.pattern.permute.xlu1 %v10640_v23  ;;  %v8762_v1 = vadd.f32 %v8507_v62, %v1007_v34  ;;  %v8776_v62 = vadd.f32 %v8505_v61, %v1002_v56  ;;  %v1233_v61 = vadd.f32 %v8627_v11, %v8639_v47 }
 0x2d0   : > { %5065 = vperm.xlu1 %7295, %v8619_v32   ;;  %7297 = vset.pattern.permute.xlu0 %v10650_v29 }
 0x2d1   : > { %10761 = vst [vmem:[#allocation31_spill] sm:$0xff] %v8697_v22  ;;  %1984 = vperm.xlu0 %7297, %v8693_v25   ;;  %v6975_v30 = vpop.f32.mrb[10].mxu1 }
 0x2d2   : > { %v8704_v51 = vadd.f32 %v6975_v30, %v8656_v52  ;;  %v1141_v12 = vpop.f32.mrb[11].mxu1 }
 0x2d3   : > { %v8710_v58 = vadd.f32 %v8656_v52, %v1141_v12 }
 0x2d4   : > { %7298 = vset.pattern.permute.xlu1 %v10650_v29 }
 0x2d5   : > { %7300 = vset.pattern.permute.xlu0 %v10638_v63  ;;  %1996 = vperm.xlu1 %7298, %v8707_v55   ;;  %v8715_v38 = vpop.f32.mrb[12].mxu1 }
 0x2d6   : > { %3146 = vperm.xlu0 %7300, %v8707_v55   ;;  %v8718_v41 = vpop.f32.mrb[13].mxu1 }
 0x2d9   : > { %7299 = vset.pattern.permute.xlu1 %v10638_v63  ;;  %v7009_v45 = vpop.f32.mrb[14].mxu1 }
 0x2da   : > { %v8727_v49 = vadd.f32 %v7009_v45, %v8723_v20  ;;  %7302 = vset.pattern.permute.xlu0 %v10658_v57  ;;  %3134 = vperm.xlu1 %7299, %v8693_v25   ;;  %v8731_v4 = vpop.f32.mrb[15].mxu1 }
 0x2db   : > { %4110 = vperm.xlu0 %7302, %v8707_v55  }
 0x2dd   : > { %v7012_v2 = vpop.f32.mrb[16].mxu1 }
 0x2de   : > { %v8735_v17 = vadd.f32 %v7012_v2, %v8723_v20  ;;  %7301 = vset.pattern.permute.xlu1 %v10658_v57  ;;  %v1363_v10 = vpop.f32.mrb[17].mxu1 }
 0x2df   : > { %v8741_v6 = vadd.f32 %v8723_v20, %v1363_v10  ;;  %7303 = vset.pattern.permute.xlu0 %v10640_v23  ;;  %4098 = vperm.xlu1 %7301, %v8693_v25  }
 0x2e0   : > { %5062 = vperm.xlu0 %7303, %v8693_v25  }
 0x2e1   : > { %v7015_v15 = vpop.f32.mrb[18].mxu1 }
 0x2e2   : > { %v8747_v21 = vadd.f32 %v7015_v15, %v8723_v20  ;;  %v1373_v19 = vpop.f32.mrb[19].mxu1 }
 0x2e3   : > { %v8755_v26 = vadd.f32 %v8723_v20, %v1373_v19  ;;  %7304 = vset.pattern.permute.xlu1 %v10640_v23 }
 0x2e4   : > { %7305 = vset.pattern.permute.xlu0 %v10650_v29  ;;  %5074 = vperm.xlu1 %7304, %v8707_v55  }
 0x2e5   : > { %1993 = vperm.xlu0 %7305, %v8750_v9  }
 0x2e8   : > { %7306 = vset.pattern.permute.xlu1 %v10638_v63 }
 0x2e9   : > { %3143 = vperm.xlu1 %7306, %v8750_v9   ;;  %2005 = vperm.xlu0 %7305, %v8762_v1  }
 0x2ed   : > { %3155 = vperm.xlu1 %7306, %v8762_v1   ;;  %7308 = vset.pattern.permute.xlu0 %v10640_v23 }
 0x2ee   : > { %5071 = vperm.xlu0 %7308, %v8750_v9  }
 0x2f1   : > { %7307 = vset.pattern.permute.xlu1 %v10658_v57 }
 0x2f2   : > { %4107 = vperm.xlu1 %7307, %v8750_v9   ;;  %5083 = vperm.xlu0 %7308, %v8762_v1  }
 0x2f6   : > { %4119 = vperm.xlu1 %7307, %v8762_v1   ;;  %7311 = vset.pattern.permute.xlu0 %v10638_v63 }
 0x2f7   : > { %3152 = vperm.xlu0 %7311, %v8776_v62  }
 0x2fa   : > { %7309 = vset.pattern.permute.xlu1 %v10650_v29 }
 0x2fb   : > { %1990 = vperm.xlu1 %7309, %v8783_v0   ;;  %3409 = vperm.xlu0 %7311, %v8787_v37  }
 0x2ff   : > { %2002 = vperm.xlu1 %7309, %v8776_v62   ;;  %7316 = vset.pattern.permute.xlu0 %v10640_v23 }
 0x300   : > { %5337 = vperm.xlu0 %7316, %v8787_v37  }
 0x303   : > { %7310 = vset.pattern.permute.xlu1 %v10638_v63 }
 0x304   : > { %3140 = vperm.xlu1 %7310, %v8783_v0  }
 0x308   : > { %7312 = vset.pattern.permute.xlu1 %v10658_v57 }
 0x309   : > { %4104 = vperm.xlu1 %7312, %v8783_v0  }
 0x30d   : > { %4116 = vperm.xlu1 %7312, %v8776_v62  }
 0x311   : > { %7313 = vset.pattern.permute.xlu1 %v10640_v23 }
 0x312   : > { %5068 = vperm.xlu1 %7313, %v8783_v0  }
 0x316   : > { %5080 = vperm.xlu1 %7313, %v8776_v62  }
 0x31e   : > { %1382 = vxpose.xlu0.b32.start.end [1/1] (short) (narrow) %v1228_v54, 32 }
 0x339   : > { %v1988_v35 = vpop.permute.xlu1 %1987 }
 0x33a   : > { %v2016_v46 = vrot.slane %v1988_v35, %v8257_v3 }
 0x33f   : > { %1414 = vxpose.xlu1.b32.start.end [1/1] (short) (narrow) %v1233_v61, 32 }
 0x341   : > { %v8807_v5 = vpop.permute.xlu1 %3149  ;;  %v8809_v52 = vpop.permute.xlu0 %1999 }
 0x342   : > { %v2032_v35 = vrot.slane %v8809_v52, %v8257_v3 }
 0x346   : > { %v8811_v24 = vpop.permute.xlu1 %4101  ;;  %v8814_v27 = vpop.permute.xlu0 %3137 }
 0x347   : > { %7318 = vset.pattern.permute.xlu0 %v10638_v63 }
 0x34a   : > { %v8816_v30 = vpop.permute.xlu1 %4113 }
 0x34b   : > { %v8818_v12 = vpop.permute.xlu0 %5077 }
 0x34f   : > { %v8820_v13 = vpop.permute.xlu1 %5065 }
 0x350   : > { %v1985_v47 = vpop.permute.xlu0 %1984 }
 0x351   : > { %v2012_v50 = vrot.slane %v1985_v47, %v8257_v3 }
 0x353   : > { %3406 = vperm.xlu0 %7318, %v8669_v8   ;;  %v2042_v42 = vsel %vm2041_vm1, %v2016_v46, %v2012_v50 }
 0x354   : > { %v1997_v11 = vpop.permute.xlu1 %1996 }
 0x355   : > { %v8825_v2 = vpop.permute.xlu0 %3146  ;;  %v2028_v47 = vrot.slane %v1997_v11, %v8257_v3 }
 0x357   : > { %7321 = vset.pattern.permute.xlu0 %v10650_v29 }
 0x358   : > { %2371 = vperm.xlu0 %7321, %v8674_v18  }
 0x359   : > { %v3135_v45 = vpop.permute.xlu1 %3134 }
 0x35a   : > { %v8832_v59 = vpop.permute.xlu0 %4110 }
 0x35c   : > { %7322 = vset.pattern.permute.xlu0 %v10638_v63 }
 0x35d   : > { %3415 = vperm.xlu0 %7322, %v8674_v18   ;;  %7314 = vset.pattern.permute.xlu1 %v10650_v29 }
 0x35e   : > { %v8830_v10 = vpop.permute.xlu1 %4098 }
 0x35f   : > { %v8838_v19 = vpop.permute.xlu0 %5062 }
 0x361   : > { %7324 = vset.pattern.permute.xlu0 %v10640_v23 }
 0x362   : > { %5343 = vperm.xlu0 %7324, %v8674_v18  }
 0x363   : > { %v8836_v15 = vpop.permute.xlu1 %5074 }
 0x364   : > { %v1994_v54 = vpop.permute.xlu0 %1993 }
 0x365   : > { %v2024_v39 = vrot.slane %v1994_v54, %v8257_v3 }
 0x368   : > { %v3144_v34 = vpop.permute.xlu1 %3143  ;;  %v2006_v63 = vpop.permute.xlu0 %2005 }
 0x369   : > { %2365 = vperm.xlu1 %7314, %v8787_v37   ;;  %v2040_v11 = vrot.slane %v2006_v63, %v8257_v3  ;;  %v3172_v63 = vrot.slane %v3144_v34, %v8257_v3 }
 0x36c   : > { %v8841_v56 = vpop.permute.xlu1 %3155 }
 0x36d   : > { %7315 = vset.pattern.permute.xlu1 %v10658_v57  ;;  %v8854_v48 = vpop.permute.xlu0 %5071 }
 0x36e   : > { %4373 = vperm.xlu1 %7315, %v8787_v37  }
 0x371   : > { %v8845_v61 = vpop.permute.xlu1 %4107  ;;  %v8867_v46 = vpop.permute.xlu0 %5083 }
 0x372   : > { %7317 = vset.pattern.permute.xlu1 %v10650_v29 }
 0x373   : > { %2362 = vperm.xlu1 %7317, %v8669_v8  }
 0x375   : > { %v8849_v23 = vpop.permute.xlu1 %4119 }
 0x376   : > { %10763 = vst [vmem:[#allocation32_spill] sm:$0xff] %v8849_v23 }
 0x377   : > { %7319 = vset.pattern.permute.xlu1 %v10658_v57 }
 0x378   : > { %4370 = vperm.xlu1 %7319, %v8669_v8  }
 0x37a   : > { %v1991_v44 = vpop.permute.xlu1 %1990 }
 0x37b   : > { %v2020_v29 = vrot.slane %v1991_v44, %v8257_v3 }
 0x37c   : > { %7320 = vset.pattern.permute.xlu1 %v10764_v36 }
 0x37d   : > { %v2044_v57 = vsel %vm2043_vm2, %v2020_v29, %v2042_v42  ;;  %5334 = vperm.xlu1 %7320, %v8669_v8   ;;  %v3160_v29 = vrot.slane %v3135_v45, %v8257_v3  ;;  %v4124_v45 = vrot.slane %v8830_v10, %v8257_v3 }
 0x37e   : > { %v2046_v40 = vsel %vm2045_vm3, %v2024_v39, %v2044_v57  ;;  %v2003_v44 = vpop.permute.xlu1 %2002  ;;  %v3164_v57 = vrot.slane %v8814_v27, %v8257_v3 }
 0x37f   : > { %v2036_v50 = vrot.slane %v2003_v44, %v8257_v3  ;;  %v2048_v54 = vsel %vm2047_vm4, %v2028_v47, %v2046_v40  ;;  %v3176_v47 = vrot.slane %v8825_v2, %v8257_v3  ;;  %v3188_v2 = vrot.slane %v8841_v56, %v8257_v3 }
 0x380   : > { %1446 = vxpose.xlu0.b32.start.end [1/1] (short) (narrow) %v8651_v60, 32  ;;  %v2050_v42 = vsel %vm2049_vm5, %v2032_v35, %v2048_v54  ;;  %v3189_v40 = vsel %vm2041_vm1, %v3164_v57, %v3160_v29  ;;  %v3153_v60 = vpop.permute.xlu0 %3152  ;;  %v4128_v54 = vrot.slane %v8811_v24, %v8257_v3  ;;  %v4140_v24 = vrot.slane %v8832_v59, %v8257_v3 }
 0x381   : > { %v2052_v52 = vsel %vm2051_vm6, %v2036_v50, %v2050_v42  ;;  %v3180_v50 = vrot.slane %v8807_v5, %v8257_v3  ;;  %v4136_v5 = vrot.slane %v8845_v61, %v8257_v3  ;;  %v4144_v56 = vrot.slane %v8816_v30, %v8257_v3 }
 0x382   : > { %v8877_v39 = vsel %vm2053_vm7, %v2040_v11, %v2052_v52  ;;  %v3184_v11 = vrot.slane %v3153_v60, %v8257_v3  ;;  %v4153_v29 = vsel %vm2041_vm1, %v4128_v54, %v4124_v45  ;;  %v5088_v59 = vrot.slane %v8838_v19, %v8257_v3 }
 0x383   : > { %v3141_v44 = vpop.permute.xlu1 %3140  ;;  %v5100_v54 = vrot.slane %v8854_v48, %v8257_v3 }
 0x384   : > { %v3168_v23 = vrot.slane %v3141_v44, %v8257_v3 }
 0x386   : > { %v3190_v35 = vsel %vm2043_vm2, %v3168_v23, %v3189_v40 }
 0x387   : > { %v3191_v27 = vsel %vm2045_vm3, %v3172_v63, %v3190_v35  ;;  %v5092_v35 = vrot.slane %v8820_v13, %v8257_v3 }
 0x388   : > { %v4105_v34 = vpop.permute.xlu1 %4104  ;;  %v3192_v42 = vsel %vm2047_vm4, %v3176_v47, %v3191_v27 }
 0x389   : > { %v4132_v10 = vrot.slane %v4105_v34, %v8257_v3  ;;  %v3193_v23 = vsel %vm2049_vm5, %v3180_v50, %v3192_v42  ;;  %v5117_v27 = vsel %vm2041_vm1, %v5092_v35, %v5088_v59  ;;  %v8929_v34 = vpop.permute.xlu0 %3409  ;;  %v5108_v42 = vrot.slane %v8818_v12, %v8257_v3 }
 0x38a   : > { %v3194_v52 = vsel %vm2051_vm6, %v3184_v11, %v3193_v23  ;;  %v5104_v11 = vrot.slane %v8836_v15, %v8257_v3  ;;  %v10765_v15 = vmov 1   ;;  %v10766_v12 = vmov 0  }
 0x38b   : > { %v4154_v57 = vsel %vm2043_vm2, %v4132_v10, %v4153_v29  ;;  %v8908_v44 = vsel %vm2053_vm7, %v3188_v2, %v3194_v52  ;;  %v10767_v29 = vmov 2  }
 0x38c   : > { %v4155_v40 = vsel %vm2045_vm3, %v4136_v5, %v4154_v57  ;;  %v4117_v63 = vpop.permute.xlu1 %4116  ;;  %v1344_v5 = vadd.f32 %v8723_v20, %v8718_v41 }
 0x38d   : > { %v4148_v60 = vrot.slane %v4117_v63, %v8257_v3  ;;  %v4156_v61 = vsel %vm2047_vm4, %v4140_v24, %v4155_v40  ;;  %v8939_v23 = vpop.permute.xlu0 %5337  ;;  %v1354_v40 = vadd.f32 %v8723_v20, %v8731_v4 }
 0x38e   : > { %v4157_v47 = vsel %vm2049_vm5, %v4144_v56, %v4156_v61 }
 0x38f   : > { %v8919_v45 = vsel %vm2051_vm6, %v4148_v60, %v4157_v47 }
 0x391   : > { %v5069_v50 = vpop.permute.xlu1 %5068 }
 0x392   : > { %v5096_v30 = vrot.slane %v5069_v50, %v8257_v3  ;;  %v6699_v50 = vmul.f32 -1.442695, %v8707_v55 }
 0x394   : > { %v5118_v19 = vsel %vm2043_vm2, %v5096_v30, %v5117_v27  ;;  %7407 = vpow2.f32 %v6699_v50 }
 0x395   : > { %v5119_v13 = vsel %vm2045_vm3, %v5100_v54, %v5118_v19  ;;  %v8994_v24 = vpop.permute.xlu1 %5080 }
 0x396   : > { %v5120_v2 = vsel %vm2047_vm4, %v5104_v11, %v5119_v13 }
 0x397   : > { %v8937_v10 = vsel %vm2049_vm5, %v5108_v42, %v5120_v2 }
 0x39e   : > { %v1398_v48 = vpop.trf.xlu0  ;;  %v7408_v42 = vpop.eup %7407 }
 0x39f   : > { %7018 = vmatprep.mubr.msk.f32.mxu0 %vm2056_vm8, %v1398_v48  ;;  %v2285_v2 = vadd.f32 1.0, %v7408_v42 }
 0x3a1   : > { %7409 = vrcp.f32 %v2285_v2 }
 0x3a6   : > { %1478 = vxpose.xlu1.b32.start.end [1/1] (short) (narrow) %v8644_v33, 32  ;;  %v8981_v33 = vpop.trf.xlu0 }
 0x3a7   : > { %10768 = vst [vmem:[#allocation33_spill] sm:$0xff] %v8981_v33 }
 0x3a9   : > { %7326 = vset.pattern.permute.xlu0 %v10765_v15 }
 0x3b5   : > { %3412 = vperm.xlu0 %7326, %v8681_v7  }
 0x3b9   : > { %7329 = vset.pattern.permute.xlu0 %v10766_v12 }
 0x3ba   : > { %2377 = vperm.xlu0 %7329, %v8690_v31  }
 0x3be   : > { %7330 = vset.pattern.permute.xlu0 %v10765_v15 }
 0x3bf   : > { %3421 = vperm.xlu0 %7330, %v8690_v31   ;;  %v8998_v57 = vpop.trf.xlu1 }
 0x3c0   : > { %10771 = vst [vmem:[#allocation36_spill] sm:$0xff] %v8998_v57 }
 0x3c3   : > { %7332 = vset.pattern.permute.xlu0 %v10764_v36  ;;  %v9005_v63 = vpop.trf.xlu1 }
 0x3c4   : > { %5349 = vperm.xlu0 %7332, %v8690_v31   ;;  %7323 = vset.pattern.permute.xlu1 %v10767_v29  ;;  %10772 = vst [vmem:[#allocation37_spill] sm:$0xff] %v9005_v63 }
 0x3c7   : > { %v9012_v60 = vpop.trf.xlu1 }
 0x3c8   : > { %10774 = vst [vmem:[#allocation39_spill] sm:$0xff] %v9012_v60 }
 0x3cb   : > { %v9019_v4 = vpop.trf.xlu1 }
 0x3cc   : > { %10776 = vst [vmem:[#allocation41_spill] sm:$0xff] %v9019_v4 }
 0x3d0   : > { %4379 = vperm.xlu1 %7323, %v8674_v18  }
 0x3d4   : > { %7325 = vset.pattern.permute.xlu1 %v10766_v12 }
 0x3d5   : > { %2368 = vperm.xlu1 %7325, %v8681_v7  }
 0x3d9   : > { %7327 = vset.pattern.permute.xlu1 %v10767_v29 }
 0x3da   : > { %4376 = vperm.xlu1 %7327, %v8681_v7  }
 0x3de   : > { %7328 = vset.pattern.permute.xlu1 %v10764_v36 }
 0x3df   : > { %5340 = vperm.xlu1 %7328, %v8681_v7  }
 0x3e2   : > { %1510 = vxpose.xlu0.b32.start.end [1/1] (short) (narrow) %v8666_v14, 32 }
 0x3e8   : > { %v9023_v59 = vpop.permute.xlu1 %2365 }
 0x3ed   : > { %v9028_v30 = vpop.permute.xlu1 %4373 }
 0x3f2   : > { %v9032_v54 = vpop.permute.xlu1 %2362 }
 0x3f7   : > { %v9036_v19 = vpop.permute.xlu1 %4370 }
 0x3fc   : > { %v9040_v48 = vpop.permute.xlu1 %5334 }
 0x408   : > { %1542 = vxpose.xlu1.b32.start.end [1/1] (short) (narrow) %v8661_v43, 32  ;;  %v8983_v43 = vpop.trf.xlu0 }
 0x409   : > { %10769 = vst [vmem:[#allocation34_spill] sm:$0xff] %v8983_v43 }
 0x40b   : > { %7337 = vset.pattern.permute.xlu0 %v10766_v12 }
 0x40c   : > { %v8985_v14 = vpop.trf.xlu0 }
 0x40d   : > { %10770 = vst [vmem:[#allocation35_spill] sm:$0xff] %v8985_v14  ;;  %v7410_v14 = vpop.eup %7409 }
 0x417   : > { %2383 = vperm.xlu0 %7337, %v8704_v51  }
 0x41b   : > { %7338 = vset.pattern.permute.xlu0 %v10765_v15 }
 0x41c   : > { %3427 = vperm.xlu0 %7338, %v8704_v51  }
 0x420   : > { %7340 = vset.pattern.permute.xlu0 %v10764_v36 }
 0x421   : > { %5355 = vperm.xlu0 %7340, %v8704_v51  }
 0x426   : > { %7331 = vset.pattern.permute.xlu1 %v10767_v29 }
 0x432   : > { %4385 = vperm.xlu1 %7331, %v8690_v31  }
 0x436   : > { %7333 = vset.pattern.permute.xlu1 %v10766_v12 }
 0x437   : > { %2374 = vperm.xlu1 %7333, %v8697_v22  }
 0x43b   : > { %7334 = vset.pattern.permute.xlu1 %v10765_v15 }
 0x43c   : > { %3418 = vperm.xlu1 %7334, %v8697_v22  }
 0x43f   : > { %1574 = vxpose.xlu0.b32.start.end [1/1] (short) (narrow) %v8684_v28, 32  ;;  %v8987_v28 = vpop.permute.xlu0 %3406 }
 0x440   : > { %7335 = vset.pattern.permute.xlu1 %v10767_v29 }
 0x441   : > { %4382 = vperm.xlu1 %7335, %v8697_v22  }
 0x443   : > { %v8992_v52 = vpop.permute.xlu0 %2371 }
 0x445   : > { %7336 = vset.pattern.permute.xlu1 %v10764_v36 }
 0x446   : > { %5346 = vperm.xlu1 %7336, %v8697_v22  }
 0x468   : > { %7342 = vset.pattern.permute.xlu0 %v10765_v15 }
 0x46f   : > { %1606 = vxpose.xlu1.b32.start.end [1/1] (short) (narrow) %v8677_v16, 32  ;;  %v8996_v16 = vpop.permute.xlu0 %3415 }
 0x473   : > { %v9001_v56 = vpop.permute.xlu0 %5343 }
 0x474   : > { %3424 = vperm.xlu0 %7342, %v8710_v58  }
 0x477   : > { %v9009_v41 = vpop.trf.xlu0 }
 0x478   : > { %10773 = vst [vmem:[#allocation38_spill] sm:$0xff] %v9009_v41 }
 0x47b   : > { %v9015_v61 = vpop.trf.xlu0 }
 0x47c   : > { %10775 = vst [vmem:[#allocation40_spill] sm:$0xff] %v9015_v61 }
 0x47f   : > { %v9021_v47 = vpop.trf.xlu0 }
 0x480   : > { %10777 = vst [vmem:[#allocation42_spill] sm:$0xff] %v9021_v47 }
 0x483   : > { %v9025_v35 = vpop.trf.xlu0 }
 0x484   : > { %10778 = vst [vmem:[#allocation43_spill] sm:$0xff] %v9025_v35  ;;  %v1349_v35 = vadd.f32 %v8715_v38, %v8723_v20 }
 0x487   : > { %v9030_v27 = vpop.permute.xlu0 %3412 }
 0x48b   : > { %v9034_v11 = vpop.permute.xlu0 %2377 }
 0x48d   : > { %7339 = vset.pattern.permute.xlu1 %v10767_v29 }
 0x48f   : > { %v9038_v13 = vpop.permute.xlu0 %3421 }
 0x492   : > { %1638 = vxpose.xlu0.b32.start.end [1/1] (short) (narrow) %v1344_v5, 32 }
 0x493   : > { %v9042_v5 = vpop.permute.xlu0 %5349 }
 0x497   : > { %v9046_v50 = vpop.trf.xlu0 }
 0x498   : > { %10780 = vst [vmem:[#allocation45_spill] sm:$0xff] %v9046_v50 }
 0x499   : > { %4391 = vperm.xlu1 %7339, %v8704_v51  }
 0x49b   : > { %v9052_v47 = vpop.trf.xlu0 }
 0x49c   : > { %10782 = vst [vmem:[#allocation47_spill] sm:$0xff] %v9052_v47 }
 0x49d   : > { %7341 = vset.pattern.permute.xlu1 %v10766_v12 }
 0x49e   : > { %2380 = vperm.xlu1 %7341, %v8710_v58  }
 0x49f   : > { %1702 = vxpose.xlu0.b32.start.end [1/1] (short) (narrow) %v1354_v40, 32  ;;  %v9044_v40 = vpop.trf.xlu1  ;;  %v9057_v2 = vpop.trf.xlu0 }
 0x4a0   : > { %10779 = vst [vmem:[#allocation44_spill] sm:$0xff] %v9044_v40  ;;  %10784 = vst [vmem:[#allocation49_spill] sm:$0xff] %v9057_v2 }
 0x4a2   : > { %7343 = vset.pattern.permute.xlu1 %v10767_v29 }
 0x4a3   : > { %4388 = vperm.xlu1 %7343, %v8710_v58   ;;  %v9050_v4 = vpop.trf.xlu1  ;;  %v9062_v43 = vpop.trf.xlu0 }
 0x4a4   : > { %10781 = vst [vmem:[#allocation46_spill] sm:$0xff] %v9050_v4  ;;  %10786 = vst [vmem:[#allocation51_spill] sm:$0xff] %v9062_v43 }
 0x4a7   : > { %7344 = vset.pattern.permute.xlu1 %v10764_v36  ;;  %v9055_v42 = vpop.trf.xlu1  ;;  %v9066_v20 = vpop.permute.xlu0 %2383 }
 0x4a8   : > { %5352 = vperm.xlu1 %7344, %v8710_v58   ;;  %10783 = vst [vmem:[#allocation48_spill] sm:$0xff] %v9055_v42 }
 0x4ab   : > { %v9059_v60 = vpop.trf.xlu1  ;;  %v9072_v42 = vpop.permute.xlu0 %3427 }
 0x4ac   : > { %10785 = vst [vmem:[#allocation50_spill] sm:$0xff] %v9059_v60  ;;  %v6695_v60 = vmul.f32 -1.442695, %v8693_v25 }
 0x4af   : > { %v9064_v38 = vpop.permute.xlu1 %4379 }
 0x4b3   : > { %v9069_v47 = vpop.permute.xlu1 %2368 }
 0x4b7   : > { %v9074_v2 = vpop.permute.xlu1 %4376 }
 0x4bb   : > { %v9080_v43 = vpop.permute.xlu1 %5340 }
 0x4d1   : > { %1670 = vxpose.xlu1.b32.start.end [1/1] (short) (narrow) %v1349_v35, 32  ;;  %v6696_v35 = vmul.f32 -1.442695, %v8619_v32 }
 0x4d3   : > { %7411 = vpow2.f32 %v6696_v35  ;;  %v9084_v35 = vpop.trf.xlu1 }
 0x4d4   : > { %2321 = vrot.lane.b32.xlu0 %v7410_v14, %s7933_s26  ;;  %v6700_v14 = vmul.f32 -1.442695, %v8634_v53  ;;  %10788 = vst [vmem:[#allocation53_spill] sm:$0xff] %v9084_v35 }
 0x4d6   : > { %7413 = vpow2.f32 %v6700_v14 }
 0x4d7   : > { %7415 = vpow2.f32 %v6695_v60  ;;  %v9088_v14 = vpop.trf.xlu1 }
 0x4d8   : > { %10790 = vst [vmem:[#allocation55_spill] sm:$0xff] %v9088_v14 }
 0x4db   : > { %v9093_v57 = vpop.trf.xlu1 }
 0x4dc   : > { %10792 = vst [vmem:[#allocation57_spill] sm:$0xff] %v9093_v57 }
 0x4dd   : > { %v7412_v4 = vpop.eup %7411 }
 0x4de   : > { %1734 = vxpose.xlu1.b32.start.end [1/1] (short) (narrow) %v8727_v49, 32  ;;  %v9077_v49 = vpop.permute.xlu0 %5355  ;;  %v2282_v63 = vadd.f32 1.0, %v7412_v4 }
 0x4e0   : > { %v7414_v33 = vpop.eup %7413  ;;  %7417 = vrcp.f32 %v2282_v63  ;;  %v9098_v63 = vpop.trf.xlu1 }
 0x4e1   : > { %v2286_v40 = vadd.f32 1.0, %v7414_v33  ;;  %v7416_v41 = vpop.eup %7415  ;;  %10794 = vst [vmem:[#allocation59_spill] sm:$0xff] %v9098_v63 }
 0x4e2   : > { %v9082_v61 = vpop.trf.xlu0 }
 0x4e3   : > { %10787 = vst [vmem:[#allocation52_spill] sm:$0xff] %v9082_v61  ;;  %7419 = vrcp.f32 %v2286_v40 }
 0x4e6   : > { %v9086_v50 = vpop.trf.xlu0 }
 0x4e7   : > { %10789 = vst [vmem:[#allocation54_spill] sm:$0xff] %v9086_v50 }
 0x4ea   : > { %v9091_v60 = vpop.trf.xlu0  ;;  %v7418_v61 = vpop.eup %7417 }
 0x4eb   : > { %10791 = vst [vmem:[#allocation56_spill] sm:$0xff] %v9091_v60 }
 0x4ed   : > { %v7420_v4 = vpop.eup %7419 }
 0x4ee   : > { %v9095_v35 = vpop.trf.xlu0 }
 0x4ef   : > { %10793 = vst [vmem:[#allocation58_spill] sm:$0xff] %v9095_v35 }
 0x4f2   : > { %1766 = vxpose.xlu0.b32.start.end [1/1] (short) (narrow) %v8741_v6, 32  ;;  %v2281_v6 = vadd.f32 1.0, %v7416_v41  ;;  %v9104_v41 = vpop.permute.xlu1 %4385 }
 0x4f3   : > { %v9101_v33 = vpop.permute.xlu0 %3424 }
 0x4f4   : > { %7421 = vrcp.f32 %v2281_v6  ;;  %v6707_v6 = vmul.f32 -1.442695, %v8697_v22 }
 0x4f6   : > { %v9108_v35 = vpop.permute.xlu1 %2374  ;;  %7423 = vpow2.f32 %v6707_v6 }
 0x4ff   : > { %1830 = vxpose.xlu0.b32.start.end [1/1] (short) (narrow) %v8755_v26, 32  ;;  %v7422_v26 = vpop.eup %7421 }
 0x500   : > { %v7424_v60 = vpop.eup %7423 }
 0x501   : > { %v2653_v57 = vadd.f32 1.0, %v7424_v60  ;;  %v6698_v60 = vmul.f32 -1.442695, %v8750_v9 }
 0x503   : > { %7425 = vrcp.f32 %v2653_v57  ;;  %v3432_v57 = vrot.slane %v8987_v28, %v8257_v3 }
 0x504   : > { %7427 = vpow2.f32 %v6698_v60  ;;  %v4396_v60 = vrot.slane %v9036_v19, %v8257_v3 }
 0x508   : > { %2315 = vrot.lane.b32.xlu1 %v7418_v61, %s7933_s26  ;;  %v3419_v61 = vpop.permute.xlu1 %3418 }
 0x50c   : > { %2323 = vrot.lane.b32.xlu1 %v7420_v4, %s7933_s26  ;;  %v4383_v63 = vpop.permute.xlu1 %4382 }
 0x50d   : > { %v7426_v50 = vpop.eup %7425 }
 0x510   : > { %2313 = vrot.lane.b32.xlu1 %v7422_v26, %s7933_s26  ;;  %v9111_v4 = vpop.permute.xlu1 %5346 }
 0x512   : > { %v1654_v40 = vpop.trf.xlu0 }
 0x513   : > { %7032 = vmatprep.mubr.msk.f32.mxu1 %vm2056_vm8, %v1654_v40 }
 0x514   : > { %v9113_v26 = vpop.trf.xlu1 }
 0x515   : > { %10795 = vst [vmem:[#allocation60_spill] sm:$0xff] %v9113_v26 }
 0x518   : > { %v9115_v14 = vpop.trf.xlu1 }
 0x519   : > { %10796 = vst [vmem:[#allocation61_spill] sm:$0xff] %v9115_v14  ;;  %v3440_v14 = vrot.slane %v9030_v27, %v8257_v3  ;;  %v4404_v27 = vrot.slane %v9074_v2, %v8257_v3 }
 0x51c   : > { %v9118_v40 = vpop.trf.xlu1 }
 0x51d   : > { %10797 = vst [vmem:[#allocation62_spill] sm:$0xff] %v9118_v40  ;;  %v6697_v40 = vmul.f32 -1.442695, %v8783_v0 }
 0x520   : > { %v9121_v6 = vpop.trf.xlu1 }
 0x521   : > { %10798 = vst [vmem:[#allocation63_spill] sm:$0xff] %v9121_v6 }
 0x524   : > { %v4392_v22 = vpop.permute.xlu1 %4391 }
 0x528   : > { %7345 = vset.pattern.permute.xlu0 %v10766_v12  ;;  %v6702_v12 = vmul.f32 -1.442695, %v8762_v1  ;;  %v9137_v26 = vpop.permute.xlu1 %2380 }
 0x52a   : > { %7429 = vpow2.f32 %v6702_v12  ;;  %v3444_v12 = vrot.slane %v8996_v16, %v8257_v3  ;;  %v3456_v16 = vrot.slane %v9101_v33, %v8257_v3 }
 0x52b   : > { %7431 = vpow2.f32 %v6697_v40  ;;  %v5116_v40 = vrot.slane %v8867_v46, %v8257_v3 }
 0x534   : > { %2689 = vrot.lane.b32.xlu0 %v7426_v50, %s7933_s26  ;;  %v3436_v50 = vrot.slane %v8929_v34, %v8257_v3  ;;  %v3448_v34 = vrot.slane %v3419_v61, %v8257_v3 }
 0x536   : > { %v3461_v6 = vsel %vm2041_vm1, %v3436_v50, %v3432_v57  ;;  %v6701_v57 = vmul.f32 -1.442695, %v8776_v62 }
 0x537   : > { %v3462_v28 = vsel %vm2043_vm2, %v3440_v14, %v3461_v6  ;;  %v4412_v6 = vrot.slane %v4383_v63, %v8257_v3 }
 0x538   : > { %v3463_v50 = vsel %vm2045_vm3, %v3444_v12, %v3462_v28  ;;  %v4408_v28 = vrot.slane %v9064_v38, %v8257_v3  ;;  %7433 = vpow2.f32 %v6701_v57 }
 0x539   : > { %1798 = vxpose.xlu1.b32.start.end [1/1] (short) (narrow) %v8735_v17, 32  ;;  %v5112_v17 = vrot.slane %v8994_v24, %v8257_v3  ;;  %v4400_v24 = vrot.slane %v9028_v30, %v8257_v3  ;;  %v3464_v61 = vsel %vm2047_vm4, %v3448_v34, %v3463_v50  ;;  %v7428_v30 = vpop.eup %7427  ;;  %v6703_v50 = vmul.f32 -1.442695, %v8669_v8 }
 0x53a   : > { %v2284_v12 = vadd.f32 1.0, %v7428_v30 }
 0x53b   : > { %v4425_v19 = vsel %vm2041_vm1, %v4400_v24, %v4396_v60  ;;  %v5122_v14 = vsel %vm2051_vm6, %v5112_v17, %v8937_v10  ;;  %v3452_v60 = vrot.slane %v9038_v13, %v8257_v3  ;;  %v4389_v10 = vpop.permute.xlu1 %4388  ;;  %v6704_v17 = vmul.f32 -1.442695, %v8787_v37  ;;  %v7430_v24 = vpop.eup %7429 }
 0x53c   : > { %v4426_v2 = vsel %vm2043_vm2, %v4404_v27, %v4425_v19  ;;  %v3197_v27 = vsel %vm2056_vm8, %v8908_v44, -inf  ;;  %v5123_v33 = vsel %vm2053_vm7, %v5116_v40, %v5122_v14  ;;  %v4420_v13 = vrot.slane %v4389_v10, %v8257_v3 }
 0x53d   : > { %v4427_v63 = vsel %vm2045_vm3, %v4408_v28, %v4426_v2  ;;  %v3465_v46 = vsel %vm2049_vm5, %v3452_v60, %v3464_v61  ;;  %v3460_v19 = vrot.slane %v9072_v42, %v8257_v3  ;;  %v4416_v44 = vrot.slane %v9104_v41, %v8257_v3  ;;  %v7432_v61 = vpop.eup %7431 }
 0x53e   : > { %v4428_v34 = vsel %vm2047_vm4, %v4412_v6, %v4427_v63  ;;  %v3466_v38 = vsel %vm2051_vm6, %v3456_v16, %v3465_v46  ;;  %v5125_v57 = vsel %vm2056_vm8, %v5123_v33, -inf  ;;  %7435 = vpow2.f32 %v6704_v17 }
 0x53f   : > { %v3467_v14 = vsel %vm2053_vm7, %v3460_v19, %v3466_v38  ;;  %v4429_v2 = vsel %vm2049_vm5, %v4416_v44, %v4428_v34  ;;  %7437 = vrcp.f32 %v2284_v12  ;;  %v2288_v16 = vadd.f32 1.0, %v7430_v24  ;;  %v9191_v24 = vpop.trf.xlu0 }
 0x540   : > { %v4430_v6 = vsel %vm2051_vm6, %v4420_v13, %v4429_v2  ;;  %v4424_v42 = vrot.slane %v4392_v22, %v8257_v3  ;;  %v3469_v30 = vsel %vm2056_vm8, %v3467_v14, -inf  ;;  %7439 = vpow2.f32 %v6703_v50  ;;  %10799 = vst [vmem:[#allocation64_spill] sm:$0xff] %v9191_v24 }
 0x541   : > { %7441 = vrcp.f32 %v2288_v16  ;;  %v2283_v40 = vadd.f32 1.0, %v7432_v61  ;;  %v6706_v44 = vmul.f32 -1.442695, %v8674_v18  ;;  %v6705_v50 = vmul.f32 -1.442695, %v8681_v7 }
 0x542   : > { %v4431_v41 = vsel %vm2053_vm7, %v4424_v42, %v4430_v6  ;;  %v7434_v60 = vpop.eup %7433  ;;  %v6708_v2 = vmul.f32 -1.442695, %v8690_v31  ;;  %v6710_v61 = vmul.f32 -1.442695, %v8704_v51  ;;  %v6709_v16 = vmul.f32 -1.442695, %v8710_v58 }
 0x543   : > { %v4433_v28 = vsel %vm2056_vm8, %v4431_v41, -inf  ;;  %7443 = vrcp.f32 %v2283_v40  ;;  %v2287_v10 = vadd.f32 1.0, %v7434_v60  ;;  %v9194_v19 = vpop.trf.xlu0 }
 0x544   : > { %10800 = vst [vmem:[#allocation65_spill] sm:$0xff] %v9194_v19 }
 0x545   : > { %7445 = vrcp.f32 %v2287_v10 }
 0x548   : > { %v7436_v17 = vpop.eup %7435 }
 0x549   : > { %v2650_v22 = vadd.f32 1.0, %v7436_v17 }
 0x54b   : > { %7447 = vrcp.f32 %v2650_v22 }
 0x553   : > { %3198 = vmax.xlane.f32.xlu0 %v3197_v27  ;;  %v7438_v27 = vpop.eup %7437 }
 0x554   : > { %v7440_v63 = vpop.eup %7439 }
 0x555   : > { %v7442_v33 = vpop.eup %7441  ;;  %v2649_v46 = vadd.f32 1.0, %v7440_v63 }
 0x556   : > { %v7444_v34 = vpop.eup %7443 }
 0x557   : > { %5126 = vmax.xlane.f32.xlu0 %v5125_v57  ;;  %7449 = vrcp.f32 %v2649_v46  ;;  %v7446_v13 = vpop.eup %7445  ;;  %v9197_v57 = vpop.trf.xlu0 }
 0x558   : > { %v7448_v38 = vpop.eup %7447  ;;  %10801 = vst [vmem:[#allocation66_spill] sm:$0xff] %v9197_v57  ;;  %7451 = vpow2.f32 %v6706_v44 }
 0x559   : > { %7453 = vpow2.f32 %v6705_v50 }
 0x55a   : > { %7455 = vpow2.f32 %v6708_v2  ;;  %v5353_v2 = vpop.permute.xlu1 %5352 }
 0x55b   : > { %3470 = vmax.xlane.f32.xlu0 %v3469_v30  ;;  %v9200_v14 = vpop.trf.xlu0  ;;  %7457 = vpow2.f32 %v6710_v61 }
 0x55c   : > { %10802 = vst [vmem:[#allocation67_spill] sm:$0xff] %v9200_v14  ;;  %7459 = vpow2.f32 %v6709_v16 }
 0x55f   : > { %4434 = vmax.xlane.f32.xlu0 %v4433_v28  ;;  %v9204_v6 = vpop.trf.xlu0 }
 0x560   : > { %10803 = vst [vmem:[#allocation68_spill] sm:$0xff] %v9204_v6 }
 0x561   : > { %v7450_v12 = vpop.eup %7449 }
 0x563   : > { %2319 = vrot.lane.b32.xlu1 %v7438_v27, %s7933_s26  ;;  %v9207_v41 = vpop.trf.xlu0 }
 0x564   : > { %10804 = vst [vmem:[#allocation69_spill] sm:$0xff] %v9207_v41 }
 0x567   : > { %2327 = vrot.lane.b32.xlu1 %v7442_v33, %s7933_s26  ;;  %v9210_v28 = vpop.trf.xlu0 }
 0x568   : > { %10805 = vst [vmem:[#allocation70_spill] sm:$0xff] %v9210_v28 }
 0x56b   : > { %2317 = vrot.lane.b32.xlu1 %v7444_v34, %s7933_s26  ;;  %v9212_v33 = vpop.permute.xlu0 %2321 }
 0x56f   : > { %2325 = vrot.lane.b32.xlu1 %v7446_v13, %s7933_s26 }
 0x572   : > { %v9215_v13 = vpop.trf.xlu0 }
 0x573   : > { %2683 = vrot.lane.b32.xlu1 %v7448_v38, %s7933_s26  ;;  %10806 = vst [vmem:[#allocation71_spill] sm:$0xff] %v9215_v13 }
 0x577   : > { %2681 = vrot.lane.b32.xlu1 %v7450_v12, %s7933_s26  ;;  %v9219_v12 = vpop.trf.xlu0 }
 0x578   : > { %10807 = vst [vmem:[#allocation72_spill] sm:$0xff] %v9219_v12 }
 0x57b   : > { %v9222_v61 = vpop.trf.xlu0 }
 0x57c   : > { %10808 = vst [vmem:[#allocation73_spill] sm:$0xff] %v9222_v61 }
 0x57f   : > { %v9227_v16 = vpop.trf.xlu0 }
 0x580   : > { %10810 = vst [vmem:[#allocation75_spill] sm:$0xff] %v9227_v16 }
 0x5a0   : > { %1862 = vxpose.xlu1.b32.start.end [1/1] (short) (narrow) %v8747_v21, 32  ;;  %v7452_v21 = vpop.eup %7451 }
 0x5a1   : > { %v2652_v42 = vadd.f32 1.0, %v7452_v21  ;;  %v7454_v30 = vpop.eup %7453  ;;  %v9225_v21 = vpop.trf.xlu1 }
 0x5a2   : > { %v2651_v40 = vadd.f32 1.0, %v7454_v30  ;;  %v7456_v60 = vpop.eup %7455  ;;  %10809 = vst [vmem:[#allocation74_spill] sm:$0xff] %v9225_v21  ;;  %v9231_v30 = vpop.trf.xlu0 }
 0x5a3   : > { %7461 = vrcp.f32 %v2652_v42  ;;  %v2654_v10 = vadd.f32 1.0, %v7456_v60  ;;  %v7458_v17 = vpop.eup %7457  ;;  %10812 = vst [vmem:[#allocation77_spill] sm:$0xff] %v9231_v30 }
 0x5a4   : > { %7463 = vrcp.f32 %v2651_v40  ;;  %v2656_v27 = vadd.f32 1.0, %v7458_v17  ;;  %v7460_v22 = vpop.eup %7459 }
 0x5a5   : > { %7465 = vrcp.f32 %v2654_v10  ;;  %v2655_v46 = vadd.f32 1.0, %v7460_v22  ;;  %v9229_v42 = vpop.trf.xlu1  ;;  %v2396_v22 = vrot.slane %v9069_v47, %v8257_v3  ;;  %v5364_v47 = vrot.slane %v8939_v23, %v8257_v3  ;;  %v10820_v23 = vld [vmem:[#allocation32_spill] sm:$0xff] }
 0x5a6   : > { %7467 = vrcp.f32 %v2656_v27  ;;  %10811 = vst [vmem:[#allocation76_spill] sm:$0xff] %v9229_v42  ;;  %v9235_v60 = vpop.trf.xlu0  ;;  %v2388_v27 = vrot.slane %v9032_v54, %v8257_v3  ;;  %v2404_v54 = vrot.slane %v9108_v35, %v8257_v3  ;;  %v2412_v35 = vrot.slane %v9137_v26, %v8257_v3 }
 0x5a7   : > { %7469 = vrcp.f32 %v2655_v46  ;;  %10814 = vst [vmem:[#allocation79_spill] sm:$0xff] %v9235_v60 }
 0x5a9   : > { %v9233_v40 = vpop.trf.xlu1 }
 0x5aa   : > { %10813 = vst [vmem:[#allocation78_spill] sm:$0xff] %v9233_v40  ;;  %v9239_v17 = vpop.trf.xlu0 }
 0x5ab   : > { %10816 = vst [vmem:[#allocation81_spill] sm:$0xff] %v9239_v17 }
 0x5ad   : > { %v7462_v63 = vpop.eup %7461  ;;  %v9237_v10 = vpop.trf.xlu1 }
 0x5ae   : > { %v7464_v34 = vpop.eup %7463  ;;  %10815 = vst [vmem:[#allocation80_spill] sm:$0xff] %v9237_v10  ;;  %v9257_v16 = vpop.trf.xlu0 }
 0x5af   : > { %v7466_v38 = vpop.eup %7465  ;;  %10818 = vst [vmem:[#allocation83_spill] sm:$0xff] %v9257_v16  ;;  %v4152_v16 = vrot.slane %v10820_v23, %v8257_v3 }
 0x5b0   : > { %v7468_v44 = vpop.eup %7467 }
 0x5b1   : > { %v7470_v50 = vpop.eup %7469  ;;  %v9247_v46 = vpop.trf.xlu1  ;;  %v4159_v26 = vsel %vm2053_vm7, %v4152_v16, %v8919_v45 }
 0x5b2   : > { %10817 = vst [vmem:[#allocation82_spill] sm:$0xff] %v9247_v46  ;;  %v4161_v45 = vsel %vm2056_vm8, %v4159_v26, -inf  ;;  %v10826_v26 = vld [vmem:[#allocation24_spill] sm:$0xff] }
 0x5be   : > { %7346 = vset.pattern.permute.xlu1 %v10765_v15 }
 0x5ca   : > { %2687 = vrot.lane.b32.xlu1 %v7462_v63, %s7933_s26  ;;  %v2392_v63 = vrot.slane %v9023_v59, %v8257_v3  ;;  %v2400_v59 = vrot.slane %v8992_v52, %v8257_v3  ;;  %v5372_v52 = vrot.slane %v9001_v56, %v8257_v3  ;;  %v5384_v56 = vrot.slane %v5353_v2, %v8257_v3 }
 0x5ce   : > { %2685 = vrot.lane.b32.xlu1 %v7464_v34, %s7933_s26  ;;  %v2417_v34 = vsel %vm2041_vm1, %v2392_v63, %v2388_v27 }
 0x5d2   : > { %2691 = vrot.lane.b32.xlu1 %v7466_v38, %s7933_s26  ;;  %v5360_v38 = vrot.slane %v9040_v48, %v8257_v3 }
 0x5d4   : > { %v5389_v27 = vsel %vm2041_vm1, %v5364_v47, %v5360_v38  ;;  %v2408_v38 = vrot.slane %v9034_v11, %v8257_v3  ;;  %v5380_v11 = vrot.slane %v9042_v5, %v8257_v3  ;;  %v10823_v5 = vld [vmem:[#allocation25_spill] sm:$0xff] }
 0x5d6   : > { %2695 = vrot.lane.b32.xlu1 %v7468_v44, %s7933_s26  ;;  %v2418_v44 = vsel %vm2043_vm2, %v2396_v22, %v2417_v34  ;;  %v9271_v34 = vpop.trf.xlu1 }
 0x5d7   : > { %v2419_v48 = vsel %vm2045_vm3, %v2400_v59, %v2418_v44  ;;  %10819 = vst [vmem:[#allocation84_spill] sm:$0xff] %v9271_v34  ;;  %v9279_v44 = vpop.permute.xlu0 %2689 }
 0x5d8   : > { %v2420_v63 = vsel %vm2047_vm4, %v2404_v54, %v2419_v48  ;;  %10821 = vst [vmem:[#allocation32_spill] sm:$0xff] %v9279_v44 }
 0x5d9   : > { %v2421_v54 = vsel %vm2049_vm5, %v2408_v38, %v2420_v63  ;;  %v5388_v63 = vrot.slane %v9077_v49, %v8257_v3 }
 0x5da   : > { %2693 = vrot.lane.b32.xlu1 %v7470_v50, %s7933_s26  ;;  %v5368_v50 = vrot.slane %v9080_v43, %v8257_v3  ;;  %v5376_v43 = vrot.slane %v9111_v4, %v8257_v3  ;;  %v2422_v59 = vsel %vm2051_vm6, %v2412_v35, %v2421_v54 }
 0x5dc   : > { %v5390_v22 = vsel %vm2043_vm2, %v5368_v50, %v5389_v27  ;;  %v2057_v50 = vsel %vm2056_vm8, %v8877_v39, -inf  ;;  %v2416_v39 = vrot.slane %v9066_v20, %v8257_v3  ;;  %v9294_v27 = vpop.trf.xlu1 }
 0x5dd   : > { %v5391_v4 = vsel %vm2045_vm3, %v5372_v52, %v5390_v22  ;;  %10822 = vst [vmem:[#allocation85_spill] sm:$0xff] %v9294_v27  ;;  %v10825_v52 = vld [vmem:[#allocation23_spill] sm:$0xff] }
 0x5de   : > { %v5392_v47 = vsel %vm2047_vm4, %v5376_v43, %v5391_v4  ;;  %v2423_v16 = vsel %vm2053_vm7, %v2416_v39, %v2422_v59  ;;  %v10827_v59 = vld [vmem:[#allocation26_spill] sm:$0xff] }
 0x5df   : > { %v5393_v22 = vsel %vm2049_vm5, %v5380_v11, %v5392_v47  ;;  %v2425_v20 = vsel %vm2056_vm8, %v2423_v16, -inf }
 0x5e0   : > { %v9296_v48 = vpop.xlane.xlu0 %3198  ;;  %v5394_v2 = vsel %vm2051_vm6, %v5384_v56, %v5393_v22  ;;  %v9308_v23 = vpop.trf.xlu1  ;;  %v10828_v22 = vld [vmem:[#allocation27_spill] sm:$0xff] }
 0x5e1   : > { %v3204_v43 = vrot.slane %v9296_v48, %v10823_v5  ;;  %v5395_v35 = vsel %vm2053_vm7, %v5388_v63, %v5394_v2  ;;  %10824 = vst [vmem:[#allocation25_spill] sm:$0xff] %v9308_v23  ;;  %v3208_v38 = vrot.slane %v9296_v48, %v10825_v52  ;;  %v3212_v49 = vrot.slane %v9296_v48, %v10826_v26 }
 0x5e2   : > { %v5397_v4 = vsel %vm2056_vm8, %v5395_v35, -inf  ;;  %v3216_v11 = vrot.slane %v9296_v48, %v10827_v59  ;;  %v3220_v2 = vrot.slane %v9296_v48, %v10828_v22 }
 0x5e3   : > { %v3242_v54 = vsub.f32 %v8619_v32, %v3208_v38  ;;  %v3243_v39 = vsub.f32 %v8783_v0, %v3212_v49 }
 0x5e4   : > { %v9317_v56 = vpop.permute.xlu1 %2315  ;;  %v3244_v63 = vsub.f32 %v8750_v9, %v3216_v11  ;;  %v3245_v38 = vsub.f32 %v8707_v55, %v3220_v2 }
 0x5e8   : > { %v9322_v16 = vpop.permute.xlu1 %2323 }
 0x5fe   : > { %2058 = vmax.xlane.f32.xlu1 %v2057_v50  ;;  %v3241_v50 = vsub.f32 %v8693_v25, %v3204_v43  ;;  %v3253_v43 = vmul.f32 1.442695, %v3243_v39  ;;  %v3257_v39 = vmul.f32 1.442695, %v3245_v38 }
 0x600   : > { %v3249_v47 = vmul.f32 1.442695, %v3241_v50  ;;  %v3255_v50 = vmul.f32 1.442695, %v3244_v63 }
 0x602   : > { %4162 = vmax.xlane.f32.xlu1 %v4161_v45  ;;  %7471 = vpow2.f32 %v3249_v47  ;;  %v3251_v45 = vmul.f32 1.442695, %v3242_v54  ;;  %v10830_v54 = vld [vmem:[#allocation29_spill] sm:$0xff] }
 0x603   : > { %v3228_v47 = vrot.slane %v9296_v48, %v10830_v54 }
 0x604   : > { %7473 = vpow2.f32 %v3251_v45 }
 0x605   : > { %7475 = vpow2.f32 %v3253_v43  ;;  %v3247_v2 = vsub.f32 %v8776_v62, %v3228_v47 }
 0x606   : > { %2426 = vmax.xlane.f32.xlu1 %v2425_v20  ;;  %v10829_v20 = vld [vmem:[#allocation28_spill] sm:$0xff]  ;;  %7477 = vpow2.f32 %v3255_v50 }
 0x607   : > { %v3224_v35 = vrot.slane %v9296_v48, %v10829_v20  ;;  %7479 = vpow2.f32 %v3257_v39 }
 0x609   : > { %v3246_v11 = vsub.f32 %v8634_v53, %v3224_v35  ;;  %v3261_v35 = vmul.f32 1.442695, %v3247_v2 }
 0x60a   : > { %5398 = vmax.xlane.f32.xlu1 %v5397_v4  ;;  %v9330_v4 = vpop.permute.xlu1 %2313 }
 0x60b   : > { %v3259_v63 = vmul.f32 1.442695, %v3246_v11 }
 0x60c   : > { %v9332_v49 = vpop.eup %7471 }
 0x60d   : > { %7481 = vpow2.f32 %v3259_v63 }
 0x60e   : > { %v9338_v45 = vpop.trf.xlu1  ;;  %v9340_v23 = vpop.eup %7473  ;;  %7483 = vpow2.f32 %v3261_v35 }
 0x60f   : > { %10831 = vst [vmem:[#allocation23_spill] sm:$0xff] %v9338_v45  ;;  %v9344_v43 = vpop.eup %7475 }
 0x610   : > { %v9349_v50 = vpop.eup %7477 }
 0x611   : > { %v9354_v10 = vpop.eup %7479 }
 0x612   : > { %v9346_v28 = vpop.trf.xlu1 }
 0x613   : > { %10832 = vst [vmem:[#allocation24_spill] sm:$0xff] %v9346_v28 }
 0x616   : > { %v9352_v38 = vpop.trf.xlu1 }
 0x617   : > { %10833 = vst [vmem:[#allocation26_spill] sm:$0xff] %v9352_v38  ;;  %v9357_v47 = vpop.eup %7481 }
 0x618   : > { %10834 = vst [vmem:[#allocation27_spill] sm:$0xff] %v9357_v47  ;;  %v9362_v39 = vpop.eup %7483 }
 0x619   : > { %10836 = vst [vmem:[#allocation29_spill] sm:$0xff] %v9362_v39 }
 0x61a   : > { %v9359_v11 = vpop.trf.xlu1 }
 0x61b   : > { %3274 = vperm.xlu1 %7346, %v9332_v49   ;;  %10835 = vst [vmem:[#allocation28_spill] sm:$0xff] %v9359_v11 }
 0x61e   : > { %v9365_v2 = vpop.permute.xlu1 %2319 }
 0x61f   : > { %3277 = vperm.xlu1 %7346, %v9340_v23  }
 0x622   : > { %v9368_v63 = vpop.permute.xlu1 %2327 }
 0x623   : > { %3280 = vperm.xlu1 %7346, %v9344_v43  }
 0x626   : > { %v9370_v35 = vpop.permute.xlu1 %2317 }
 0x627   : > { %3283 = vperm.xlu1 %7346, %v9349_v50  }
 0x62a   : > { %v9372_v57 = vpop.permute.xlu1 %2325 }
 0x62b   : > { %3286 = vperm.xlu1 %7346, %v9354_v10  }
 0x62e   : > { %v9374_v17 = vpop.permute.xlu1 %2683 }
 0x62f   : > { %3289 = vperm.xlu1 %7346, %v9357_v47   ;;  %10837 = vst [vmem:[#allocation86_spill] sm:$0xff] %v9374_v17 }
 0x632   : > { %v9376_v38 = vpop.permute.xlu1 %2681 }
 0x633   : > { %3292 = vperm.xlu1 %7346, %v9362_v39   ;;  %10838 = vst [vmem:[#allocation87_spill] sm:$0xff] %v9376_v38 }
 0x636   : > { %v9378_v11 = vpop.trf.xlu1 }
 0x637   : > { %7348 = vset.pattern.permute.xlu1 %v10767_v29  ;;  %10839 = vst [vmem:[#allocation88_spill] sm:$0xff] %v9378_v11 }
 0x63a   : > { %v9380_v61 = vpop.trf.xlu1 }
 0x63b   : > { %10840 = vst [vmem:[#allocation89_spill] sm:$0xff] %v9380_v61 }
 0x63e   : > { %v9382_v27 = vpop.trf.xlu1 }
 0x63f   : > { %10841 = vst [vmem:[#allocation90_spill] sm:$0xff] %v9382_v27 }
 0x642   : > { %v9384_v41 = vpop.trf.xlu1 }
 0x643   : > { %10842 = vst [vmem:[#allocation91_spill] sm:$0xff] %v9384_v41 }
 0x646   : > { %v9386_v40 = vpop.permute.xlu1 %2687 }
 0x647   : > { %10843 = vst [vmem:[#allocation92_spill] sm:$0xff] %v9386_v40 }
 0x64a   : > { %v9388_v19 = vpop.permute.xlu1 %2685 }
 0x64b   : > { %10844 = vst [vmem:[#allocation93_spill] sm:$0xff] %v9388_v19 }
 0x64e   : > { %v9390_v60 = vpop.permute.xlu1 %2691 }
 0x64f   : > { %10845 = vst [vmem:[#allocation94_spill] sm:$0xff] %v9390_v60 }
 0x652   : > { %v9392_v28 = vpop.permute.xlu1 %2695 }
 0x653   : > { %10846 = vst [vmem:[#allocation95_spill] sm:$0xff] %v9392_v28 }
 0x656   : > { %v9394_v12 = vpop.permute.xlu1 %2693 }
 0x657   : > { %10847 = vst [vmem:[#allocation96_spill] sm:$0xff] %v9394_v12 }
 0x68b   : > { %v2059_v34 = vpop.xlane.xlu1 %2058 }
 0x68c   : > { %v2064_v6 = vrot.slane %v2059_v34, %v10823_v5  ;;  %v2068_v42 = vrot.slane %v2059_v34, %v10825_v52  ;;  %v2072_v61 = vrot.slane %v2059_v34, %v10826_v26  ;;  %v2076_v45 = vrot.slane %v2059_v34, %v10827_v59 }
 0x68e   : > { %v2101_v27 = vsub.f32 %v8693_v25, %v2064_v6  ;;  %v2102_v41 = vsub.f32 %v8619_v32, %v2068_v42  ;;  %v2103_v13 = vsub.f32 %v8783_v0, %v2072_v61  ;;  %v2080_v6 = vrot.slane %v2059_v34, %v10828_v22 }
 0x68f   : > { %v9401_v24 = vpop.xlane.xlu1 %4162  ;;  %v2104_v42 = vsub.f32 %v8750_v9, %v2076_v45  ;;  %v2084_v61 = vrot.slane %v2059_v34, %v10829_v20  ;;  %v2088_v45 = vrot.slane %v2059_v34, %v10830_v54 }
 0x690   : > { %v2109_v11 = vmul.f32 1.442695, %v2101_v27  ;;  %v4168_v30 = vrot.slane %v9401_v24, %v10823_v5  ;;  %v2111_v46 = vmul.f32 1.442695, %v2102_v41  ;;  %v4172_v14 = vrot.slane %v9401_v24, %v10825_v52 }
 0x691   : > { %v2113_v12 = vmul.f32 1.442695, %v2103_v13  ;;  %v4176_v27 = vrot.slane %v9401_v24, %v10826_v26  ;;  %v2105_v41 = vsub.f32 %v8707_v55, %v2080_v6  ;;  %v2107_v28 = vsub.f32 %v8776_v62, %v2088_v45 }
 0x692   : > { %7485 = vpow2.f32 %v2109_v11  ;;  %v4205_v21 = vsub.f32 %v8693_v25, %v4168_v30  ;;  %v4206_v44 = vsub.f32 %v8619_v32, %v4172_v14  ;;  %v2115_v11 = vmul.f32 1.442695, %v2104_v42 }
 0x693   : > { %7487 = vpow2.f32 %v2111_v46  ;;  %v4180_v30 = vrot.slane %v9401_v24, %v10827_v59  ;;  %v4207_v38 = vsub.f32 %v8783_v0, %v4176_v27  ;;  %v2106_v14 = vsub.f32 %v8634_v53, %v2084_v61 }
 0x694   : > { %v4213_v19 = vmul.f32 1.442695, %v4205_v21  ;;  %7489 = vpow2.f32 %v2113_v12  ;;  %v4215_v13 = vmul.f32 1.442695, %v4206_v44  ;;  %v2117_v21 = vmul.f32 1.442695, %v2105_v41 }
 0x695   : > { %v4188_v12 = vrot.slane %v9401_v24, %v10829_v20  ;;  %v4208_v6 = vsub.f32 %v8750_v9, %v4180_v30  ;;  %v4217_v42 = vmul.f32 1.442695, %v4207_v38  ;;  %v2119_v60 = vmul.f32 1.442695, %v2106_v14 }
 0x696   : > { %7491 = vpow2.f32 %v4213_v19  ;;  %v10848_v19 = vld [vmem:[#allocation30_spill] sm:$0xff]  ;;  %v4192_v61 = vrot.slane %v9401_v24, %v10830_v54  ;;  %v2121_v45 = vmul.f32 1.442695, %v2107_v28 }
 0x697   : > { %7493 = vpow2.f32 %v2115_v11  ;;  %v2092_v44 = vrot.slane %v2059_v34, %v10848_v19  ;;  %v4210_v41 = vsub.f32 %v8634_v53, %v4188_v12  ;;  %v4219_v11 = vmul.f32 1.442695, %v4208_v6 }
 0x698   : > { %7495 = vpow2.f32 %v4215_v13  ;;  %v9440_v13 = vpop.xlane.xlu0 %5126  ;;  %v3232_v14 = vrot.slane %v9296_v48, %v10848_v19  ;;  %v4196_v17 = vrot.slane %v9401_v24, %v10848_v19 }
 0x699   : > { %7497 = vpow2.f32 %v2117_v21  ;;  %v2108_v34 = vsub.f32 %v8762_v1, %v2092_v44  ;;  %v4211_v21 = vsub.f32 %v8776_v62, %v4192_v61  ;;  %v4223_v12 = vmul.f32 1.442695, %v4210_v41 }
 0x69a   : > { %7499 = vpow2.f32 %v4217_v42  ;;  %v5132_v42 = vrot.slane %v9440_v13, %v10823_v5  ;;  %v5140_v61 = vrot.slane %v9440_v13, %v10826_v26 }
 0x69b   : > { %7501 = vpow2.f32 %v2119_v60  ;;  %v2123_v28 = vmul.f32 1.442695, %v2108_v34  ;;  %v3248_v60 = vsub.f32 %v8762_v1, %v3232_v14  ;;  %v4225_v48 = vmul.f32 1.442695, %v4211_v21 }
 0x69c   : > { %v9420_v46 = vpop.eup %7485  ;;  %7503 = vpow2.f32 %v4219_v11  ;;  %v5169_v41 = vsub.f32 %v8693_v25, %v5132_v42  ;;  %v4184_v34 = vrot.slane %v9401_v24, %v10828_v22  ;;  %v5144_v21 = vrot.slane %v9440_v13, %v10827_v59  ;;  %v9502_v39 = vpop.xlane.xlu0 %3470 }
 0x69d   : > { %2134 = vperm.xlu0 %7345, %v9420_v46   ;;  %v9428_v27 = vpop.eup %7487  ;;  %7505 = vpow2.f32 %v2121_v45  ;;  %v3263_v45 = vmul.f32 1.442695, %v3248_v60  ;;  %v4212_v24 = vsub.f32 %v8762_v1, %v4196_v17 }
 0x69e   : > { %v9436_v30 = vpop.eup %7489  ;;  %7507 = vpow2.f32 %v4223_v12  ;;  %v5171_v12 = vsub.f32 %v8783_v0, %v5140_v61  ;;  %v5177_v25 = vmul.f32 1.442695, %v5169_v41  ;;  %v5172_v0 = vsub.f32 %v8750_v9, %v5144_v21 }
 0x69f   : > { %7509 = vpow2.f32 %v2123_v28  ;;  %v4209_v28 = vsub.f32 %v8707_v55, %v4184_v34  ;;  %v5136_v34 = vrot.slane %v9440_v13, %v10825_v52  ;;  %v4227_v17 = vmul.f32 1.442695, %v4212_v24 }
 0x6a0   : > { %v9438_v38 = vpop.eup %7491  ;;  %7511 = vpow2.f32 %v4225_v48  ;;  %v5152_v48 = vrot.slane %v9440_v13, %v10829_v20  ;;  %v5181_v61 = vmul.f32 1.442695, %v5171_v12  ;;  %v5183_v21 = vmul.f32 1.442695, %v5172_v0 }
 0x6a1   : > { %2137 = vperm.xlu0 %7345, %v9428_v27   ;;  %4238 = vperm.xlu1 %7348, %v9438_v38   ;;  %v9448_v6 = vpop.eup %7493  ;;  %7513 = vpow2.f32 %v3263_v45 }
 0x6a2   : > { %v9452_v40 = vpop.eup %7495  ;;  %7515 = vpow2.f32 %v5177_v25  ;;  %v5174_v9 = vsub.f32 %v8634_v53, %v5152_v48  ;;  %v5148_v25 = vrot.slane %v9440_v13, %v10828_v22 }
 0x6a3   : > { %10849 = vst [vmem:[#allocation30_spill] sm:$0xff] %v9452_v40  ;;  %v9457_v44 = vpop.eup %7497  ;;  %7517 = vpow2.f32 %v5181_v61 }
 0x6a4   : > { %v9462_v11 = vpop.eup %7499  ;;  %v5187_v53 = vmul.f32 1.442695, %v5174_v9  ;;  %v5173_v61 = vsub.f32 %v8707_v55, %v5148_v25 }
 0x6a5   : > { %2140 = vperm.xlu0 %7345, %v9436_v30   ;;  %4241 = vperm.xlu1 %7348, %v9452_v40   ;;  %10850 = vst [vmem:[#allocation97_spill] sm:$0xff] %v9462_v11  ;;  %v9468_v14 = vpop.eup %7501  ;;  %v5160_v40 = vrot.slane %v9440_v13, %v10848_v19 }
 0x6a6   : > { %v9473_v42 = vpop.eup %7503 }
 0x6a7   : > { %v9480_v60 = vpop.eup %7505  ;;  %v5176_v47 = vsub.f32 %v8762_v1, %v5160_v40  ;;  %v9520_v40 = vpop.xlane.xlu1 %2426 }
 0x6a8   : > { %v9485_v41 = vpop.eup %7507  ;;  %v2432_v25 = vrot.slane %v9520_v40, %v10823_v5 }
 0x6a9   : > { %2143 = vperm.xlu0 %7345, %v9448_v6   ;;  %4244 = vperm.xlu1 %7348, %v9462_v11   ;;  %v4221_v11 = vmul.f32 1.442695, %v4209_v28  ;;  %v9492_v45 = vpop.eup %7509  ;;  %v5170_v28 = vsub.f32 %v8619_v32, %v5136_v34  ;;  %v5156_v32 = vrot.slane %v9440_v13, %v10830_v54  ;;  %v5191_v1 = vmul.f32 1.442695, %v5176_v47 }
 0x6aa   : > { %v9497_v12 = vpop.eup %7511  ;;  %v3480_v34 = vrot.slane %v9502_v39, %v10825_v52  ;;  %v3484_v47 = vrot.slane %v9502_v39, %v10826_v26 }
 0x6ab   : > { %10851 = vst [vmem:[#allocation98_spill] sm:$0xff] %v9497_v12  ;;  %7519 = vpow2.f32 %v4221_v11  ;;  %v9507_v48 = vpop.eup %7513  ;;  %v3476_v11 = vrot.slane %v9502_v39, %v10823_v5  ;;  %v5179_v24 = vmul.f32 1.442695, %v5170_v28  ;;  %v5175_v55 = vsub.f32 %v8776_v62, %v5156_v32 }
 0x6ac   : > { %7521 = vpow2.f32 %v5183_v21  ;;  %10852 = vst [vmem:[#allocation99_spill] sm:$0xff] %v9507_v48  ;;  %v9511_v0 = vpop.eup %7515  ;;  %v5185_v21 = vmul.f32 1.442695, %v5173_v61  ;;  %v3514_v28 = vsub.f32 %v8787_v37, %v3480_v34  ;;  %v2436_v61 = vrot.slane %v9520_v40, %v10825_v52 }
 0x6ad   : > { %2146 = vperm.xlu0 %7345, %v9457_v44   ;;  %4247 = vperm.xlu1 %7348, %v9473_v42   ;;  %7523 = vpow2.f32 %v4227_v17  ;;  %10853 = vst [vmem:[#allocation100_spill] sm:$0xff] %v9511_v0  ;;  %v3513_v13 = vsub.f32 %v8669_v8, %v3476_v11  ;;  %v9525_v9 = vpop.eup %7517  ;;  %v5189_v11 = vmul.f32 1.442695, %v5175_v55  ;;  %v3515_v34 = vsub.f32 %v8681_v7, %v3484_v47 }
 0x6ae   : > { %7525 = vpow2.f32 %v5187_v53  ;;  %10854 = vst [vmem:[#allocation101_spill] sm:$0xff] %v9525_v9  ;;  %v2440_v55 = vrot.slane %v9520_v40, %v10826_v26  ;;  %v3496_v47 = vrot.slane %v9502_v39, %v10829_v20 }
 0x6af   : > { %7527 = vpow2.f32 %v5179_v24  ;;  %v3521_v62 = vmul.f32 1.442695, %v3513_v13  ;;  %v2469_v24 = vsub.f32 %v8669_v8, %v2432_v25  ;;  %v3523_v13 = vmul.f32 1.442695, %v3514_v28 }
 0x6b0   : > { %7529 = vpow2.f32 %v5191_v1  ;;  %v3492_v1 = vrot.slane %v9502_v39, %v10828_v22 }
 0x6b1   : > { %2149 = vperm.xlu0 %7345, %v9468_v14   ;;  %4253 = vperm.xlu1 %7348, %v9485_v41   ;;  %7531 = vpow2.f32 %v5185_v21  ;;  %v2477_v25 = vmul.f32 1.442695, %v2469_v24  ;;  %v2471_v24 = vsub.f32 %v8681_v7, %v2440_v55  ;;  %v2448_v55 = vrot.slane %v9520_v40, %v10828_v22 }
 0x6b2   : > { %7533 = vpow2.f32 %v3521_v62  ;;  %v10859_v62 = vld [vmem:[#allocation31_spill] sm:$0xff] }
 0x6b3   : > { %7535 = vpow2.f32 %v5189_v11  ;;  %v3517_v28 = vsub.f32 %v10859_v62, %v3492_v1  ;;  %v3500_v1 = vrot.slane %v9502_v39, %v10830_v54 }
 0x6b4   : > { %7537 = vpow2.f32 %v3523_v13 }
 0x6b5   : > { %2152 = vperm.xlu0 %7345, %v9480_v60   ;;  %4256 = vperm.xlu1 %7348, %v9497_v12   ;;  %v9528_v17 = vpop.eup %7519  ;;  %7539 = vpow2.f32 %v2477_v25  ;;  %v3529_v13 = vmul.f32 1.442695, %v3517_v28  ;;  %v2481_v25 = vmul.f32 1.442695, %v2471_v24  ;;  %v2473_v24 = vsub.f32 %v10859_v62, %v2448_v55 }
 0x6b6   : > { %10855 = vst [vmem:[#allocation102_spill] sm:$0xff] %v9528_v17  ;;  %v9538_v53 = vpop.eup %7521  ;;  %v2456_v55 = vrot.slane %v9520_v40, %v10830_v54 }
 0x6b7   : > { %10856 = vst [vmem:[#allocation103_spill] sm:$0xff] %v9538_v53  ;;  %v9540_v32 = vpop.eup %7523 }
 0x6b8   : > { %v9550_v21 = vpop.eup %7525 }
 0x6b9   : > { %2155 = vperm.xlu0 %7345, %v9492_v45   ;;  %7350 = vset.pattern.permute.xlu1 %v10764_v36  ;;  %10857 = vst [vmem:[#allocation104_spill] sm:$0xff] %v9550_v21 }
 0x6ba   : > { %5202 = vperm.xlu1 %7350, %v9511_v0   ;;  %v3525_v0 = vmul.f32 1.442695, %v3515_v34  ;;  %v3518_v34 = vsub.f32 %v8690_v31, %v3496_v47  ;;  %v3519_v47 = vsub.f32 %v8710_v58, %v3500_v1 }
 0x6bc   : > { %7541 = vpow2.f32 %v3525_v0  ;;  %v3504_v0 = vrot.slane %v9502_v39, %v10848_v19  ;;  %v3531_v28 = vmul.f32 1.442695, %v3518_v34  ;;  %v3533_v34 = vmul.f32 1.442695, %v3519_v47 }
 0x6bd   : > { %7347 = vset.pattern.permute.xlu0 %v10765_v15 }
 0x6be   : > { %3295 = vperm.xlu0 %7347, %v9507_v48   ;;  %5208 = vperm.xlu1 %7350, %v9525_v9   ;;  %v2470_v9 = vsub.f32 %v8787_v37, %v2436_v61  ;;  %v2444_v61 = vrot.slane %v9520_v40, %v10827_v59  ;;  %v3520_v1 = vsub.f32 %v8704_v51, %v3504_v0 }
 0x6c0   : > { %v3535_v47 = vmul.f32 1.442695, %v3520_v1 }
 0x6c2   : > { %7349 = vset.pattern.permute.xlu0 %v10767_v29  ;;  %5211 = vperm.xlu1 %7350, %v9538_v53   ;;  %v9556_v53 = vpop.eup %7527 }
 0x6c3   : > { %4250 = vperm.xlu0 %7349, %v9528_v17   ;;  %10858 = vst [vmem:[#allocation105_spill] sm:$0xff] %v9556_v53  ;;  %v9563_v11 = vpop.eup %7529 }
 0x6c4   : > { %10860 = vst [vmem:[#allocation31_spill] sm:$0xff] %v9563_v11  ;;  %v9569_v12 = vpop.eup %7531 }
 0x6c5   : > { %10861 = vst [vmem:[#allocation106_spill] sm:$0xff] %v9569_v12  ;;  %v9575_v17 = vpop.eup %7533 }
 0x6c6   : > { %5217 = vperm.xlu1 %7350, %v9550_v21   ;;  %v2479_v21 = vmul.f32 1.442695, %v2470_v9  ;;  %10862 = vst [vmem:[#allocation107_spill] sm:$0xff] %v9575_v17  ;;  %v2472_v9 = vsub.f32 %v8674_v18, %v2444_v61  ;;  %v9590_v61 = vpop.xlane.xlu0 %4434 }
 0x6c7   : > { %4259 = vperm.xlu0 %7349, %v9540_v32   ;;  %v4456_v1 = vrot.slane %v9590_v61, %v10828_v22 }
 0x6c8   : > { %7543 = vpow2.f32 %v2479_v21  ;;  %v2452_v21 = vrot.slane %v9520_v40, %v10829_v20 }
 0x6c9   : > { %7545 = vpow2.f32 %v3529_v13  ;;  %v10866_v13 = vmov 0  }
 0x6ca   : > { %5223 = vperm.xlu1 %7350, %v9563_v11   ;;  %v9581_v11 = vpop.eup %7535  ;;  %7547 = vpow2.f32 %v2481_v25  ;;  %v2485_v25 = vmul.f32 1.442695, %v2473_v24 }
 0x6cb   : > { %7351 = vset.pattern.permute.xlu0 %v10764_v36  ;;  %10863 = vst [vmem:[#allocation108_spill] sm:$0xff] %v9581_v11  ;;  %v9588_v48 = vpop.eup %7537  ;;  %7549 = vpow2.f32 %v3531_v28  ;;  %v4448_v28 = vrot.slane %v9590_v61, %v10826_v26 }
 0x6cc   : > { %5205 = vperm.xlu0 %7351, %v9556_v53   ;;  %10864 = vst [vmem:[#allocation109_spill] sm:$0xff] %v9588_v48 }
 0x6ce   : > { %7353 = vset.pattern.permute.xlu1 %v10765_v15 }
 0x6cf   : > { %3546 = vperm.xlu1 %7353, %v9575_v17   ;;  %v2483_v17 = vmul.f32 1.442695, %v2472_v9  ;;  %v2474_v9 = vsub.f32 %v8690_v31, %v2452_v21  ;;  %v2460_v21 = vrot.slane %v9520_v40, %v10848_v19 }
 0x6d0   : > { %5214 = vperm.xlu0 %7351, %v9569_v12   ;;  %v9596_v12 = vpop.eup %7539 }
 0x6d1   : > { %10865 = vst [vmem:[#allocation110_spill] sm:$0xff] %v9596_v12  ;;  %v9603_v53 = vpop.eup %7541  ;;  %7551 = vpow2.f32 %v2483_v17  ;;  %v2475_v17 = vsub.f32 %v8710_v58, %v2456_v55  ;;  %v2487_v24 = vmul.f32 1.442695, %v2474_v9  ;;  %v2476_v40 = vsub.f32 %v8704_v51, %v2460_v21 }
 0x6d2   : > { %10867 = vst [vmem:[#allocation111_spill] sm:$0xff] %v9603_v53  ;;  %v9609_v0 = vpop.eup %7543  ;;  %7553 = vpow2.f32 %v3533_v34  ;;  %v3488_v9 = vrot.slane %v9502_v39, %v10827_v59  ;;  %v9642_v39 = vpop.xlane.xlu1 %5398 }
 0x6d3   : > { %3549 = vperm.xlu1 %7353, %v9588_v48   ;;  %10868 = vst [vmem:[#allocation112_spill] sm:$0xff] %v9609_v0  ;;  %7555 = vpow2.f32 %v2485_v25  ;;  %v2489_v55 = vmul.f32 1.442695, %v2475_v17  ;;  %v2491_v21 = vmul.f32 1.442695, %v2476_v40  ;;  %v5408_v40 = vrot.slane %v9642_v39, %v10825_v52 }
 0x6d4   : > { %5220 = vperm.xlu0 %7351, %v9581_v11   ;;  %v4440_v11 = vrot.slane %v9590_v61, %v10823_v5  ;;  %7557 = vpow2.f32 %v3535_v47  ;;  %v4464_v47 = vrot.slane %v9590_v61, %v10830_v54  ;;  %v3516_v17 = vsub.f32 %v8674_v18, %v3488_v9 }
 0x6d5   : > { %7559 = vpow2.f32 %v2487_v24 }
 0x6d6   : > { %v4477_v48 = vsub.f32 %v8669_v8, %v4440_v11  ;;  %v4479_v11 = vsub.f32 %v8681_v7, %v4448_v28 }
 0x6d7   : > { %3552 = vperm.xlu1 %7353, %v9603_v53  }
 0x6d8   : > { %7352 = vset.pattern.permute.xlu0 %v10866_v13  ;;  %v4485_v53 = vmul.f32 1.442695, %v4477_v48  ;;  %v4481_v48 = vsub.f32 %v10859_v62, %v4456_v1  ;;  %v4489_v28 = vmul.f32 1.442695, %v4479_v11 }
 0x6d9   : > { %2502 = vperm.xlu0 %7352, %v9596_v12   ;;  %v9615_v12 = vpop.eup %7545 }
 0x6da   : > { %10869 = vst [vmem:[#allocation113_spill] sm:$0xff] %v9615_v12  ;;  %v9621_v34 = vpop.eup %7547  ;;  %7561 = vpow2.f32 %v4485_v53  ;;  %v4483_v53 = vsub.f32 %v8710_v58, %v4464_v47  ;;  %v4493_v1 = vmul.f32 1.442695, %v4481_v48 }
 0x6db   : > { %3558 = vperm.xlu1 %7353, %v9615_v12   ;;  %10870 = vst [vmem:[#allocation114_spill] sm:$0xff] %v9621_v34  ;;  %7563 = vpow2.f32 %v2489_v55  ;;  %v3527_v55 = vmul.f32 1.442695, %v3516_v17 }
 0x6dc   : > { %7565 = vpow2.f32 %v4489_v28  ;;  %v4497_v48 = vmul.f32 1.442695, %v4483_v53  ;;  %v5416_v28 = vrot.slane %v9642_v39, %v10827_v59 }
 0x6dd   : > { %2505 = vperm.xlu0 %7352, %v9609_v0   ;;  %v9627_v0 = vpop.eup %7549  ;;  %7567 = vpow2.f32 %v2491_v21  ;;  %v5442_v21 = vsub.f32 %v8787_v37, %v5408_v40 }
 0x6de   : > { %10871 = vst [vmem:[#allocation115_spill] sm:$0xff] %v9627_v0  ;;  %v9633_v25 = vpop.eup %7551  ;;  %7569 = vpow2.f32 %v4493_v1  ;;  %v5444_v1 = vsub.f32 %v8674_v18, %v5416_v28 }
 0x6df   : > { %3561 = vperm.xlu1 %7353, %v9627_v0   ;;  %10872 = vst [vmem:[#allocation116_spill] sm:$0xff] %v9633_v25  ;;  %v4444_v0 = vrot.slane %v9590_v61, %v10825_v52  ;;  %7571 = vpow2.f32 %v3527_v55  ;;  %v5451_v40 = vmul.f32 1.442695, %v5442_v21 }
 0x6e0   : > { %7573 = vpow2.f32 %v4497_v48  ;;  %v5432_v48 = vrot.slane %v9642_v39, %v10848_v19  ;;  %v5455_v28 = vmul.f32 1.442695, %v5444_v1  ;;  %v9703_v1 = vpop.permute.xlu1 %3274 }
 0x6e1   : > { %2508 = vperm.xlu0 %7352, %v9621_v34   ;;  %v9639_v34 = vpop.eup %7553  ;;  %v4478_v47 = vsub.f32 %v8787_v37, %v4444_v0  ;;  %v5424_v37 = vrot.slane %v9642_v39, %v10829_v20 }
 0x6e2   : > { %10873 = vst [vmem:[#allocation117_spill] sm:$0xff] %v9639_v34  ;;  %v9645_v24 = vpop.eup %7555 }
 0x6e3   : > { %3564 = vperm.xlu1 %7353, %v9639_v34   ;;  %10874 = vst [vmem:[#allocation118_spill] sm:$0xff] %v9645_v24  ;;  %v9651_v11 = vpop.eup %7557  ;;  %v4452_v34 = vrot.slane %v9590_v61, %v10827_v59  ;;  %v4487_v53 = vmul.f32 1.442695, %v4478_v47 }
 0x6e4   : > { %10875 = vst [vmem:[#allocation119_spill] sm:$0xff] %v9651_v11  ;;  %v9656_v9 = vpop.eup %7559 }
 0x6e5   : > { %2511 = vperm.xlu0 %7352, %v9633_v25   ;;  %10876 = vst [vmem:[#allocation120_spill] sm:$0xff] %v9656_v9  ;;  %v4480_v0 = vsub.f32 %v8674_v18, %v4452_v34  ;;  %7575 = vpow2.f32 %v4487_v53  ;;  %v5446_v18 = vsub.f32 %v8690_v31, %v5424_v37  ;;  %v5448_v53 = vsub.f32 %v8704_v51, %v5432_v48 }
 0x6e6   : > { %7577 = vpow2.f32 %v5451_v40  ;;  %v5412_v40 = vrot.slane %v9642_v39, %v10826_v26 }
 0x6e7   : > { %3567 = vperm.xlu1 %7353, %v9651_v11   ;;  %v4460_v11 = vrot.slane %v9590_v61, %v10829_v20  ;;  %v4491_v47 = vmul.f32 1.442695, %v4480_v0  ;;  %v5404_v0 = vrot.slane %v9642_v39, %v10823_v5 }
 0x6e9   : > { %2514 = vperm.xlu0 %7352, %v9645_v24   ;;  %v9665_v24 = vpop.eup %7561  ;;  %v4482_v34 = vsub.f32 %v8690_v31, %v4460_v11  ;;  %7579 = vpow2.f32 %v4491_v47  ;;  %v5459_v31 = vmul.f32 1.442695, %v5446_v18  ;;  %v5443_v18 = vsub.f32 %v8681_v7, %v5412_v40 }
 0x6ea   : > { %10877 = vst [vmem:[#allocation121_spill] sm:$0xff] %v9665_v24  ;;  %v9668_v17 = vpop.eup %7563  ;;  %7581 = vpow2.f32 %v5455_v28 }
 0x6eb   : > { %7355 = vset.pattern.permute.xlu1 %v10767_v29  ;;  %10878 = vst [vmem:[#allocation122_spill] sm:$0xff] %v9668_v17  ;;  %v9678_v55 = vpop.eup %7565 }
 0x6ec   : > { %4510 = vperm.xlu1 %7355, %v9665_v24   ;;  %10879 = vst [vmem:[#allocation123_spill] sm:$0xff] %v9678_v55  ;;  %v9680_v12 = vpop.eup %7567 }
 0x6ed   : > { %2517 = vperm.xlu0 %7352, %v9656_v9   ;;  %10880 = vst [vmem:[#allocation124_spill] sm:$0xff] %v9680_v12  ;;  %v4468_v9 = vrot.slane %v9590_v61, %v10848_v19  ;;  %v9690_v21 = vpop.eup %7569  ;;  %v4495_v61 = vmul.f32 1.442695, %v4482_v34  ;;  %v5441_v34 = vsub.f32 %v8669_v8, %v5404_v0 }
 0x6ee   : > { %10881 = vst [vmem:[#allocation125_spill] sm:$0xff] %v9690_v21  ;;  %v9694_v11 = vpop.eup %7571 }
 0x6ef   : > { %v4484_v24 = vsub.f32 %v8704_v51, %v4468_v9  ;;  %10882 = vst [vmem:[#allocation126_spill] sm:$0xff] %v9694_v11  ;;  %v9701_v37 = vpop.eup %7573  ;;  %7583 = vpow2.f32 %v4495_v61  ;;  %v5463_v51 = vmul.f32 1.442695, %v5448_v53  ;;  %v5449_v28 = vmul.f32 1.442695, %v5441_v34  ;;  %v9722_v61 = vpop.permute.xlu1 %3277 }
 0x6f0   : > { %4516 = vperm.xlu1 %7355, %v9678_v55   ;;  %10883 = vst [vmem:[#allocation127_spill] sm:$0xff] %v9701_v37  ;;  %v9709_v47 = vpop.eup %7575  ;;  %7585 = vpow2.f32 %v5459_v31  ;;  %v5428_v53 = vrot.slane %v9642_v39, %v10830_v54 }
 0x6f1   : > { %2520 = vperm.xlu0 %7352, %v9668_v17   ;;  %v4499_v9 = vmul.f32 1.442695, %v4484_v24  ;;  %10884 = vst [vmem:[#allocation128_spill] sm:$0xff] %v9709_v47  ;;  %v9713_v48 = vpop.eup %7577  ;;  %v5420_v24 = vrot.slane %v9642_v39, %v10828_v22 }
 0x6f2   : > { %10885 = vst [vmem:[#allocation129_spill] sm:$0xff] %v9713_v48 }
 0x6f3   : > { %7587 = vpow2.f32 %v4499_v9  ;;  %v9720_v8 = vpop.eup %7579  ;;  %v5445_v31 = vsub.f32 %v10859_v62, %v5420_v24  ;;  %v5453_v9 = vmul.f32 1.442695, %v5443_v18  ;;  %v9736_v34 = vpop.permute.xlu1 %3280 }
 0x6f4   : > { %4522 = vperm.xlu1 %7355, %v9690_v21   ;;  %10886 = vst [vmem:[#allocation130_spill] sm:$0xff] %v9720_v8  ;;  %7589 = vpow2.f32 %v5463_v51  ;;  %v9725_v0 = vpop.eup %7581  ;;  %v5447_v51 = vsub.f32 %v8710_v58, %v5428_v53 }
 0x6f5   : > { %2523 = vperm.xlu0 %7352, %v9680_v12   ;;  %10887 = vst [vmem:[#allocation131_spill] sm:$0xff] %v9725_v0  ;;  %7591 = vpow2.f32 %v5449_v28 }
 0x6f6   : > { %7593 = vpow2.f32 %v5453_v9  ;;  %v5461_v24 = vmul.f32 1.442695, %v5447_v51 }
 0x6f7   : > { %v3284_v18 = vpop.permute.xlu1 %3283 }
 0x6f8   : > { %4528 = vperm.xlu1 %7355, %v9701_v37  }
 0x6f9   : > { %7354 = vset.pattern.permute.xlu0 %v10765_v15  ;;  %v9731_v7 = vpop.eup %7583 }
 0x6fa   : > { %3555 = vperm.xlu0 %7354, %v9694_v11   ;;  %10888 = vst [vmem:[#allocation132_spill] sm:$0xff] %v9731_v7  ;;  %v9734_v40 = vpop.eup %7585 }
 0x6fb   : > { %10889 = vst [vmem:[#allocation133_spill] sm:$0xff] %v9734_v40  ;;  %v3287_v53 = vpop.permute.xlu1 %3286 }
 0x6fc   : > { %7358 = vset.pattern.permute.xlu1 %v10764_v36 }
 0x6fd   : > { %5477 = vperm.xlu1 %7358, %v9713_v48   ;;  %v5457_v48 = vmul.f32 1.442695, %v5445_v31  ;;  %v9740_v39 = vpop.eup %7587 }
 0x6fe   : > { %7356 = vset.pattern.permute.xlu0 %v10767_v29  ;;  %10890 = vst [vmem:[#allocation134_spill] sm:$0xff] %v9740_v39  ;;  %v9743_v62 = vpop.eup %7589 }
 0x6ff   : > { %4513 = vperm.xlu0 %7356, %v9709_v47   ;;  %10891 = vst [vmem:[#allocation135_spill] sm:$0xff] %v9743_v62  ;;  %7595 = vpow2.f32 %v5457_v48  ;;  %v9746_v28 = vpop.eup %7591  ;;  %v3290_v48 = vpop.permute.xlu1 %3289 }
 0x700   : > { %10892 = vst [vmem:[#allocation136_spill] sm:$0xff] %v9746_v28  ;;  %7597 = vpow2.f32 %v5461_v24  ;;  %v9751_v58 = vpop.eup %7593 }
 0x701   : > { %5483 = vperm.xlu1 %7358, %v9725_v0   ;;  %10893 = vst [vmem:[#allocation137_spill] sm:$0xff] %v9751_v58 }
 0x703   : > { %4519 = vperm.xlu0 %7356, %v9720_v8  }
 0x705   : > { %5489 = vperm.xlu1 %7358, %v9734_v40  }
 0x707   : > { %4525 = vperm.xlu0 %7356, %v9731_v7  }
 0x709   : > { %5495 = vperm.xlu1 %7358, %v9743_v62   ;;  %v9754_v31 = vpop.eup %7595  ;;  %v3293_v62 = vpop.permute.xlu1 %3292 }
 0x70a   : > { %10894 = vst [vmem:[#allocation138_spill] sm:$0xff] %v9754_v31  ;;  %v9757_v9 = vpop.eup %7597 }
 0x70b   : > { %4531 = vperm.xlu0 %7356, %v9740_v39   ;;  %10895 = vst [vmem:[#allocation139_spill] sm:$0xff] %v9757_v9 }
 0x70d   : > { %7359 = vset.pattern.permute.xlu1 %v10866_v13 }
 0x70f   : > { %7357 = vset.pattern.permute.xlu0 %v10764_v36 }
 0x710   : > { %5474 = vperm.xlu0 %7357, %v9746_v28  }
 0x714   : > { %5480 = vperm.xlu0 %7357, %v9751_v58  }
 0x718   : > { %5486 = vperm.xlu0 %7357, %v9754_v31  }
 0x71c   : > { %5492 = vperm.xlu0 %7357, %v9757_v9   ;;  %v2135_v51 = vpop.permute.xlu0 %2134 }
 0x71d   : > { %v2160_v7 = vrot.slane %v2135_v51, %v8257_v3  ;;  %v3312_v51 = vrot.slane %v3284_v18, %v8257_v3  ;;  %v3324_v18 = vrot.slane %v3293_v62, %v8257_v3 }
 0x720   : > { %v2138_v40 = vpop.permute.xlu0 %2137  ;;  %7360 = vset.pattern.permute.xlu0 %v10866_v13  ;;  %v4239_v24 = vpop.permute.xlu1 %4238  ;;  %v3304_v13 = vrot.slane %v9722_v61, %v8257_v3  ;;  %v3316_v61 = vrot.slane %v3287_v53, %v8257_v3 }
 0x721   : > { %v2164_v31 = vrot.slane %v2138_v40, %v8257_v3 }
 0x723   : > { %v2189_v12 = vsel %vm2041_vm1, %v2164_v31, %v2160_v7 }
 0x724   : > { %v2141_v0 = vpop.permute.xlu0 %2140  ;;  %v4242_v37 = vpop.permute.xlu1 %4241 }
 0x725   : > { %v2168_v11 = vrot.slane %v2141_v0, %v8257_v3  ;;  %v3308_v0 = vrot.slane %v9736_v34, %v8257_v3  ;;  %v3320_v34 = vrot.slane %v3290_v48, %v8257_v3  ;;  %v4268_v48 = vrot.slane %v4242_v37, %v8257_v3 }
 0x727   : > { %v2190_v36 = vsel %vm2043_vm2, %v2168_v11, %v2189_v12 }
 0x728   : > { %v2144_v21 = vpop.permute.xlu0 %2143  ;;  %v4245_v55 = vpop.permute.xlu1 %4244 }
 0x729   : > { %v2172_v9 = vrot.slane %v2144_v21, %v8257_v3 }
 0x72b   : > { %v2191_v21 = vsel %vm2045_vm3, %v2172_v9, %v2190_v36 }
 0x72c   : > { %v2147_v58 = vpop.permute.xlu0 %2146  ;;  %v4248_v28 = vpop.permute.xlu1 %4247 }
 0x72d   : > { %v2176_v8 = vrot.slane %v2147_v58, %v8257_v3  ;;  %v3300_v58 = vrot.slane %v9703_v1, %v8257_v3 }
 0x72f   : > { %v2192_v7 = vsel %vm2047_vm4, %v2176_v8, %v2191_v21 }
 0x730   : > { %v2150_v39 = vpop.permute.xlu0 %2149  ;;  %v4254_v17 = vpop.permute.xlu1 %4253 }
 0x731   : > { %v2180_v25 = vrot.slane %v2150_v39, %v8257_v3 }
 0x733   : > { %v2193_v12 = vsel %vm2049_vm5, %v2180_v25, %v2192_v7 }
 0x734   : > { %v2153_v47 = vpop.permute.xlu0 %2152  ;;  %v4257_v39 = vpop.permute.xlu1 %4256 }
 0x735   : > { %v2184_v40 = vrot.slane %v2153_v47, %v8257_v3  ;;  %v3329_v47 = vsel %vm2041_vm1, %v3304_v13, %v3300_v58  ;;  %v4264_v58 = vrot.slane %v4239_v24, %v8257_v3  ;;  %v4288_v24 = vrot.slane %v4257_v39, %v8257_v3 }
 0x736   : > { %v3330_v1 = vsel %vm2043_vm2, %v3308_v0, %v3329_v47  ;;  %v4272_v0 = vrot.slane %v4245_v55, %v8257_v3 }
 0x737   : > { %v2194_v36 = vsel %vm2051_vm6, %v2184_v40, %v2193_v12  ;;  %v3331_v9 = vsel %vm2045_vm3, %v3312_v51, %v3330_v1  ;;  %v4276_v51 = vrot.slane %v4248_v28, %v8257_v3 }
 0x738   : > { %v2156_v31 = vpop.permute.xlu0 %2155  ;;  %v3332_v25 = vsel %vm2047_vm4, %v3316_v61, %v3331_v9 }
 0x739   : > { %v2188_v11 = vrot.slane %v2156_v31, %v8257_v3  ;;  %v5203_v21 = vpop.permute.xlu1 %5202  ;;  %v3333_v13 = vsel %vm2049_vm5, %v3320_v34, %v3332_v25 }
 0x73a   : > { %v3334_v62 = vsel %vm2051_vm6, %v3324_v18, %v3333_v13 }
 0x73b   : > { %v2195_v8 = vsel %vm2053_vm7, %v2188_v11, %v2194_v36  ;;  %v4293_v11 = vsel %vm2041_vm1, %v4268_v48, %v4264_v58  ;;  %v4284_v36 = vrot.slane %v4254_v17, %v8257_v3  ;;  %v5228_v17 = vrot.slane %v5203_v21, %v8257_v3 }
 0x73c   : > { %v2197_v53 = vsel %vm2056_vm8, %v2195_v8, 0.0  ;;  %v4294_v37 = vsel %vm2043_vm2, %v4272_v0, %v4293_v11 }
 0x73d   : > { %2198 = vadd.xlane.f32.xlu0 %v2197_v53  ;;  %v3296_v7 = vpop.permute.xlu0 %3295  ;;  %v5209_v61 = vpop.permute.xlu1 %5208  ;;  %v4295_v55 = vsel %vm2045_vm3, %v4276_v51, %v4294_v37 }
 0x73e   : > { %v3328_v40 = vrot.slane %v3296_v7, %v8257_v3 }
 0x740   : > { %v3335_v31 = vsel %vm2053_vm7, %v3328_v40, %v3334_v62  ;;  %v5236_v40 = vrot.slane %v5209_v61, %v8257_v3 }
 0x741   : > { %v3337_v12 = vsel %vm2056_vm8, %v3335_v31, 0.0  ;;  %v5212_v28 = vpop.permute.xlu1 %5211 }
 0x742   : > { %3338 = vadd.xlane.f32.xlu1 %v3337_v12  ;;  %v4251_v47 = vpop.permute.xlu0 %4250  ;;  %v5240_v62 = vrot.slane %v5212_v28, %v8257_v3 }
 0x743   : > { %v4280_v34 = vrot.slane %v4251_v47, %v8257_v3 }
 0x745   : > { %v4296_v1 = vsel %vm2047_vm4, %v4280_v34, %v4295_v55  ;;  %v5218_v25 = vpop.permute.xlu1 %5217 }
 0x746   : > { %v4260_v18 = vpop.permute.xlu0 %4259  ;;  %v4297_v8 = vsel %vm2049_vm5, %v4284_v36, %v4296_v1  ;;  %v5248_v21 = vrot.slane %v5218_v25, %v8257_v3 }
 0x747   : > { %v4292_v9 = vrot.slane %v4260_v18, %v8257_v3  ;;  %v4298_v53 = vsel %vm2051_vm6, %v4288_v24, %v4297_v8 }
 0x749   : > { %v4299_v7 = vsel %vm2053_vm7, %v4292_v9, %v4298_v53  ;;  %v5224_v0 = vpop.permute.xlu1 %5223 }
 0x74a   : > { %v4301_v13 = vsel %vm2056_vm8, %v4299_v7, 0.0  ;;  %v5256_v55 = vrot.slane %v5224_v0, %v8257_v3 }
 0x74b   : > { %4302 = vadd.xlane.f32.xlu1 %v4301_v13  ;;  %v5206_v48 = vpop.permute.xlu0 %5205 }
 0x74c   : > { %v5232_v39 = vrot.slane %v5206_v48, %v8257_v3 }
 0x74e   : > { %v5257_v58 = vsel %vm2041_vm1, %v5232_v39, %v5228_v17  ;;  %v3547_v47 = vpop.permute.xlu1 %3546 }
 0x74f   : > { %v5258_v51 = vsel %vm2043_vm2, %v5236_v40, %v5257_v58  ;;  %v5215_v31 = vpop.permute.xlu0 %5214 }
 0x750   : > { %v5259_v12 = vsel %vm2045_vm3, %v5240_v62, %v5258_v51  ;;  %v5244_v11 = vrot.slane %v5215_v31, %v8257_v3 }
 0x752   : > { %v5260_v37 = vsel %vm2047_vm4, %v5244_v11, %v5259_v12  ;;  %v3550_v24 = vpop.permute.xlu1 %3549 }
 0x753   : > { %v5221_v34 = vpop.permute.xlu0 %5220  ;;  %v5261_v36 = vsel %vm2049_vm5, %v5248_v21, %v5260_v37 }
 0x754   : > { %v5252_v61 = vrot.slane %v5221_v34, %v8257_v3 }
 0x756   : > { %v5262_v28 = vsel %vm2051_vm6, %v5252_v61, %v5261_v36  ;;  %v3553_v9 = vpop.permute.xlu1 %3552 }
 0x757   : > { %v5263_v1 = vsel %vm2053_vm7, %v5256_v55, %v5262_v28 }
 0x758   : > { %v2503_v18 = vpop.permute.xlu0 %2502  ;;  %v5265_v8 = vsel %vm2056_vm8, %v5263_v1, 0.0 }
 0x759   : > { %5266 = vadd.xlane.f32.xlu0 %v5265_v8  ;;  %v2528_v51 = vrot.slane %v2503_v18, %v8257_v3 }
 0x75a   : > { %v3559_v7 = vpop.permute.xlu1 %3558 }
 0x75c   : > { %v2506_v53 = vpop.permute.xlu0 %2505 }
 0x75d   : > { %v2532_v62 = vrot.slane %v2506_v53, %v8257_v3  ;;  %v3576_v53 = vrot.slane %v3550_v24, %v8257_v3  ;;  %v3588_v24 = vrot.slane %v3559_v7, %v8257_v3 }
 0x75e   : > { %v3562_v13 = vpop.permute.xlu1 %3561 }
 0x75f   : > { %v2557_v21 = vsel %vm2041_vm1, %v2532_v62, %v2528_v51  ;;  %v3572_v62 = vrot.slane %v3547_v47, %v8257_v3 }
 0x760   : > { %v2509_v25 = vpop.permute.xlu0 %2508 }
 0x761   : > { %v2536_v58 = vrot.slane %v2509_v25, %v8257_v3 }
 0x762   : > { %v3565_v17 = vpop.permute.xlu1 %3564 }
 0x763   : > { %v2558_v61 = vsel %vm2043_vm2, %v2536_v58, %v2557_v21  ;;  %v3592_v21 = vrot.slane %v3562_v13, %v8257_v3 }
 0x764   : > { %v2512_v48 = vpop.permute.xlu0 %2511 }
 0x765   : > { %v2540_v31 = vrot.slane %v2512_v48, %v8257_v3 }
 0x766   : > { %v3568_v40 = vpop.permute.xlu1 %3567 }
 0x767   : > { %v2559_v36 = vsel %vm2045_vm3, %v2540_v31, %v2558_v61  ;;  %v3601_v31 = vsel %vm2041_vm1, %v3576_v53, %v3572_v62  ;;  %v3596_v61 = vrot.slane %v3565_v17, %v8257_v3 }
 0x768   : > { %v2515_v39 = vpop.permute.xlu0 %2514 }
 0x769   : > { %v2544_v12 = vrot.slane %v2515_v39, %v8257_v3  ;;  %v3580_v39 = vrot.slane %v3553_v9, %v8257_v3 }
 0x76b   : > { %v4511_v11 = vpop.permute.xlu1 %4510  ;;  %v2560_v28 = vsel %vm2047_vm4, %v2544_v12, %v2559_v36 }
 0x76c   : > { %v2518_v0 = vpop.permute.xlu0 %2517 }
 0x76d   : > { %v2548_v34 = vrot.slane %v2518_v0, %v8257_v3 }
 0x76f   : > { %v2561_v18 = vsel %vm2049_vm5, %v2548_v34, %v2560_v28  ;;  %v4517_v25 = vpop.permute.xlu1 %4516 }
 0x770   : > { %v2521_v37 = vpop.permute.xlu0 %2520  ;;  %v4544_v17 = vrot.slane %v4517_v25, %v8257_v3 }
 0x771   : > { %v2552_v55 = vrot.slane %v2521_v37, %v8257_v3  ;;  %v3602_v37 = vsel %vm2043_vm2, %v3580_v39, %v3601_v31 }
 0x773   : > { %v2562_v48 = vsel %vm2051_vm6, %v2552_v55, %v2561_v18  ;;  %v4523_v34 = vpop.permute.xlu1 %4522  ;;  %v3600_v55 = vrot.slane %v3568_v40, %v8257_v3 }
 0x774   : > { %v2524_v1 = vpop.permute.xlu0 %2523  ;;  %v4552_v62 = vrot.slane %v4523_v34, %v8257_v3 }
 0x775   : > { %v2556_v8 = vrot.slane %v2524_v1, %v8257_v3  ;;  %v4536_v1 = vrot.slane %v4511_v11, %v8257_v3 }
 0x777   : > { %v2563_v0 = vsel %vm2053_vm7, %v2556_v8, %v2562_v48  ;;  %v4529_v48 = vpop.permute.xlu1 %4528 }
 0x778   : > { %v2565_v58 = vsel %vm2056_vm8, %v2563_v0, 0.0  ;;  %v4560_v25 = vrot.slane %v4529_v48, %v8257_v3 }
 0x779   : > { %2566 = vadd.xlane.f32.xlu0 %v2565_v58  ;;  %v3556_v51 = vpop.permute.xlu0 %3555 }
 0x77a   : > { %v3584_v12 = vrot.slane %v3556_v51, %v8257_v3 }
 0x77c   : > { %v3603_v9 = vsel %vm2045_vm3, %v3584_v12, %v3602_v37  ;;  %v5478_v31 = vpop.permute.xlu1 %5477 }
 0x77d   : > { %v3604_v47 = vsel %vm2047_vm4, %v3588_v24, %v3603_v9 }
 0x77e   : > { %v4514_v36 = vpop.permute.xlu0 %4513  ;;  %v3605_v28 = vsel %vm2049_vm5, %v3592_v21, %v3604_v47 }
 0x77f   : > { %v4540_v18 = vrot.slane %v4514_v36, %v8257_v3  ;;  %v3606_v7 = vsel %vm2051_vm6, %v3596_v61, %v3605_v28  ;;  %v5504_v28 = vrot.slane %v5478_v31, %v8257_v3 }
 0x780   : > { %v3607_v13 = vsel %vm2053_vm7, %v3600_v55, %v3606_v7  ;;  %v5484_v47 = vpop.permute.xlu1 %5483 }
 0x781   : > { %v4565_v8 = vsel %vm2041_vm1, %v4540_v18, %v4536_v1  ;;  %v3609_v53 = vsel %vm2056_vm8, %v3607_v13, 0.0 }
 0x782   : > { %3610 = vadd.xlane.f32.xlu0 %v3609_v53  ;;  %v4520_v40 = vpop.permute.xlu0 %4519  ;;  %v4566_v0 = vsel %vm2043_vm2, %v4544_v17, %v4565_v8  ;;  %v5512_v53 = vrot.slane %v5484_v47, %v8257_v3 }
 0x783   : > { %v4548_v39 = vrot.slane %v4520_v40, %v8257_v3 }
 0x784   : > { %v5490_v18 = vpop.permute.xlu1 %5489 }
 0x785   : > { %v4567_v11 = vsel %vm2045_vm3, %v4548_v39, %v4566_v0 }
 0x786   : > { %v4526_v58 = vpop.permute.xlu0 %4525  ;;  %v4568_v12 = vsel %vm2047_vm4, %v4552_v62, %v4567_v11  ;;  %v5520_v11 = vrot.slane %v5490_v18, %v8257_v3 }
 0x787   : > { %v4556_v51 = vrot.slane %v4526_v58, %v8257_v3 }
 0x788   : > { %v5496_v39 = vpop.permute.xlu1 %5495 }
 0x789   : > { %v4569_v37 = vsel %vm2049_vm5, %v4556_v51, %v4568_v12  ;;  %v5528_v51 = vrot.slane %v5496_v39, %v8257_v3 }
 0x78a   : > { %v4532_v24 = vpop.permute.xlu0 %4531  ;;  %v4570_v9 = vsel %vm2051_vm6, %v4560_v25, %v4569_v37 }
 0x78b   : > { %v4564_v21 = vrot.slane %v4532_v24, %v8257_v3 }
 0x78d   : > { %v4571_v61 = vsel %vm2053_vm7, %v4564_v21, %v4570_v9 }
 0x78e   : > { %v4573_v34 = vsel %vm2056_vm8, %v4571_v61, 0.0 }
 0x78f   : > { %4574 = vadd.xlane.f32.xlu0 %v4573_v34  ;;  %v5475_v55 = vpop.permute.xlu0 %5474 }
 0x790   : > { %v5500_v36 = vrot.slane %v5475_v55, %v8257_v3 }
 0x792   : > { %v5529_v13 = vsel %vm2041_vm1, %v5504_v28, %v5500_v36 }
 0x793   : > { %v5481_v1 = vpop.permute.xlu0 %5480 }
 0x794   : > { %v5508_v7 = vrot.slane %v5481_v1, %v8257_v3 }
 0x796   : > { %v5530_v8 = vsel %vm2043_vm2, %v5508_v7, %v5529_v13 }
 0x797   : > { %v5487_v17 = vpop.permute.xlu0 %5486  ;;  %v5531_v40 = vsel %vm2045_vm3, %v5512_v53, %v5530_v8 }
 0x798   : > { %v5516_v48 = vrot.slane %v5487_v17, %v8257_v3 }
 0x79a   : > { %v5532_v0 = vsel %vm2047_vm4, %v5516_v48, %v5531_v40 }
 0x79b   : > { %v5493_v62 = vpop.permute.xlu0 %5492  ;;  %v5533_v31 = vsel %vm2049_vm5, %v5520_v11, %v5532_v0 }
 0x79c   : > { %v5524_v58 = vrot.slane %v5493_v62, %v8257_v3 }
 0x79e   : > { %v5534_v12 = vsel %vm2051_vm6, %v5524_v58, %v5533_v31 }
 0x79f   : > { %v5535_v37 = vsel %vm2053_vm7, %v5528_v51, %v5534_v12 }
 0x7a0   : > { %v5537_v25 = vsel %vm2056_vm8, %v5535_v37, 0.0 }
 0x7a1   : > { %5538 = vadd.xlane.f32.xlu1 %v5537_v25 }
 0x7ca   : > { %v2199_v24 = vpop.xlane.xlu0 %2198 }
 0x7cb   : > { %v2204_v21 = vrot.slane %v2199_v24, %v10823_v5  ;;  %v2208_v9 = vrot.slane %v2199_v24, %v10825_v52  ;;  %v2216_v61 = vrot.slane %v2199_v24, %v10827_v59  ;;  %v2224_v47 = vrot.slane %v2199_v24, %v10829_v20 }
 0x7cc   : > { %v2212_v34 = vrot.slane %v2199_v24, %v10826_v26  ;;  %v2232_v55 = vrot.slane %v2199_v24, %v10848_v19  ;;  %v2220_v28 = vrot.slane %v2199_v24, %v10828_v22  ;;  %v2228_v7 = vrot.slane %v2199_v24, %v10830_v54 }
 0x7cd   : > { %7599 = vrcp.f32 %v2204_v21 }
 0x7ce   : > { %7601 = vrcp.f32 %v2208_v9 }
 0x7cf   : > { %7603 = vrcp.f32 %v2216_v61  ;;  %v9898_v36 = vpop.xlane.xlu1 %3338 }
 0x7d0   : > { %7605 = vrcp.f32 %v2224_v47  ;;  %v3344_v1 = vrot.slane %v9898_v36, %v10823_v5  ;;  %v3348_v0 = vrot.slane %v9898_v36, %v10825_v52  ;;  %v3356_v61 = vrot.slane %v9898_v36, %v10827_v59 }
 0x7d1   : > { %7607 = vrcp.f32 %v2212_v34 }
 0x7d2   : > { %7609 = vrcp.f32 %v2232_v55 }
 0x7d3   : > { %7611 = vrcp.f32 %v2220_v28 }
 0x7d4   : > { %7613 = vrcp.f32 %v3344_v1 }
 0x7d5   : > { %7615 = vrcp.f32 %v2228_v7 }
 0x7d7   : > { %v7600_v18 = vpop.eup %7599 }
 0x7d8   : > { %v9904_v13 = vpop.xlane.xlu1 %4302  ;;  %v2242_v8 = vmul.f32 %v7600_v18, %v9420_v46  ;;  %v7602_v53 = vpop.eup %7601  ;;  %v3360_v18 = vrot.slane %v9898_v36, %v10828_v22 }
 0x7d9   : > { %v7604_v17 = vpop.eup %7603  ;;  %v4308_v48 = vrot.slane %v9904_v13, %v10823_v5  ;;  %v2244_v62 = vmul.f32 %v7602_v53, %v9428_v27  ;;  %v4320_v12 = vrot.slane %v9904_v13, %v10827_v59  ;;  %v4328_v21 = vrot.slane %v9904_v13, %v10829_v20 }
 0x7da   : > { %v2248_v40 = vmul.f32 %v7604_v17, %v9448_v6  ;;  %v7606_v39 = vpop.eup %7605  ;;  %v2337_v11 = vmul.f32 %v9330_v4, %v2242_v8  ;;  %v3352_v6 = vrot.slane %v9898_v36, %v10826_v26 }
 0x7db   : > { %v7608_v58 = vpop.eup %7607  ;;  %v2252_v51 = vmul.f32 %v7606_v39, %v9468_v14  ;;  %7617 = vrcp.f32 %v4308_v48  ;;  %v2338_v37 = vmul.f32 %v9317_v56, %v2244_v62  ;;  %v3364_v39 = vrot.slane %v9898_v36, %v10829_v20 }
 0x7dc   : > { %v2340_v46 = vmul.f32 %v9365_v2, %v2248_v40  ;;  %v7610_v31 = vpop.eup %7609  ;;  %2722 = vperm.xlu1 %7359, %v2337_v11   ;;  %7619 = vrcp.f32 %v3348_v0  ;;  %v2246_v27 = vmul.f32 %v7608_v58, %v9436_v30 }
 0x7dd   : > { %v7612_v25 = vpop.eup %7611  ;;  %v2342_v24 = vmul.f32 %v9322_v16, %v2252_v51  ;;  %v2256_v14 = vmul.f32 %v7610_v31, %v9492_v45  ;;  %7621 = vrcp.f32 %v4320_v12  ;;  %v4336_v45 = vrot.slane %v9904_v13, %v10848_v19 }
 0x7de   : > { %2731 = vperm.xlu0 %7360, %v2340_v46   ;;  %v7614_v9 = vpop.eup %7613  ;;  %7623 = vrcp.f32 %v3352_v6  ;;  %v2339_v47 = vmul.f32 %v9370_v35, %v2246_v27  ;;  %v2250_v30 = vmul.f32 %v7612_v25, %v9457_v44  ;;  %v3368_v51 = vrot.slane %v9898_v36, %v10830_v54 }
 0x7df   : > { %v7616_v34 = vpop.eup %7615  ;;  %v2344_v55 = vmul.f32 %v9368_v63, %v2256_v14  ;;  %7625 = vrcp.f32 %v4328_v21  ;;  %v3382_v28 = vmul.f32 %v7614_v9, %v9332_v49  ;;  %v3372_v25 = vrot.slane %v9898_v36, %v10848_v19 }
 0x7e0   : > { %2725 = vperm.xlu1 %7359, %v2338_v37   ;;  %7627 = vrcp.f32 %v3356_v61  ;;  %v2341_v44 = vmul.f32 %v9212_v33, %v2250_v30  ;;  %v2254_v8 = vmul.f32 %v7616_v34, %v9480_v60  ;;  %v10896_v34 = vld [vmem:[#allocation105_spill] sm:$0xff] }
 0x7e1   : > { %7629 = vrcp.f32 %v4336_v45  ;;  %v3397_v17 = vmul.f32 %v3382_v28, %v9330_v4 }
 0x7e2   : > { %2737 = vperm.xlu0 %7360, %v2342_v24   ;;  %7631 = vrcp.f32 %v3360_v18  ;;  %v2343_v60 = vmul.f32 %v9372_v57, %v2254_v8  ;;  %v10898_v8 = vld [vmem:[#allocation106_spill] sm:$0xff] }
 0x7e4   : > { %2728 = vperm.xlu1 %7359, %v2339_v47  }
 0x7e5   : > { %v7618_v1 = vpop.eup %7617 }
 0x7e6   : > { %2743 = vperm.xlu0 %7360, %v2344_v55   ;;  %v9936_v7 = vpop.xlane.xlu0 %5266  ;;  %v7620_v53 = vpop.eup %7619  ;;  %v4346_v48 = vmul.f32 %v7618_v1, %v9438_v38  ;;  %v10897_v1 = vld [vmem:[#allocation27_spill] sm:$0xff] }
 0x7e7   : > { %v5276_v49 = vrot.slane %v9936_v7, %v10825_v52  ;;  %v7622_v40 = vpop.eup %7621  ;;  %v3384_v0 = vmul.f32 %v7620_v53, %v9340_v23  ;;  %v5288_v62 = vrot.slane %v9936_v7, %v10828_v22  ;;  %v5296_v6 = vrot.slane %v9936_v7, %v10830_v54 }
 0x7e8   : > { %2734 = vperm.xlu1 %7359, %v2341_v44   ;;  %v7624_v11 = vpop.eup %7623  ;;  %v4361_v58 = vmul.f32 %v4346_v48, %v9330_v4  ;;  %v4352_v38 = vmul.f32 %v7622_v40, %v9473_v42  ;;  %v10899_v48 = vmov 3  }
 0x7e9   : > { %7633 = vrcp.f32 %v5276_v49  ;;  %v7626_v46 = vpop.eup %7625  ;;  %v3398_v23 = vmul.f32 %v3384_v0, %v9317_v56  ;;  %v3386_v31 = vmul.f32 %v7624_v11, %v9344_v43  ;;  %v4324_v49 = vrot.slane %v9904_v13, %v10828_v22 }
 0x7ea   : > { %7361 = vset.pattern.permute.xlu0 %v10765_v15  ;;  %7635 = vrcp.f32 %v3364_v39  ;;  %v7628_v12 = vpop.eup %7627  ;;  %v4364_v42 = vmul.f32 %v4352_v38, %v9365_v2  ;;  %v4356_v37 = vmul.f32 %v7626_v46, %v9485_v41  ;;  %v4312_v41 = vrot.slane %v9904_v13, %v10825_v52  ;;  %v10900_v39 = vld [vmem:[#allocation29_spill] sm:$0xff] }
 0x7eb   : > { %3686 = vperm.xlu0 %7361, %v3397_v17   ;;  %7637 = vrcp.f32 %v5288_v62  ;;  %v7630_v27 = vpop.eup %7629  ;;  %v3399_v43 = vmul.f32 %v3386_v31, %v9370_v35  ;;  %v3388_v24 = vmul.f32 %v7628_v12, %v9349_v50  ;;  %v10901_v62 = vld [vmem:[#allocation108_spill] sm:$0xff]  ;;  %v4332_v38 = vrot.slane %v9904_v13, %v10830_v54 }
 0x7ec   : > { %2740 = vperm.xlu1 %7359, %v2343_v60   ;;  %7639 = vrcp.f32 %v3368_v51  ;;  %v7632_v14 = vpop.eup %7631  ;;  %v4366_v21 = vmul.f32 %v4356_v37, %v9322_v16  ;;  %v4360_v9 = vmul.f32 %v7630_v27, %v9540_v32  ;;  %v4316_v32 = vrot.slane %v9904_v13, %v10826_v26  ;;  %v10902_v51 = vld [vmem:[#allocation99_spill] sm:$0xff] }
 0x7ed   : > { %7641 = vrcp.f32 %v5296_v6  ;;  %v3400_v36 = vmul.f32 %v3388_v24, %v9365_v2  ;;  %v3390_v47 = vmul.f32 %v7632_v14, %v9354_v10  ;;  %v5272_v13 = vrot.slane %v9936_v7, %v10823_v5 }
 0x7ee   : > { %7643 = vrcp.f32 %v3372_v25  ;;  %v4368_v50 = vmul.f32 %v4360_v9, %v9368_v63 }
 0x7ef   : > { %7363 = vset.pattern.permute.xlu0 %v10767_v29  ;;  %7645 = vrcp.f32 %v4312_v41  ;;  %v3401_v28 = vmul.f32 %v3390_v47, %v9212_v33  ;;  %v10904_v41 = vld [vmem:[#allocation97_spill] sm:$0xff]  ;;  %v10905_v47 = vmov 0  }
 0x7f0   : > { %4650 = vperm.xlu0 %7363, %v4361_v58   ;;  %7362 = vset.pattern.permute.xlu1 %v10765_v15  ;;  %7647 = vrcp.f32 %v4316_v32 }
 0x7f1   : > { %3689 = vperm.xlu1 %7362, %v3398_v23   ;;  %7649 = vrcp.f32 %v4324_v49 }
 0x7f2   : > { %7651 = vrcp.f32 %v4332_v38 }
 0x7f3   : > { %v7634_v61 = vpop.eup %7633 }
 0x7f4   : > { %4659 = vperm.xlu0 %7363, %v4364_v42   ;;  %v7636_v30 = vpop.eup %7635  ;;  %v5312_v55 = vmul.f32 %v7634_v61, %v10896_v34  ;;  %v5284_v34 = vrot.slane %v9936_v7, %v10827_v59 }
 0x7f5   : > { %3692 = vperm.xlu1 %7362, %v3399_v43   ;;  %v7638_v45 = vpop.eup %7637  ;;  %v3392_v18 = vmul.f32 %v7636_v30, %v10897_v1  ;;  %v10903_v43 = vld [vmem:[#allocation30_spill] sm:$0xff] }
 0x7f6   : > { %v7640_v44 = vpop.eup %7639  ;;  %v5326_v10 = vmul.f32 %v5312_v55, %v9317_v56  ;;  %v5318_v53 = vmul.f32 %v7638_v45, %v10898_v8  ;;  %v10906_v45 = vld [vmem:[#allocation102_spill] sm:$0xff]  ;;  %v5292_v8 = vrot.slane %v9936_v7, %v10829_v20 }
 0x7f7   : > { %v7642_v17 = vpop.eup %7641  ;;  %v3402_v40 = vmul.f32 %v3392_v18, %v9322_v16  ;;  %v3394_v60 = vmul.f32 %v7640_v44, %v10900_v39  ;;  %v10907_v18 = vld [vmem:[#allocation112_spill] sm:$0xff] }
 0x7f8   : > { %4665 = vperm.xlu0 %7363, %v4366_v21   ;;  %v7644_v0 = vpop.eup %7643  ;;  %v5329_v11 = vmul.f32 %v5318_v53, %v9212_v33  ;;  %v5322_v58 = vmul.f32 %v7642_v17, %v10901_v62  ;;  %v5280_v21 = vrot.slane %v9936_v7, %v10826_v26  ;;  %v10908_v17 = vld [vmem:[#allocation98_spill] sm:$0xff] }
 0x7f9   : > { %3695 = vperm.xlu1 %7362, %v3400_v36   ;;  %v3403_v46 = vmul.f32 %v3394_v60, %v9372_v57  ;;  %v3396_v23 = vmul.f32 %v7644_v0, %v10902_v51  ;;  %v7646_v12 = vpop.eup %7645  ;;  %v10909_v60 = vld [vmem:[#allocation86_spill] sm:$0xff] }
 0x7fa   : > { %v5331_v37 = vmul.f32 %v5322_v58, %v9372_v57  ;;  %v4348_v24 = vmul.f32 %v7646_v12, %v10903_v43  ;;  %v7648_v14 = vpop.eup %7647  ;;  %v10914_v43 = vld [vmem:[#allocation101_spill] sm:$0xff] }
 0x7fb   : > { %v3404_v27 = vmul.f32 %v3396_v23, %v9368_v63  ;;  %v4350_v36 = vmul.f32 %v7648_v14, %v10904_v41  ;;  %v7650_v30 = vpop.eup %7649  ;;  %v10916_v41 = vld [vmem:[#allocation124_spill] sm:$0xff] }
 0x7fc   : > { %4671 = vperm.xlu0 %7363, %v4368_v50   ;;  %v4362_v61 = vmul.f32 %v4348_v24, %v9317_v56  ;;  %v4354_v32 = vmul.f32 %v7650_v30, %v10906_v45  ;;  %v7652_v56 = vpop.eup %7651 }
 0x7fd   : > { %3698 = vperm.xlu1 %7362, %v3401_v28   ;;  %v4363_v55 = vmul.f32 %v4350_v36, %v9370_v35  ;;  %v4358_v49 = vmul.f32 %v7652_v56, %v10908_v17  ;;  %v10918_v56 = vld [vmem:[#allocation95_spill] sm:$0xff] }
 0x7fe   : > { %v4365_v53 = vmul.f32 %v4354_v32, %v9212_v33 }
 0x7ff   : > { %v4367_v33 = vmul.f32 %v4358_v49, %v9372_v57  ;;  %v10920_v49 = vld [vmem:[#allocation104_spill] sm:$0xff] }
 0x800   : > { %7366 = vset.pattern.permute.xlu0 %v10899_v48 }
 0x801   : > { %5617 = vperm.xlu0 %7366, %v5326_v10   ;;  %3701 = vperm.xlu1 %7362, %v3402_v40  }
 0x805   : > { %5626 = vperm.xlu0 %7366, %v5329_v11   ;;  %3704 = vperm.xlu1 %7362, %v3403_v46   ;;  %v10910_v11 = vld [vmem:[#allocation116_spill] sm:$0xff] }
 0x806   : > { %v9992_v31 = vpop.xlane.xlu0 %2566  ;;  %v10911_v46 = vld [vmem:[#allocation100_spill] sm:$0xff] }
 0x807   : > { %v2576_v6 = vrot.slane %v9992_v31, %v10825_v52  ;;  %v2584_v42 = vrot.slane %v9992_v31, %v10827_v59  ;;  %v2592_v25 = vrot.slane %v9992_v31, %v10829_v20  ;;  %v2600_v9 = vrot.slane %v9992_v31, %v10848_v19 }
 0x808   : > { %v2572_v38 = vrot.slane %v9992_v31, %v10823_v5  ;;  %v2588_v45 = vrot.slane %v9992_v31, %v10828_v22 }
 0x809   : > { %7653 = vrcp.f32 %v2576_v6  ;;  %5632 = vperm.xlu0 %7366, %v5331_v37   ;;  %3707 = vperm.xlu1 %7362, %v3404_v27   ;;  %v10912_v6 = vld [vmem:[#allocation92_spill] sm:$0xff] }
 0x80a   : > { %7655 = vrcp.f32 %v2584_v42  ;;  %v10913_v37 = vld [vmem:[#allocation120_spill] sm:$0xff] }
 0x80b   : > { %7657 = vrcp.f32 %v5272_v13 }
 0x80c   : > { %7659 = vrcp.f32 %v2592_v25  ;;  %v2580_v25 = vrot.slane %v9992_v31, %v10826_v26 }
 0x80d   : > { %7368 = vset.pattern.permute.xlu0 %v10905_v47  ;;  %7364 = vset.pattern.permute.xlu1 %v10767_v29  ;;  %7661 = vrcp.f32 %v5280_v21 }
 0x80e   : > { %4653 = vperm.xlu1 %7364, %v4362_v61   ;;  %7663 = vrcp.f32 %v2600_v9  ;;  %v10915_v9 = vld [vmem:[#allocation94_spill] sm:$0xff] }
 0x80f   : > { %v10013_v50 = vpop.xlane.xlu0 %3610  ;;  %7665 = vrcp.f32 %v5284_v34 }
 0x810   : > { %v3616_v28 = vrot.slane %v10013_v50, %v10823_v5  ;;  %v3624_v39 = vrot.slane %v10013_v50, %v10826_v26  ;;  %v3632_v12 = vrot.slane %v10013_v50, %v10828_v22  ;;  %v3640_v21 = vrot.slane %v10013_v50, %v10830_v54 }
 0x812   : > { %4656 = vperm.xlu1 %7364, %v4363_v55   ;;  %7667 = vrcp.f32 %v3616_v28 }
 0x813   : > { %v7654_v1 = vpop.eup %7653  ;;  %7669 = vrcp.f32 %v5292_v8 }
 0x814   : > { %v2612_v44 = vmul.f32 %v7654_v1, %v10907_v18  ;;  %v7656_v10 = vpop.eup %7655  ;;  %7671 = vrcp.f32 %v3624_v39 }
 0x815   : > { %v7658_v40 = vpop.eup %7657  ;;  %v2616_v62 = vmul.f32 %v7656_v10, %v10910_v11  ;;  %7673 = vrcp.f32 %v2572_v38 }
 0x816   : > { %v2706_v0 = vmul.f32 %v10909_v60, %v2612_v44  ;;  %v7660_v58 = vpop.eup %7659  ;;  %4662 = vperm.xlu1 %7364, %v4365_v53   ;;  %v5310_v51 = vmul.f32 %v7658_v40, %v10911_v46  ;;  %7675 = vrcp.f32 %v3632_v12  ;;  %v10919_v44 = vld [vmem:[#allocation107_spill] sm:$0xff]  ;;  %v2596_v53 = vrot.slane %v9992_v31, %v10830_v54  ;;  %v10924_v12 = vld [vmem:[#allocation93_spill] sm:$0xff] }
 0x817   : > { %v7662_v23 = vpop.eup %7661  ;;  %v2708_v42 = vmul.f32 %v10912_v6, %v2616_v62  ;;  %v2620_v13 = vmul.f32 %v7660_v58, %v10913_v37  ;;  %7677 = vrcp.f32 %v2580_v25  ;;  %v10922_v62 = vld [vmem:[#allocation111_spill] sm:$0xff]  ;;  %v10925_v37 = vld [vmem:[#allocation113_spill] sm:$0xff]  ;;  %v3628_v25 = vrot.slane %v10013_v50, %v10827_v59 }
 0x818   : > { %2927 = vperm.xlu0 %7368, %v2706_v0   ;;  %v7664_v27 = vpop.eup %7663  ;;  %v5325_v57 = vmul.f32 %v5310_v51, %v9330_v4  ;;  %v5314_v24 = vmul.f32 %v7662_v23, %v10914_v43  ;;  %v10917_v4 = vld [vmem:[#allocation103_spill] sm:$0xff]  ;;  %7679 = vrcp.f32 %v3640_v21 }
 0x819   : > { %v7666_v14 = vpop.eup %7665  ;;  %v2710_v61 = vmul.f32 %v10915_v9, %v2620_v13  ;;  %v2624_v36 = vmul.f32 %v7664_v27, %v10916_v41  ;;  %7681 = vrcp.f32 %v2588_v45  ;;  %v10921_v0 = vld [vmem:[#allocation87_spill] sm:$0xff] }
 0x81a   : > { %4668 = vperm.xlu1 %7364, %v4367_v33   ;;  %v5316_v55 = vmul.f32 %v7666_v14, %v10917_v4  ;;  %v5327_v32 = vmul.f32 %v5314_v24, %v9370_v35  ;;  %v10923_v33 = vld [vmem:[#allocation110_spill] sm:$0xff]  ;;  %v10927_v14 = vld [vmem:[#allocation32_spill] sm:$0xff] }
 0x81b   : > { %v2712_v28 = vmul.f32 %v10918_v56, %v2624_v36 }
 0x81c   : > { %2933 = vperm.xlu0 %7368, %v2708_v42   ;;  %v7668_v30 = vpop.eup %7667  ;;  %v10047_v34 = vpop.xlane.xlu0 %4574  ;;  %v5328_v17 = vmul.f32 %v5316_v55, %v9365_v2  ;;  %v3620_v2 = vrot.slane %v10013_v50, %v10825_v52  ;;  %v3636_v55 = vrot.slane %v10013_v50, %v10829_v20 }
 0x81d   : > { %v7670_v1 = vpop.eup %7669  ;;  %v4584_v18 = vrot.slane %v10047_v34, %v10825_v52  ;;  %v3654_v10 = vmul.f32 %v7668_v30, %v10919_v44  ;;  %v4592_v39 = vrot.slane %v10047_v34, %v10827_v59  ;;  %v4600_v23 = vrot.slane %v10047_v34, %v10829_v20 }
 0x81e   : > { %7365 = vset.pattern.permute.xlu1 %v10899_v48  ;;  %v7672_v8 = vpop.eup %7671  ;;  %v5320_v40 = vmul.f32 %v7670_v1, %v10920_v49  ;;  %v4608_v24 = vrot.slane %v10047_v34, %v10848_v19  ;;  %v10930_v1 = vld [vmem:[#allocation118_spill] sm:$0xff] }
 0x81f   : > { %5614 = vperm.xlu1 %7365, %v5325_v57   ;;  %v7674_v35 = vpop.eup %7673  ;;  %7683 = vrcp.f32 %v4584_v18  ;;  %v3669_v11 = vmul.f32 %v3654_v10, %v10921_v0  ;;  %v3658_v58 = vmul.f32 %v7672_v8, %v10922_v62  ;;  %v10926_v57 = vld [vmem:[#allocation114_spill] sm:$0xff]  ;;  %v10931_v10 = vld [vmem:[#allocation128_spill] sm:$0xff] }
 0x820   : > { %2939 = vperm.xlu0 %7368, %v2710_v61   ;;  %v7676_v38 = vpop.eup %7675  ;;  %7685 = vrcp.f32 %v2596_v53  ;;  %v5330_v31 = vmul.f32 %v5320_v40, %v9322_v16  ;;  %v2610_v46 = vmul.f32 %v7674_v35, %v10923_v33  ;;  %v10928_v61 = vld [vmem:[#allocation117_spill] sm:$0xff]  ;;  %v10932_v40 = vld [vmem:[#allocation122_spill] sm:$0xff] }
 0x821   : > { %v7678_v51 = vpop.eup %7677  ;;  %7687 = vrcp.f32 %v4592_v39  ;;  %v3671_v42 = vmul.f32 %v3658_v58, %v10924_v12  ;;  %v3662_v13 = vmul.f32 %v7676_v38, %v10925_v37  ;;  %v10933_v58 = vld [vmem:[#allocation130_spill] sm:$0xff]  ;;  %v10934_v33 = vld [vmem:[#allocation109_spill] sm:$0xff]  ;;  %v10935_v37 = vld [vmem:[#allocation132_spill] sm:$0xff] }
 0x822   : > { %v7680_v27 = vpop.eup %7679  ;;  %7689 = vrcp.f32 %v3620_v2  ;;  %v2705_v16 = vmul.f32 %v10921_v0, %v2610_v46  ;;  %v2614_v43 = vmul.f32 %v7678_v51, %v10926_v57 }
 0x823   : > { %5620 = vperm.xlu1 %7365, %v5327_v32   ;;  %7691 = vrcp.f32 %v4600_v23  ;;  %v3673_v21 = vmul.f32 %v3662_v13, %v10927_v14  ;;  %v3666_v41 = vmul.f32 %v7680_v27, %v10928_v61  ;;  %v7682_v36 = vpop.eup %7681  ;;  %v10929_v32 = vld [vmem:[#allocation96_spill] sm:$0xff] }
 0x824   : > { %2945 = vperm.xlu0 %7368, %v2712_v28   ;;  %7693 = vrcp.f32 %v3628_v25  ;;  %v2707_v45 = vmul.f32 %v10924_v12, %v2614_v43  ;;  %v2618_v18 = vmul.f32 %v7682_v36, %v10930_v1  ;;  %v4588_v25 = vrot.slane %v10047_v34, %v10826_v26 }
 0x825   : > { %7695 = vrcp.f32 %v4608_v24  ;;  %v3675_v28 = vmul.f32 %v3666_v41, %v10929_v32 }
 0x826   : > { %7697 = vrcp.f32 %v3636_v55  ;;  %v2709_v49 = vmul.f32 %v10927_v14, %v2618_v18  ;;  %v10939_v18 = vld [vmem:[#allocation136_spill] sm:$0xff] }
 0x827   : > { %5623 = vperm.xlu1 %7365, %v5328_v17   ;;  %v3644_v17 = vrot.slane %v10013_v50, %v10848_v19  ;;  %v4580_v50 = vrot.slane %v10047_v34, %v10823_v5 }
 0x828   : > { %7369 = vset.pattern.permute.xlu0 %v10765_v15 }
 0x829   : > { %3888 = vperm.xlu0 %7369, %v3669_v11   ;;  %v7684_v30 = vpop.eup %7683 }
 0x82a   : > { %v7686_v44 = vpop.eup %7685  ;;  %v4620_v8 = vmul.f32 %v7684_v30, %v10931_v10  ;;  %v10940_v10 = vld [vmem:[#allocation119_spill] sm:$0xff] }
 0x82b   : > { %5629 = vperm.xlu1 %7365, %v5330_v31   ;;  %v7688_v53 = vpop.eup %7687  ;;  %v2622_v35 = vmul.f32 %v7686_v44, %v10932_v40 }
 0x82c   : > { %v7690_v39 = vpop.eup %7689  ;;  %v4634_v62 = vmul.f32 %v4620_v8, %v10909_v60  ;;  %v4624_v38 = vmul.f32 %v7688_v53, %v10933_v58 }
 0x82d   : > { %3894 = vperm.xlu0 %7369, %v3671_v42   ;;  %v7692_v2 = vpop.eup %7691  ;;  %v2711_v31 = vmul.f32 %v10929_v32, %v2622_v35  ;;  %v3656_v46 = vmul.f32 %v7690_v39, %v10934_v33  ;;  %v5300_v39 = vrot.slane %v9936_v7, %v10848_v19 }
 0x82e   : > { %v10083_v4 = vpop.xlane.xlu1 %5538  ;;  %v7694_v51 = vpop.eup %7693  ;;  %v4636_v42 = vmul.f32 %v4624_v38, %v10912_v6  ;;  %v4628_v13 = vmul.f32 %v7692_v2, %v10935_v37  ;;  %v10943_v38 = vld [vmem:[#allocation138_spill] sm:$0xff] }
 0x82f   : > { %7367 = vset.pattern.permute.xlu1 %v10905_v47  ;;  %v5544_v47 = vrot.slane %v10083_v4, %v10823_v5  ;;  %v5552_v11 = vrot.slane %v10083_v4, %v10826_v26  ;;  %v5560_v23 = vrot.slane %v10083_v4, %v10828_v22  ;;  %v7696_v27 = vpop.eup %7695  ;;  %v3670_v5 = vmul.f32 %v3656_v46, %v10909_v60 }
 0x830   : > { %2924 = vperm.xlu1 %7367, %v2705_v16   ;;  %v10936_v16 = vld [vmem:[#allocation126_spill] sm:$0xff]  ;;  %v5568_v43 = vrot.slane %v10083_v4, %v10830_v54  ;;  %v4638_v24 = vmul.f32 %v4628_v13, %v10915_v9  ;;  %v7698_v41 = vpop.eup %7697  ;;  %v4596_v26 = vrot.slane %v10047_v34, %v10828_v22  ;;  %v5548_v46 = vrot.slane %v10083_v4, %v10825_v52  ;;  %v10946_v52 = vld [vmem:[#allocation125_spill] sm:$0xff] }
 0x831   : > { %3900 = vperm.xlu0 %7369, %v3673_v21   ;;  %7699 = vrcp.f32 %v5544_v47  ;;  %v3660_v57 = vmul.f32 %v7694_v51, %v10936_v16  ;;  %v10937_v21 = vld [vmem:[#allocation134_spill] sm:$0xff]  ;;  %v5564_v16 = vrot.slane %v10083_v4, %v10829_v20 }
 0x832   : > { %7701 = vrcp.f32 %v3644_v17  ;;  %v4632_v61 = vmul.f32 %v7696_v27, %v10937_v21  ;;  %v5556_v27 = vrot.slane %v10083_v4, %v10827_v59  ;;  %v5572_v59 = vrot.slane %v10083_v4, %v10848_v19 }
 0x833   : > { %7703 = vrcp.f32 %v5552_v11  ;;  %v3672_v30 = vmul.f32 %v3660_v57, %v10912_v6  ;;  %v10947_v57 = vld [vmem:[#allocation127_spill] sm:$0xff] }
 0x834   : > { %2930 = vperm.xlu1 %7367, %v2707_v45   ;;  %7705 = vrcp.f32 %v4580_v50  ;;  %v4640_v55 = vmul.f32 %v4632_v61, %v10918_v56  ;;  %v10938_v45 = vld [vmem:[#allocation115_spill] sm:$0xff] }
 0x835   : > { %3906 = vperm.xlu0 %7369, %v3675_v28   ;;  %7707 = vrcp.f32 %v5560_v23  ;;  %v3664_v28 = vmul.f32 %v7698_v41, %v10938_v45  ;;  %v10945_v23 = vld [vmem:[#allocation139_spill] sm:$0xff]  ;;  %v10949_v45 = vld [vmem:[#allocation129_spill] sm:$0xff] }
 0x836   : > { %7709 = vrcp.f32 %v4588_v25  ;;  %v10948_v41 = vld [vmem:[#allocation31_spill] sm:$0xff] }
 0x837   : > { %7711 = vrcp.f32 %v5568_v43  ;;  %v3674_v22 = vmul.f32 %v3664_v28, %v10915_v9 }
 0x838   : > { %2936 = vperm.xlu1 %7367, %v2709_v49   ;;  %7713 = vrcp.f32 %v4596_v26  ;;  %v10941_v49 = vld [vmem:[#allocation137_spill] sm:$0xff] }
 0x839   : > { %7372 = vset.pattern.permute.xlu0 %v10767_v29 }
 0x83a   : > { %4855 = vperm.xlu0 %7372, %v4634_v62   ;;  %v10942_v62 = vld [vmem:[#allocation121_spill] sm:$0xff] }
 0x83b   : > { %v7700_v36 = vpop.eup %7699 }
 0x83c   : > { %2942 = vperm.xlu1 %7367, %v2711_v31   ;;  %v7702_v1 = vpop.eup %7701  ;;  %v5582_v44 = vmul.f32 %v7700_v36, %v10939_v18  ;;  %v10944_v31 = vld [vmem:[#allocation123_spill] sm:$0xff] }
 0x83d   : > { %v7704_v47 = vpop.eup %7703  ;;  %v3668_v8 = vmul.f32 %v7702_v1, %v10940_v10 }
 0x83e   : > { %4861 = vperm.xlu0 %7372, %v4636_v42   ;;  %v7706_v53 = vpop.eup %7705  ;;  %v5597_v17 = vmul.f32 %v5582_v44, %v10921_v0  ;;  %v5586_v40 = vmul.f32 %v7704_v47, %v10941_v49 }
 0x83f   : > { %v7708_v35 = vpop.eup %7707  ;;  %v4618_v58 = vmul.f32 %v7706_v53, %v10942_v62 }
 0x840   : > { %7370 = vset.pattern.permute.xlu1 %v10765_v15  ;;  %v4604_v15 = vrot.slane %v10047_v34, %v10830_v54  ;;  %v3676_v54 = vmul.f32 %v3668_v8, %v10918_v56  ;;  %v7710_v34 = vpop.eup %7709  ;;  %v5599_v11 = vmul.f32 %v5586_v40, %v10924_v12  ;;  %v5590_v2 = vmul.f32 %v7708_v35, %v10943_v38  ;;  %v10951_v35 = vld [vmem:[#allocation133_spill] sm:$0xff] }
 0x841   : > { %3891 = vperm.xlu1 %7370, %v3670_v5   ;;  %v7712_v50 = vpop.eup %7711  ;;  %v4622_v33 = vmul.f32 %v7710_v34, %v10944_v31  ;;  %v4633_v7 = vmul.f32 %v4618_v58, %v10921_v0 }
 0x842   : > { %4867 = vperm.xlu0 %7372, %v4638_v24   ;;  %7715 = vrcp.f32 %v4604_v15  ;;  %v5601_v51 = vmul.f32 %v5590_v2, %v10927_v14  ;;  %v5594_v42 = vmul.f32 %v7712_v50, %v10945_v23  ;;  %v7714_v37 = vpop.eup %7713  ;;  %v10950_v15 = vld [vmem:[#allocation131_spill] sm:$0xff] }
 0x843   : > { %7717 = vrcp.f32 %v5300_v39  ;;  %v4635_v13 = vmul.f32 %v4622_v33, %v10924_v12  ;;  %v4626_v5 = vmul.f32 %v7714_v37, %v10946_v52  ;;  %v10952_v50 = vld [vmem:[#allocation135_spill] sm:$0xff]  ;;  %v10953_v37 = vld [vmem:[#allocation36_spill] sm:$0xff] }
 0x844   : > { %7719 = vrcp.f32 %v5548_v46  ;;  %v5603_v25 = vmul.f32 %v5594_v42, %v10929_v32 }
 0x845   : > { %3897 = vperm.xlu1 %7370, %v3672_v30   ;;  %7721 = vrcp.f32 %v5556_v27  ;;  %v10955_v27 = vld [vmem:[#allocation44_spill] sm:$0xff] }
 0x846   : > { %4873 = vperm.xlu0 %7372, %v4640_v55   ;;  %7723 = vrcp.f32 %v5564_v16 }
 0x847   : > { %7725 = vrcp.f32 %v5572_v59 }
 0x849   : > { %3903 = vperm.xlu1 %7370, %v3674_v22  }
 0x84a   : > { %7374 = vset.pattern.permute.xlu0 %v10899_v48 }
 0x84b   : > { %5816 = vperm.xlu0 %7374, %v5597_v17  }
 0x84c   : > { %v7716_v0 = vpop.eup %7715 }
 0x84d   : > { %3909 = vperm.xlu1 %7370, %v3676_v54   ;;  %v4630_v43 = vmul.f32 %v7716_v0, %v10947_v57  ;;  %v7718_v12 = vpop.eup %7717  ;;  %v10957_v0 = vld [vmem:[#allocation53_spill] sm:$0xff]  ;;  %v10959_v57 = vld [vmem:[#allocation60_spill] sm:$0xff] }
 0x84e   : > { %v5324_v36 = vmul.f32 %v7718_v12, %v10948_v41  ;;  %v7720_v26 = vpop.eup %7719  ;;  %v10960_v12 = vld [vmem:[#allocation33_spill] sm:$0xff] }
 0x84f   : > { %5822 = vperm.xlu0 %7374, %v5599_v11   ;;  %v4639_v61 = vmul.f32 %v4630_v43, %v10929_v32  ;;  %v5584_v28 = vmul.f32 %v7720_v26, %v10949_v45  ;;  %v7722_v1 = vpop.eup %7721 }
 0x850   : > { %v5332_v55 = vmul.f32 %v5324_v36, %v9368_v63  ;;  %v5588_v22 = vmul.f32 %v7722_v1, %v10950_v15  ;;  %v7724_v10 = vpop.eup %7723  ;;  %v10961_v15 = vld [vmem:[#allocation37_spill] sm:$0xff] }
 0x851   : > { %7371 = vset.pattern.permute.xlu1 %v10767_v29  ;;  %v4637_v29 = vmul.f32 %v4626_v5, %v10927_v14  ;;  %v5598_v47 = vmul.f32 %v5584_v28, %v10909_v60  ;;  %v5592_v39 = vmul.f32 %v7724_v10, %v10951_v35  ;;  %v7726_v54 = vpop.eup %7725 }
 0x852   : > { %4852 = vperm.xlu1 %7371, %v4633_v7   ;;  %v5600_v40 = vmul.f32 %v5588_v22, %v10912_v6  ;;  %v5596_v31 = vmul.f32 %v7726_v54, %v10952_v50 }
 0x853   : > { %5828 = vperm.xlu0 %7374, %v5601_v51   ;;  %v5602_v2 = vmul.f32 %v5592_v39, %v10915_v9  ;;  %v10954_v9 = vld [vmem:[#allocation38_spill] sm:$0xff]  ;;  %v10964_v39 = vld [vmem:[#allocation47_spill] sm:$0xff] }
 0x854   : > { %v5604_v51 = vmul.f32 %v5596_v31, %v10918_v56  ;;  %v10958_v56 = vld [vmem:[#allocation52_spill] sm:$0xff] }
 0x856   : > { %4858 = vperm.xlu1 %7371, %v4635_v13  }
 0x857   : > { %5834 = vperm.xlu0 %7374, %v5603_v25   ;;  %v10956_v25 = vld [vmem:[#allocation45_spill] sm:$0xff] }
 0x85a   : > { %4864 = vperm.xlu1 %7371, %v4637_v29  }
 0x85b   : > { %v2723_v24 = vpop.permute.xlu1 %2722 }
 0x85c   : > { %v2748_v19 = vrot.slane %v2723_v24, %v8257_v3 }
 0x85d   : > { %v2732_v21 = vpop.permute.xlu0 %2731 }
 0x85e   : > { %4870 = vperm.xlu1 %7371, %v4639_v61   ;;  %v2760_v8 = vrot.slane %v2732_v21, %v8257_v3 }
 0x85f   : > { %v2726_v20 = vpop.permute.xlu1 %2725 }
 0x860   : > { %v2752_v14 = vrot.slane %v2726_v20, %v8257_v3 }
 0x861   : > { %v2738_v30 = vpop.permute.xlu0 %2737 }
 0x862   : > { %7373 = vset.pattern.permute.xlu1 %v10899_v48  ;;  %v2777_v44 = vsel %vm2041_vm1, %v2752_v14, %v2748_v19  ;;  %v2768_v34 = vrot.slane %v2738_v30, %v8257_v3 }
 0x863   : > { %v2729_v4 = vpop.permute.xlu1 %2728  ;;  %5635 = vperm.xlu1 %7373, %v5332_v55  }
 0x864   : > { %v2756_v32 = vrot.slane %v2729_v4, %v8257_v3 }
 0x865   : > { %v2744_v18 = vpop.permute.xlu0 %2743 }
 0x866   : > { %v2778_v63 = vsel %vm2043_vm2, %v2756_v32, %v2777_v44  ;;  %v2776_v58 = vrot.slane %v2744_v18, %v8257_v3 }
 0x867   : > { %v2735_v53 = vpop.permute.xlu1 %2734  ;;  %5819 = vperm.xlu1 %7373, %v5598_v47   ;;  %v2779_v17 = vsel %vm2045_vm3, %v2760_v8, %v2778_v63  ;;  %v10962_v63 = vld [vmem:[#allocation40_spill] sm:$0xff] }
 0x868   : > { %v2764_v48 = vrot.slane %v2735_v53, %v8257_v3 }
 0x86a   : > { %v3687_v49 = vpop.permute.xlu0 %3686  ;;  %v2780_v60 = vsel %vm2047_vm4, %v2764_v48, %v2779_v17 }
 0x86b   : > { %v2741_v11 = vpop.permute.xlu1 %2740  ;;  %5825 = vperm.xlu1 %7373, %v5600_v40   ;;  %v2781_v38 = vsel %vm2049_vm5, %v2768_v34, %v2780_v60  ;;  %v3712_v59 = vrot.slane %v3687_v49, %v8257_v3  ;;  %v10963_v49 = vld [vmem:[#allocation46_spill] sm:$0xff] }
 0x86c   : > { %v2772_v62 = vrot.slane %v2741_v11, %v8257_v3 }
 0x86e   : > { %v2782_v6 = vsel %vm2051_vm6, %v2772_v62, %v2781_v38  ;;  %v10965_v62 = vld [vmem:[#allocation55_spill] sm:$0xff] }
 0x86f   : > { %v4651_v33 = vpop.permute.xlu0 %4650  ;;  %5831 = vperm.xlu1 %7373, %v5602_v2   ;;  %v2783_v46 = vsel %vm2053_vm7, %v2776_v58, %v2782_v6  ;;  %v10966_v2 = vld [vmem:[#allocation54_spill] sm:$0xff] }
 0x870   : > { %v3690_v7 = vpop.permute.xlu1 %3689  ;;  %7016 = vmatprep.subr.msk.mxu0 %vm2056_vm8, %v2783_v46  ;;  %v4676_v22 = vrot.slane %v4651_v33, %v8257_v3 }
 0x871   : > { %7017 = vmatpush3.xpose.msk.msra.mxu0 %vm2056_vm8, %v2783_v46  ;;  %v3716_v43 = vrot.slane %v3690_v7, %v8257_v3  ;;  %v10967_v7 = vld [vmem:[#allocation61_spill] sm:$0xff] }
 0x873   : > { %5837 = vperm.xlu1 %7373, %v5604_v51   ;;  %v4660_v23 = vpop.permute.xlu0 %4659  ;;  %v3741_v36 = vsel %vm2041_vm1, %v3716_v43, %v3712_v59  ;;  %v10968_v51 = vld [vmem:[#allocation34_spill] sm:$0xff] }
 0x874   : > { %v3693_v42 = vpop.permute.xlu1 %3692  ;;  %7019 = vmatmul.mubr.msk.f32.vlgmr.msra.gmra.mrb[12].mxu0 %vm2056_vm8, %v10953_v37  ;;  %v4688_v40 = vrot.slane %v4660_v23, %v8257_v3  ;;  %v10975_v43 = vld [vmem:[#allocation62_spill] sm:$0xff] }
 0x875   : > { %7021 = vmatprep.mubr.msk.f32.mxu0 %vm2056_vm8, %v10954_v9  ;;  %v3720_v24 = vrot.slane %v3693_v42, %v8257_v3 }
 0x877   : > { %v4666_v52 = vpop.permute.xlu0 %4665  ;;  %v3742_v20 = vsel %vm2043_vm2, %v3720_v24, %v3741_v36  ;;  %v10976_v24 = vld [vmem:[#allocation35_spill] sm:$0xff] }
 0x878   : > { %v3696_v13 = vpop.permute.xlu1 %3695  ;;  %7022 = vmatmul.mubr.msk.f32.gmra.mrb[14].mxu0 %vm2056_vm8, %v10955_v27  ;;  %v4696_v58 = vrot.slane %v4666_v52, %v8257_v3  ;;  %v10970_v27 = vld [vmem:[#allocation42_spill] sm:$0xff]  ;;  %v10971_v52 = vld [vmem:[#allocation48_spill] sm:$0xff] }
 0x879   : > { %7024 = vmatprep.mubr.msk.f32.mxu0 %vm2056_vm8, %v10956_v25  ;;  %v3724_v21 = vrot.slane %v3696_v13, %v8257_v3  ;;  %v10969_v13 = vld [vmem:[#allocation39_spill] sm:$0xff] }
 0x87b   : > { %v4672_v16 = vpop.permute.xlu0 %4671  ;;  %v3743_v55 = vsel %vm2045_vm3, %v3724_v21, %v3742_v20 }
 0x87c   : > { %v3699_v5 = vpop.permute.xlu1 %3698  ;;  %7025 = vmatmul.mubr.msk.f32.gmra.mrb[16].mxu0 %vm2056_vm8, %v10957_v0  ;;  %v4704_v31 = vrot.slane %v4672_v16, %v8257_v3  ;;  %v10972_v0 = vld [vmem:[#allocation49_spill] sm:$0xff] }
 0x87d   : > { %7027 = vmatprep.mubr.msk.f32.mxu0 %vm2056_vm8, %v10958_v56  ;;  %v3728_v61 = vrot.slane %v3699_v5, %v8257_v3  ;;  %v10973_v16 = vld [vmem:[#allocation57_spill] sm:$0xff] }
 0x87f   : > { %v3744_v45 = vsel %vm2047_vm4, %v3728_v61, %v3743_v55 }
 0x880   : > { %v3702_v29 = vpop.permute.xlu1 %3701  ;;  %7028 = vmatmul.mubr.msk.f32.gmra.mrb[18].mxu0 %vm2056_vm8, %v10959_v57  ;;  %v10209_v30 = vpop.permute.xlu0 %5617 }
 0x881   : > { %7046 = vmatprep.mubr.msk.f32.mxu0 %vm2056_vm8, %v10960_v12  ;;  %v3732_v26 = vrot.slane %v3702_v29, %v8257_v3  ;;  %v10974_v29 = vld [vmem:[#allocation56_spill] sm:$0xff] }
 0x883   : > { %v3745_v1 = vsel %vm2049_vm5, %v3732_v26, %v3744_v45 }
 0x884   : > { %v3705_v41 = vpop.permute.xlu1 %3704  ;;  %v10218_v18 = vpop.permute.xlu0 %5626 }
 0x885   : > { %v3736_v14 = vrot.slane %v3705_v41, %v8257_v3 }
 0x887   : > { %v3746_v4 = vsel %vm2051_vm6, %v3736_v14, %v3745_v1 }
 0x888   : > { %v3708_v28 = vpop.permute.xlu1 %3707  ;;  %v10228_v8 = vpop.permute.xlu0 %5632 }
 0x889   : > { %v3740_v19 = vrot.slane %v3708_v28, %v8257_v3 }
 0x88b   : > { %v3747_v32 = vsel %vm2053_vm7, %v3740_v19, %v3746_v4 }
 0x88c   : > { %7044 = vmatprep.subr.msk.mxu0 %vm2056_vm8, %v3747_v32 }
 0x88d   : > { %v4654_v44 = vpop.permute.xlu1 %4653  ;;  %7045 = vmatpush3.xpose.msk.msra.mxu0 %vm2056_vm8, %v3747_v32 }
 0x88e   : > { %v4680_v47 = vrot.slane %v4654_v44, %v8257_v3 }
 0x890   : > { %7047 = vmatmul.mubr.msk.f32.vlgmr.msra.gmra.mrb[20].mxu0 %vm2056_vm8, %v10961_v15  ;;  %v4705_v48 = vsel %vm2041_vm1, %v4680_v47, %v4676_v22 }
 0x891   : > { %v4657_v10 = vpop.permute.xlu1 %4656  ;;  %7049 = vmatprep.mubr.msk.f32.mxu0 %vm2056_vm8, %v10962_v63 }
 0x892   : > { %v4684_v53 = vrot.slane %v4657_v10, %v8257_v3 }
 0x894   : > { %v4706_v17 = vsel %vm2043_vm2, %v4684_v53, %v4705_v48  ;;  %7050 = vmatmul.mubr.msk.f32.gmra.mrb[22].mxu0 %vm2056_vm8, %v10963_v49 }
 0x895   : > { %v4663_v35 = vpop.permute.xlu1 %4662  ;;  %7052 = vmatprep.mubr.msk.f32.mxu0 %vm2056_vm8, %v10964_v39  ;;  %v4707_v34 = vsel %vm2045_vm3, %v4688_v40, %v4706_v17  ;;  %v10977_v39 = vld [vmem:[#allocation74_spill] sm:$0xff] }
 0x896   : > { %v4692_v54 = vrot.slane %v4663_v35, %v8257_v3 }
 0x897   : > { %v2928_v60 = vpop.permute.xlu0 %2927 }
 0x898   : > { %v4708_v11 = vsel %vm2047_vm4, %v4692_v54, %v4707_v34  ;;  %7053 = vmatmul.mubr.msk.f32.gmra.mrb[24].mxu0 %vm2056_vm8, %v10965_v62  ;;  %v2954_v21 = vrot.slane %v2928_v60, %v8257_v3  ;;  %v10978_v34 = vld [vmem:[#allocation67_spill] sm:$0xff] }
 0x899   : > { %v4669_v38 = vpop.permute.xlu1 %4668  ;;  %7055 = vmatprep.mubr.msk.f32.mxu0 %vm2056_vm8, %v10966_v2  ;;  %v4709_v6 = vsel %vm2049_vm5, %v4696_v58, %v4708_v11  ;;  %v10979_v2 = vld [vmem:[#allocation82_spill] sm:$0xff] }
 0x89a   : > { %v4700_v50 = vrot.slane %v4669_v38, %v8257_v3 }
 0x89b   : > { %v2934_v33 = vpop.permute.xlu0 %2933 }
 0x89c   : > { %v4710_v46 = vsel %vm2051_vm6, %v4700_v50, %v4709_v6  ;;  %7056 = vmatmul.mubr.msk.f32.gmra.mrb[26].mxu0 %vm2056_vm8, %v10967_v7  ;;  %v2962_v14 = vrot.slane %v2934_v33, %v8257_v3 }
 0x89d   : > { %7074 = vmatprep.mubr.msk.f32.mxu0 %vm2056_vm8, %v10968_v51  ;;  %v4711_v23 = vsel %vm2053_vm7, %v4704_v31, %v4710_v46  ;;  %v10980_v31 = vld [vmem:[#allocation71_spill] sm:$0xff] }
 0x89e   : > { %v10255_v42 = vpop.permute.xlu1 %5614  ;;  %7072 = vmatprep.subr.msk.mxu0 %vm2056_vm8, %v4711_v23 }
 0x89f   : > { %7073 = vmatpush3.xpose.msk.msra.mxu0 %vm2056_vm8, %v4711_v23  ;;  %v2940_v37 = vpop.permute.xlu0 %2939  ;;  %v10981_v23 = vld [vmem:[#allocation23_spill] sm:$0xff] }
 0x8a0   : > { %v2970_v4 = vrot.slane %v2940_v37, %v8257_v3 }
 0x8a2   : > { %v10259_v9 = vpop.permute.xlu1 %5620  ;;  %7075 = vmatmul.mubr.msk.f32.vlgmr.msra.gmra.mrb[28].mxu0 %vm2056_vm8, %v10969_v13  ;;  %v10982_v13 = vld [vmem:[#allocation77_spill] sm:$0xff] }
 0x8a3   : > { %7077 = vmatprep.mubr.msk.f32.mxu0 %vm2056_vm8, %v10970_v27  ;;  %v2946_v5 = vpop.permute.xlu0 %2945 }
 0x8a4   : > { %v2978_v47 = vrot.slane %v2946_v5, %v8257_v3  ;;  %v10983_v5 = vld [vmem:[#allocation88_spill] sm:$0xff] }
 0x8a6   : > { %v10265_v25 = vpop.permute.xlu1 %5623  ;;  %7078 = vmatmul.mubr.msk.f32.gmra.mrb[30].mxu0 %vm2056_vm8, %v10971_v52 }
 0x8a7   : > { %7080 = vmatprep.mubr.msk.f32.mxu0 %vm2056_vm8, %v10972_v0 }
 0x8a8   : > { %v3889_v57 = vpop.permute.xlu0 %3888 }
 0x8a9   : > { %v3914_v48 = vrot.slane %v3889_v57, %v8257_v3 }
 0x8aa   : > { %v10271_v56 = vpop.permute.xlu1 %5629  ;;  %7081 = vmatmul.mubr.msk.f32.gmra.mrb[32].mxu0 %vm2056_vm8, %v10973_v16 }
 0x8ab   : > { %7083 = vmatprep.mubr.msk.f32.mxu0 %vm2056_vm8, %v10974_v29  ;;  %v10984_v29 = vld [vmem:[#allocation64_spill] sm:$0xff] }
 0x8ac   : > { %v3895_v61 = vpop.permute.xlu0 %3894 }
 0x8ad   : > { %v3922_v40 = vrot.slane %v3895_v61, %v8257_v3  ;;  %v5640_v61 = vrot.slane %v10255_v42, %v8257_v3 }
 0x8ae   : > { %7084 = vmatmul.mubr.msk.f32.gmra.mrb[34].mxu0 %vm2056_vm8, %v10975_v43  ;;  %v10985_v43 = vld [vmem:[#allocation76_spill] sm:$0xff] }
 0x8af   : > { %v2925_v12 = vpop.permute.xlu1 %2924  ;;  %7102 = vmatprep.mubr.msk.f32.mxu0 %vm2056_vm8, %v10976_v24 }
 0x8b0   : > { %v2950_v59 = vrot.slane %v2925_v12, %v8257_v3  ;;  %v3901_v28 = vpop.permute.xlu0 %3900 }
 0x8b1   : > { %v3930_v58 = vrot.slane %v3901_v28, %v8257_v3 }
 0x8b2   : > { %v2979_v26 = vsel %vm2041_vm1, %v2954_v21, %v2950_v59  ;;  %v10986_v59 = vld [vmem:[#allocation68_spill] sm:$0xff] }
 0x8b3   : > { %v2931_v41 = vpop.permute.xlu1 %2930 }
 0x8b4   : > { %v2958_v36 = vrot.slane %v2931_v41, %v8257_v3  ;;  %v3907_v10 = vpop.permute.xlu0 %3906 }
 0x8b5   : > { %v3938_v7 = vrot.slane %v3907_v10, %v8257_v3 }
 0x8b6   : > { %v2980_v20 = vsel %vm2043_vm2, %v2958_v36, %v2979_v26  ;;  %v5648_v26 = vrot.slane %v10259_v9, %v8257_v3 }
 0x8b7   : > { %v2937_v55 = vpop.permute.xlu1 %2936  ;;  %v2981_v1 = vsel %vm2045_vm3, %v2962_v14, %v2980_v20  ;;  %v10987_v14 = vld [vmem:[#allocation84_spill] sm:$0xff] }
 0x8b8   : > { %v2966_v45 = vrot.slane %v2937_v55, %v8257_v3  ;;  %v5644_v55 = vrot.slane %v10209_v30, %v8257_v3  ;;  %v10989_v30 = vld [vmem:[#allocation24_spill] sm:$0xff] }
 0x8b9   : > { %v4856_v54 = vpop.permute.xlu0 %4855 }
 0x8ba   : > { %v2982_v19 = vsel %vm2047_vm4, %v2966_v45, %v2981_v1  ;;  %v4882_v12 = vrot.slane %v4856_v54, %v8257_v3  ;;  %v5652_v45 = vrot.slane %v10265_v25, %v8257_v3  ;;  %v10988_v1 = vld [vmem:[#allocation72_spill] sm:$0xff]  ;;  %v5669_v9 = vsel %vm2041_vm1, %v5644_v55, %v5640_v61  ;;  %v10992_v54 = vld [vmem:[#allocation65_spill] sm:$0xff] }
 0x8bb   : > { %v2943_v32 = vpop.permute.xlu1 %2942  ;;  %v2983_v15 = vsel %vm2049_vm5, %v2970_v4, %v2982_v19 }
 0x8bc   : > { %v2974_v44 = vrot.slane %v2943_v32, %v8257_v3  ;;  %v5670_v32 = vsel %vm2043_vm2, %v5648_v26, %v5669_v9  ;;  %v11008_v9 = vld [vmem:[#allocation80_spill] sm:$0xff] }
 0x8bd   : > { %v4862_v33 = vpop.permute.xlu0 %4861  ;;  %v5671_v25 = vsel %vm2045_vm3, %v5652_v45, %v5670_v32  ;;  %v11005_v45 = vld [vmem:[#allocation58_spill] sm:$0xff]  ;;  %v11011_v32 = vld [vmem:[#allocation75_spill] sm:$0xff] }
 0x8be   : > { %v2984_v22 = vsel %vm2051_vm6, %v2974_v44, %v2983_v15  ;;  %v4890_v28 = vrot.slane %v4862_v33, %v8257_v3 }
 0x8bf   : > { %v2985_v63 = vsel %vm2053_vm7, %v2978_v47, %v2984_v22  ;;  %v5660_v47 = vrot.slane %v10271_v56, %v8257_v3 }
 0x8c0   : > { %v3892_v53 = vpop.permute.xlu1 %3891  ;;  %7030 = vmatprep.subr.msk.mxu1 %vm2056_vm8, %v2985_v63 }
 0x8c1   : > { %v3918_v17 = vrot.slane %v3892_v53, %v8257_v3  ;;  %7031 = vmatpush3.xpose.msk.msra.mxu1 %vm2056_vm8, %v2985_v63  ;;  %v4868_v0 = vpop.permute.xlu0 %4867  ;;  %v10990_v63 = vld [vmem:[#allocation79_spill] sm:$0xff]  ;;  %v5656_v53 = vrot.slane %v10218_v18, %v8257_v3 }
 0x8c2   : > { %v4898_v15 = vrot.slane %v4868_v0, %v8257_v3 }
 0x8c3   : > { %v3943_v49 = vsel %vm2041_vm1, %v3918_v17, %v3914_v48 }
 0x8c4   : > { %v3898_v35 = vpop.permute.xlu1 %3897  ;;  %7033 = vmatmul.mubr.msk.f32.vlgmr.msra.gmra.mrb[20].mxu1 %vm2056_vm8, %v10977_v39  ;;  %v3944_v11 = vsel %vm2043_vm2, %v3922_v40, %v3943_v49  ;;  %v5672_v40 = vsel %vm2047_vm4, %v5656_v53, %v5671_v25  ;;  %v11014_v25 = vld [vmem:[#allocation91_spill] sm:$0xff] }
 0x8c5   : > { %v3926_v60 = vrot.slane %v3898_v35, %v8257_v3  ;;  %7035 = vmatprep.mubr.msk.f32.mxu1 %vm2056_vm8, %v10978_v34  ;;  %v4874_v41 = vpop.permute.xlu0 %4873  ;;  %v10991_v35 = vld [vmem:[#allocation89_spill] sm:$0xff]  ;;  %v5673_v39 = vsel %vm2049_vm5, %v5660_v47, %v5672_v40 }
 0x8c6   : > { %v4906_v17 = vrot.slane %v4874_v41, %v8257_v3 }
 0x8c7   : > { %v3945_v62 = vsel %vm2045_vm3, %v3926_v60, %v3944_v11  ;;  %v5664_v60 = vrot.slane %v10228_v8, %v8257_v3 }
 0x8c8   : > { %v3904_v38 = vpop.permute.xlu1 %3903  ;;  %7036 = vmatmul.mubr.msk.f32.gmra.mrb[22].mxu1 %vm2056_vm8, %v10979_v2  ;;  %v3946_v6 = vsel %vm2047_vm4, %v3930_v58, %v3945_v62 }
 0x8c9   : > { %v3934_v50 = vrot.slane %v3904_v38, %v8257_v3  ;;  %7038 = vmatprep.mubr.msk.f32.mxu1 %vm2056_vm8, %v10980_v31  ;;  %v5674_v58 = vsel %vm2051_vm6, %v5664_v60, %v5673_v39 }
 0x8ca   : > { %v5817_v22 = vpop.permute.xlu0 %5816 }
 0x8cb   : > { %v3947_v46 = vsel %vm2049_vm5, %v3934_v50, %v3946_v6  ;;  %v10993_v50 = vld [vmem:[#allocation78_spill] sm:$0xff]  ;;  %v5842_v8 = vrot.slane %v5817_v22, %v8257_v3  ;;  %v10994_v6 = vld [vmem:[#allocation69_spill] sm:$0xff] }
 0x8cc   : > { %v3910_v51 = vpop.permute.xlu1 %3909  ;;  %7039 = vmatmul.mubr.msk.f32.gmra.mrb[24].mxu1 %vm2056_vm8, %v10981_v23  ;;  %v3948_v27 = vsel %vm2051_vm6, %v3938_v7, %v3947_v46  ;;  %v10995_v23 = vld [vmem:[#allocation85_spill] sm:$0xff] }
 0x8cd   : > { %v3942_v37 = vrot.slane %v3910_v51, %v8257_v3  ;;  %7041 = vmatprep.mubr.msk.f32.mxu1 %vm2056_vm8, %v10982_v13 }
 0x8ce   : > { %v5823_v11 = vpop.permute.xlu0 %5822 }
 0x8cf   : > { %v3949_v52 = vsel %vm2053_vm7, %v3942_v37, %v3948_v27  ;;  %v5850_v7 = vrot.slane %v5823_v11, %v8257_v3  ;;  %v10996_v37 = vld [vmem:[#allocation41_spill] sm:$0xff] }
 0x8d0   : > { %7042 = vmatmul.mubr.msk.f32.gmra.mrb[26].mxu1 %vm2056_vm8, %v10983_v5  ;;  %7058 = vmatprep.subr.msk.mxu1 %vm2056_vm8, %v3949_v52  ;;  %v10997_v27 = vld [vmem:[#allocation73_spill] sm:$0xff] }
 0x8d1   : > { %v4853_v16 = vpop.permute.xlu1 %4852  ;;  %7059 = vmatpush3.xpose.msk.msra.mxu1 %vm2056_vm8, %v3949_v52  ;;  %7060 = vmatprep.mubr.msk.f32.mxu1 %vm2056_vm8, %v10984_v29  ;;  %v10998_v52 = vld [vmem:[#allocation43_spill] sm:$0xff] }
 0x8d2   : > { %v4878_v57 = vrot.slane %v4853_v16, %v8257_v3  ;;  %v5829_v33 = vpop.permute.xlu0 %5828 }
 0x8d3   : > { %v5858_v16 = vrot.slane %v5829_v33, %v8257_v3 }
 0x8d4   : > { %7061 = vmatmul.mubr.msk.f32.vlgmr.msra.gmra.mrb[28].mxu1 %vm2056_vm8, %v10985_v43  ;;  %v4907_v36 = vsel %vm2041_vm1, %v4882_v12, %v4878_v57  ;;  %v10999_v57 = vld [vmem:[#allocation26_spill] sm:$0xff] }
 0x8d5   : > { %v4859_v24 = vpop.permute.xlu1 %4858  ;;  %7063 = vmatprep.mubr.msk.f32.mxu1 %vm2056_vm8, %v10986_v59  ;;  %v11000_v43 = vld [vmem:[#allocation50_spill] sm:$0xff]  ;;  %v11001_v59 = vld [vmem:[#allocation81_spill] sm:$0xff] }
 0x8d6   : > { %v4886_v21 = vrot.slane %v4859_v24, %v8257_v3  ;;  %v5835_v12 = vpop.permute.xlu0 %5834 }
 0x8d8   : > { %v4908_v20 = vsel %vm2043_vm2, %v4886_v21, %v4907_v36  ;;  %7064 = vmatmul.mubr.msk.f32.gmra.mrb[30].mxu1 %vm2056_vm8, %v10987_v14  ;;  %v11002_v21 = vld [vmem:[#allocation51_spill] sm:$0xff]  ;;  %v5866_v36 = vrot.slane %v5835_v12, %v8257_v3 }
 0x8d9   : > { %v4865_v42 = vpop.permute.xlu1 %4864  ;;  %7066 = vmatprep.mubr.msk.f32.mxu1 %vm2056_vm8, %v10988_v1  ;;  %v4909_v4 = vsel %vm2045_vm3, %v4890_v28, %v4908_v20  ;;  %v11003_v20 = vld [vmem:[#allocation90_spill] sm:$0xff]  ;;  %v11004_v14 = vld [vmem:[#allocation59_spill] sm:$0xff] }
 0x8da   : > { %v4894_v19 = vrot.slane %v4865_v42, %v8257_v3  ;;  %v11006_v28 = vld [vmem:[#allocation66_spill] sm:$0xff] }
 0x8dc   : > { %v4910_v44 = vsel %vm2047_vm4, %v4894_v19, %v4909_v4  ;;  %7067 = vmatmul.mubr.msk.f32.gmra.mrb[32].mxu1 %vm2056_vm8, %v10989_v30  ;;  %v11007_v19 = vld [vmem:[#allocation63_spill] sm:$0xff]  ;;  %v11010_v4 = vld [vmem:[#allocation25_spill] sm:$0xff] }
 0x8dd   : > { %v4871_v10 = vpop.permute.xlu1 %4870  ;;  %7069 = vmatprep.mubr.msk.f32.mxu1 %vm2056_vm8, %v10990_v63  ;;  %v4911_v49 = vsel %vm2049_vm5, %v4898_v15, %v4910_v44  ;;  %v11012_v44 = vld [vmem:[#allocation28_spill] sm:$0xff]  ;;  %v11013_v30 = vld [vmem:[#allocation83_spill] sm:$0xff] }
 0x8de   : > { %v4902_v48 = vrot.slane %v4871_v10, %v8257_v3 }
 0x8e0   : > { %v4912_v56 = vsel %vm2051_vm6, %v4902_v48, %v4911_v49  ;;  %7070 = vmatmul.mubr.msk.f32.gmra.mrb[34].mxu1 %vm2056_vm8, %v10991_v35 }
 0x8e1   : > { %7088 = vmatprep.mubr.msk.f32.mxu1 %vm2056_vm8, %v10992_v54  ;;  %v4913_v18 = vsel %vm2053_vm7, %v4906_v17, %v4912_v56 }
 0x8e2   : > { %v5636_v34 = vpop.permute.xlu1 %5635  ;;  %7086 = vmatprep.subr.msk.mxu1 %vm2056_vm8, %v4913_v18 }
 0x8e3   : > { %v5668_v62 = vrot.slane %v5636_v34, %v8257_v3  ;;  %7087 = vmatpush3.xpose.msk.msra.mxu1 %vm2056_vm8, %v4913_v18 }
 0x8e5   : > { %v5675_v38 = vsel %vm2053_vm7, %v5668_v62, %v5674_v58 }
 0x8e6   : > { %v5820_v2 = vpop.permute.xlu1 %5819  ;;  %7089 = vmatmul.mubr.msk.f32.vlgmr.msra.gmra.mrb[36].mxu1 %vm2056_vm8, %v10993_v50  ;;  %7100 = vmatprep.subr.msk.mxu0 %vm2056_vm8, %v5675_v38 }
 0x8e7   : > { %v5846_v31 = vrot.slane %v5820_v2, %v8257_v3  ;;  %7091 = vmatprep.mubr.msk.f32.mxu1 %vm2056_vm8, %v10994_v6  ;;  %7101 = vmatpush3.xpose.msk.msra.mxu0 %vm2056_vm8, %v5675_v38 }
 0x8e9   : > { %v5871_v46 = vsel %vm2041_vm1, %v5846_v31, %v5842_v8 }
 0x8ea   : > { %v5826_v51 = vpop.permute.xlu1 %5825  ;;  %7092 = vmatmul.mubr.msk.f32.gmra.mrb[38].mxu1 %vm2056_vm8, %v10995_v23  ;;  %7103 = vmatmul.mubr.msk.f32.vlgmr.msra.gmra.mrb[36].mxu0 %vm2056_vm8, %v10996_v37  ;;  %v5872_v5 = vsel %vm2043_vm2, %v5850_v7, %v5871_v46 }
 0x8eb   : > { %v5854_v13 = vrot.slane %v5826_v51, %v8257_v3  ;;  %7094 = vmatprep.mubr.msk.f32.mxu1 %vm2056_vm8, %v10997_v27  ;;  %7105 = vmatprep.mubr.msk.f32.mxu0 %vm2056_vm8, %v10998_v52 }
 0x8ed   : > { %v5873_v0 = vsel %vm2045_vm3, %v5854_v13, %v5872_v5 }
 0x8ee   : > { %v5832_v29 = vpop.permute.xlu1 %5831  ;;  %7095 = vmatmul.mubr.msk.f32.gmra.mrb[40].mxu1 %vm2056_vm8, %v10999_v57  ;;  %7106 = vmatmul.mubr.msk.f32.gmra.mrb[38].mxu0 %vm2056_vm8, %v11000_v43  ;;  %v5874_v61 = vsel %vm2047_vm4, %v5858_v16, %v5873_v0 }
 0x8ef   : > { %v5862_v24 = vrot.slane %v5832_v29, %v8257_v3  ;;  %7097 = vmatprep.mubr.msk.f32.mxu1 %vm2056_vm8, %v11001_v59  ;;  %7108 = vmatprep.mubr.msk.f32.mxu0 %vm2056_vm8, %v11002_v21 }
 0x8f1   : > { %v5875_v41 = vsel %vm2049_vm5, %v5862_v24, %v5874_v61 }
 0x8f2   : > { %v5838_v26 = vpop.permute.xlu1 %5837  ;;  %7098 = vmatmul.mubr.msk.f32.gmra.mrb[42].mxu1 %vm2056_vm8, %v11003_v20  ;;  %7109 = vmatmul.mubr.msk.f32.gmra.mrb[40].mxu0 %vm2056_vm8, %v11004_v14  ;;  %v5876_v42 = vsel %vm2051_vm6, %v5866_v36, %v5875_v41  ;;  %v6345_v41 = vld [vmem:[%s11015_s30] sm:$0xff]  ;;  %v6346_v36 = vld [vmem:[%s11015_s30 + $0x8] sm:$0xff]  ;;  %v6347_v20 = vld [vmem:[%s11015_s30 + $0x10] sm:$0xff] }
 0x8f3   : > { %v5870_v55 = vrot.slane %v5838_v26, %v8257_v3  ;;  %7111 = vmatprep.mubr.msk.f32.mxu0 %vm2056_vm8, %v11005_v45  ;;  %7116 = vmatprep.mubr.msk.f32.mxu1 %vm2056_vm8, %v11006_v28  ;;  %v11009_v3 = vld [vmem:[#allocation70_spill] sm:$0xff]  ;;  %v7188_v26 = vpack.c.bf16 %v6346_v36, %v6345_v41  ;;  %v6348_v14 = vld [vmem:[%s11015_s30 + $0x18] sm:$0xff]  ;;  %v6349_v28 = vld [vmem:[%s11015_s30 + $0x20] sm:$0xff] }
 0x8f4   : > { %v7192_v45 = vpack.c.bf16 %v6348_v14, %v6347_v20 }
 0x8f5   : > { %v5877_v1 = vsel %vm2053_vm7, %v5870_v55, %v5876_v42  ;;  %v6350_v42 = vld [vmem:[%s11015_s30 + $0x28] sm:$0xff]  ;;  %7189 = vmatprep.subr.bf16.mxu0 %v7188_v26 }
 0x8f6   : > { %7112 = vmatmul.mubr.msk.f32.gmra.mrb[42].mxu0 %vm2056_vm8, %v11007_v19  ;;  %7114 = vmatprep.subr.msk.mxu1 %vm2056_vm8, %v5877_v1  ;;  %v7196_v19 = vpack.c.bf16 %v6350_v42, %v6349_v28 }
 0x8f7   : > { %7115 = vmatpush3.xpose.msk.msra.mxu1 %vm2056_vm8, %v5877_v1  ;;  %7191 = vmatpush3.bf16.msra.mxu0 %v7188_v26 }
 0x8f8   : > { %7193 = vmatprep.subr.bf16.mxu0 %v7192_v45 }
 0x8fa   : > { %7117 = vmatmul.mubr.msk.f32.vlgmr.msra.gmra.mrb[44].mxu1 %vm2056_vm8, %v11008_v9 }
 0x8fb   : > { %7119 = vmatprep.mubr.msk.f32.mxu1 %vm2056_vm8, %v11009_v3  ;;  %7195 = vmatpush3.bf16.msra.mxu0 %v7192_v45 }
 0x8fc   : > { %7197 = vmatprep.subr.bf16.mxu0 %v7196_v19 }
 0x8fe   : > { %7120 = vmatmul.mubr.msk.f32.gmra.mrb[46].mxu1 %vm2056_vm8, %v11010_v4  ;;  %v6351_v4 = vld [vmem:[%s11015_s30 + $0x30] sm:$0xff] }
 0x8ff   : > { %7122 = vmatprep.mubr.msk.f32.mxu1 %vm2056_vm8, %v11011_v32  ;;  %v6352_v32 = vld [vmem:[%s11015_s30 + $0x38] sm:$0xff]  ;;  %7199 = vmatpush3.bf16.msra.mxu0 %v7196_v19 }
 0x902   : > { %7123 = vmatmul.mubr.msk.f32.gmra.mrb[48].mxu1 %vm2056_vm8, %v11012_v44 }
 0x903   : > { %7125 = vmatprep.mubr.msk.f32.mxu1 %vm2056_vm8, %v11013_v30 }
 0x906   : > { %7126 = vmatmul.mubr.msk.f32.gmra.mrb[50].mxu1 %vm2056_vm8, %v11014_v25  ;;  %v7200_v25 = vpack.c.bf16 %v6352_v32, %v6351_v4 }
 0x908   : > { %7201 = vmatprep.subr.bf16.mxu0 %v7200_v25 }
 0x909   : > { %7203 = vmatpush3.bf16.msra.mxu0 %v7200_v25 }
 0x947   : > { %v7020_v47 = vpop.f32.mrb[12].mxu0 }
 0x948   : > { %3118 = vst.msk [vmem:[#allocation2 + $0x40] sm:$0xff] %vm2056_vm8, %v7020_v47  ;;  %v2876_v15 = vpop.f32.mrb[13].mxu0 }
 0x949   : > { %3117 = vst.msk [vmem:[#allocation2] sm:$0xff] %vm2056_vm8, %v2876_v15 }
 0x94b   : > { %v7023_v22 = vpop.f32.mrb[14].mxu0 }
 0x94c   : > { %3120 = vst.msk [vmem:[#allocation2 + $0xc0] sm:$0xff] %vm2056_vm8, %v7023_v22  ;;  %v2886_v10 = vpop.f32.mrb[15].mxu0 }
 0x94d   : > { %3119 = vst.msk [vmem:[#allocation2 + $0x80] sm:$0xff] %vm2056_vm8, %v2886_v10 }
 0x94f   : > { %v7026_v63 = vpop.f32.mrb[16].mxu0  ;;  %v6033_v53 = vld [vmem:[#allocation2 + $0x40] sm:$0xff] }
 0x950   : > { %3122 = vst.msk [vmem:[#allocation2 + $0x140] sm:$0xff] %vm2056_vm8, %v7026_v63  ;;  %6121 = vxpose.xlu1.b32.start [1/8] (short) (narrow) %v6033_v53, 8  ;;  %v2896_v48 = vpop.f32.mrb[17].mxu0  ;;  %v6025_v17 = vld [vmem:[#allocation2] sm:$0xff] }
 0x951   : > { %3121 = vst.msk [vmem:[#allocation2 + $0x100] sm:$0xff] %vm2056_vm8, %v2896_v48  ;;  %6089 = vxpose.xlu0.b32.start [1/8] (short) (narrow) %v6025_v17, 8 }
 0x953   : > { %v7029_v49 = vpop.f32.mrb[18].mxu0 }
 0x954   : > { %3124 = vst.msk [vmem:[#allocation2 + $0x1c0] sm:$0xff] %vm2056_vm8, %v7029_v49  ;;  %v2906_v40 = vpop.f32.mrb[19].mxu0 }
 0x955   : > { %3123 = vst.msk [vmem:[#allocation2 + $0x180] sm:$0xff] %vm2056_vm8, %v2906_v40 }
 0x95b   : > { %v6081_v32 = vld [vmem:[#allocation2 + $0x1c0] sm:$0xff] }
 0x963   : > { %v7048_v56 = vpop.f32.mrb[20].mxu0 }
 0x964   : > { %4082 = vst.msk [vmem:[#allocation2 + $0x48] sm:$0xff] %vm2056_vm8, %v7048_v56  ;;  %v3840_v35 = vpop.f32.mrb[21].mxu0 }
 0x965   : > { %4081 = vst.msk [vmem:[#allocation2 + $0x8] sm:$0xff] %vm2056_vm8, %v3840_v35 }
 0x967   : > { %v7051_v39 = vpop.f32.mrb[22].mxu0 }
 0x968   : > { %4084 = vst.msk [vmem:[#allocation2 + $0xc8] sm:$0xff] %vm2056_vm8, %v7051_v39  ;;  %v3850_v54 = vpop.f32.mrb[23].mxu0 }
 0x969   : > { %4083 = vst.msk [vmem:[#allocation2 + $0x88] sm:$0xff] %vm2056_vm8, %v3850_v54 }
 0x96b   : > { %v7054_v18 = vpop.f32.mrb[24].mxu0  ;;  %v6034_v60 = vld [vmem:[#allocation2 + $0x48] sm:$0xff] }
 0x96c   : > { %4086 = vst.msk [vmem:[#allocation2 + $0x148] sm:$0xff] %vm2056_vm8, %v7054_v18  ;;  %6122 = vxpose.xlu1.b32.cont [2/8] (short) (narrow) %v6034_v60, 8  ;;  %v3860_v34 = vpop.f32.mrb[25].mxu0  ;;  %v6026_v11 = vld [vmem:[#allocation2 + $0x8] sm:$0xff] }
 0x96d   : > { %4085 = vst.msk [vmem:[#allocation2 + $0x108] sm:$0xff] %vm2056_vm8, %v3860_v34  ;;  %6090 = vxpose.xlu0.b32.cont [2/8] (short) (narrow) %v6026_v11, 8 }
 0x96f   : > { %v7057_v62 = vpop.f32.mrb[26].mxu0 }
 0x970   : > { %4088 = vst.msk [vmem:[#allocation2 + $0x1c8] sm:$0xff] %vm2056_vm8, %v7057_v62  ;;  %v3870_v58 = vpop.f32.mrb[27].mxu0 }
 0x971   : > { %4087 = vst.msk [vmem:[#allocation2 + $0x188] sm:$0xff] %vm2056_vm8, %v3870_v58 }
 0x973   : > { %v6066_v41 = vld [vmem:[#allocation2 + $0x148] sm:$0xff] }
 0x974   : > { %v6058_v36 = vld [vmem:[#allocation2 + $0x108] sm:$0xff] }
 0x975   : > { %v7076_v38 = vpop.f32.mrb[28].mxu0 }
 0x976   : > { %5046 = vst.msk [vmem:[#allocation2 + $0x50] sm:$0xff] %vm2056_vm8, %v7076_v38  ;;  %v4804_v2 = vpop.f32.mrb[29].mxu0 }
 0x977   : > { %5045 = vst.msk [vmem:[#allocation2 + $0x10] sm:$0xff] %vm2056_vm8, %v4804_v2 }
 0x978   : > { %v6074_v25 = vld [vmem:[#allocation2 + $0x188] sm:$0xff] }
 0x979   : > { %v7079_v50 = vpop.f32.mrb[30].mxu0 }
 0x97a   : > { %5048 = vst.msk [vmem:[#allocation2 + $0xd0] sm:$0xff] %vm2056_vm8, %v7079_v50  ;;  %v4814_v8 = vpop.f32.mrb[31].mxu0 }
 0x97b   : > { %5047 = vst.msk [vmem:[#allocation2 + $0x90] sm:$0xff] %vm2056_vm8, %v4814_v8 }
 0x97d   : > { %v7082_v31 = vpop.f32.mrb[32].mxu0  ;;  %v6035_v6 = vld [vmem:[#allocation2 + $0x50] sm:$0xff] }
 0x97e   : > { %5050 = vst.msk [vmem:[#allocation2 + $0x150] sm:$0xff] %vm2056_vm8, %v7082_v31  ;;  %6123 = vxpose.xlu1.b32.cont [3/8] (short) (narrow) %v6035_v6, 8  ;;  %v4824_v33 = vpop.f32.mrb[33].mxu0  ;;  %v6027_v46 = vld [vmem:[#allocation2 + $0x10] sm:$0xff] }
 0x97f   : > { %5049 = vst.msk [vmem:[#allocation2 + $0x110] sm:$0xff] %vm2056_vm8, %v4824_v33  ;;  %6091 = vxpose.xlu0.b32.cont [3/8] (short) (narrow) %v6027_v46, 8  ;;  %v6049_v46 = vld [vmem:[#allocation2 + $0xc0] sm:$0xff] }
 0x981   : > { %v7085_v7 = vpop.f32.mrb[34].mxu0 }
 0x982   : > { %5052 = vst.msk [vmem:[#allocation2 + $0x1d0] sm:$0xff] %vm2056_vm8, %v7085_v7  ;;  %v4834_v51 = vpop.f32.mrb[35].mxu0 }
 0x983   : > { %5051 = vst.msk [vmem:[#allocation2 + $0x190] sm:$0xff] %vm2056_vm8, %v4834_v51  ;;  %v6041_v51 = vld [vmem:[#allocation2 + $0x80] sm:$0xff] }
 0x985   : > { %v6067_v26 = vld [vmem:[#allocation2 + $0x150] sm:$0xff] }
 0x986   : > { %v6059_v20 = vld [vmem:[#allocation2 + $0x110] sm:$0xff] }
 0x997   : > { %v7034_v23 = vpop.f32.mrb[20].mxu1 }
 0x998   : > { %3126 = vst.msk [vmem:[#allocation2 + $0x60] sm:$0xff] %vm2056_vm8, %v7034_v23  ;;  %v3078_v37 = vpop.f32.mrb[21].mxu1  ;;  %v6050_v23 = vld [vmem:[#allocation2 + $0xc8] sm:$0xff] }
 0x999   : > { %3125 = vst.msk [vmem:[#allocation2 + $0x20] sm:$0xff] %vm2056_vm8, %v3078_v37  ;;  %v6042_v37 = vld [vmem:[#allocation2 + $0x88] sm:$0xff] }
 0x99b   : > { %v7037_v13 = vpop.f32.mrb[22].mxu1 }
 0x99c   : > { %3128 = vst.msk [vmem:[#allocation2 + $0xe0] sm:$0xff] %vm2056_vm8, %v7037_v13  ;;  %v3088_v27 = vpop.f32.mrb[23].mxu1  ;;  %v6051_v13 = vld [vmem:[#allocation2 + $0xd0] sm:$0xff] }
 0x99d   : > { %3127 = vst.msk [vmem:[#allocation2 + $0xa0] sm:$0xff] %vm2056_vm8, %v3088_v27  ;;  %v6043_v27 = vld [vmem:[#allocation2 + $0x90] sm:$0xff] }
 0x99f   : > { %v7040_v52 = vpop.f32.mrb[24].mxu1  ;;  %v6037_v35 = vld [vmem:[#allocation2 + $0x60] sm:$0xff] }
 0x9a0   : > { %3130 = vst.msk [vmem:[#allocation2 + $0x160] sm:$0xff] %vm2056_vm8, %v7040_v52  ;;  %v3098_v5 = vpop.f32.mrb[25].mxu1  ;;  %v6029_v54 = vld [vmem:[#allocation2 + $0x20] sm:$0xff] }
 0x9a1   : > { %3129 = vst.msk [vmem:[#allocation2 + $0x120] sm:$0xff] %vm2056_vm8, %v3098_v5 }
 0x9a3   : > { %v7043_v0 = vpop.f32.mrb[26].mxu1 }
 0x9a4   : > { %3132 = vst.msk [vmem:[#allocation2 + $0x1e0] sm:$0xff] %vm2056_vm8, %v7043_v0  ;;  %v3108_v16 = vpop.f32.mrb[27].mxu1  ;;  %v6053_v0 = vld [vmem:[#allocation2 + $0xe0] sm:$0xff] }
 0x9a5   : > { %3131 = vst.msk [vmem:[#allocation2 + $0x1a0] sm:$0xff] %vm2056_vm8, %v3108_v16  ;;  %v6045_v16 = vld [vmem:[#allocation2 + $0xa0] sm:$0xff] }
 0x9a7   : > { %v7062_v29 = vpop.f32.mrb[28].mxu1  ;;  %v6069_v45 = vld [vmem:[#allocation2 + $0x160] sm:$0xff] }
 0x9a8   : > { %4090 = vst.msk [vmem:[#allocation2 + $0x68] sm:$0xff] %vm2056_vm8, %v7062_v29  ;;  %v4042_v57 = vpop.f32.mrb[29].mxu1  ;;  %v6061_v28 = vld [vmem:[#allocation2 + $0x120] sm:$0xff] }
 0x9a9   : > { %4089 = vst.msk [vmem:[#allocation2 + $0x28] sm:$0xff] %vm2056_vm8, %v4042_v57 }
 0x9ab   : > { %v7065_v43 = vpop.f32.mrb[30].mxu1 }
 0x9ac   : > { %4092 = vst.msk [vmem:[#allocation2 + $0xe8] sm:$0xff] %vm2056_vm8, %v7065_v43  ;;  %v4052_v12 = vpop.f32.mrb[31].mxu1 }
 0x9ad   : > { %4091 = vst.msk [vmem:[#allocation2 + $0xa8] sm:$0xff] %vm2056_vm8, %v4052_v12 }
 0x9af   : > { %v7068_v24 = vpop.f32.mrb[32].mxu1  ;;  %v6038_v60 = vld [vmem:[#allocation2 + $0x68] sm:$0xff] }
 0x9b0   : > { %4094 = vst.msk [vmem:[#allocation2 + $0x168] sm:$0xff] %vm2056_vm8, %v7068_v24  ;;  %v4062_v59 = vpop.f32.mrb[33].mxu1  ;;  %v6030_v11 = vld [vmem:[#allocation2 + $0x28] sm:$0xff] }
 0x9b1   : > { %4093 = vst.msk [vmem:[#allocation2 + $0x128] sm:$0xff] %vm2056_vm8, %v4062_v59 }
 0x9b3   : > { %v7071_v21 = vpop.f32.mrb[34].mxu1  ;;  %v6054_v29 = vld [vmem:[#allocation2 + $0xe8] sm:$0xff] }
 0x9b4   : > { %4096 = vst.msk [vmem:[#allocation2 + $0x1e8] sm:$0xff] %vm2056_vm8, %v7071_v21  ;;  %v4072_v61 = vpop.f32.mrb[35].mxu1  ;;  %v6046_v57 = vld [vmem:[#allocation2 + $0xa8] sm:$0xff]  ;;  %v6065_v21 = vld [vmem:[#allocation2 + $0x140] sm:$0xff] }
 0x9b5   : > { %4095 = vst.msk [vmem:[#allocation2 + $0x1a8] sm:$0xff] %vm2056_vm8, %v4072_v61  ;;  %v6057_v61 = vld [vmem:[#allocation2 + $0x100] sm:$0xff] }
 0x9b7   : > { %v6070_v42 = vld [vmem:[#allocation2 + $0x168] sm:$0xff] }
 0x9b9   : > { %v7090_v55 = vpop.f32.mrb[36].mxu1 }
 0x9ba   : > { %5054 = vst.msk [vmem:[#allocation2 + $0x70] sm:$0xff] %vm2056_vm8, %v7090_v55  ;;  %v5006_v1 = vpop.f32.mrb[37].mxu1 }
 0x9bb   : > { %5053 = vst.msk [vmem:[#allocation2 + $0x30] sm:$0xff] %vm2056_vm8, %v5006_v1  ;;  %v6062_v1 = vld [vmem:[#allocation2 + $0x128] sm:$0xff] }
 0x9bd   : > { %v7093_v9 = vpop.f32.mrb[38].mxu1  ;;  %v7104_v3 = vpop.f32.mrb[36].mxu0 }
 0x9be   : > { %5056 = vst.msk [vmem:[#allocation2 + $0xf0] sm:$0xff] %vm2056_vm8, %v7093_v9  ;;  %6010 = vst.msk [vmem:[#allocation2 + $0x58] sm:$0xff] %vm2056_vm8, %v7104_v3  ;;  %v5016_v44 = vpop.f32.mrb[39].mxu1  ;;  %v5768_v30 = vpop.f32.mrb[37].mxu0 }
 0x9bf   : > { %5055 = vst.msk [vmem:[#allocation2 + $0xb0] sm:$0xff] %vm2056_vm8, %v5016_v44  ;;  %6009 = vst.msk [vmem:[#allocation2 + $0x18] sm:$0xff] %vm2056_vm8, %v5768_v30  ;;  %v6073_v44 = vld [vmem:[#allocation2 + $0x180] sm:$0xff]  ;;  %v6082_v30 = vld [vmem:[#allocation2 + $0x1c8] sm:$0xff] }
 0x9c1   : > { %v7096_v47 = vpop.f32.mrb[40].mxu1  ;;  %v7107_v15 = vpop.f32.mrb[38].mxu0  ;;  %v6039_v58 = vld [vmem:[#allocation2 + $0x70] sm:$0xff] }
 0x9c2   : > { %5058 = vst.msk [vmem:[#allocation2 + $0x170] sm:$0xff] %vm2056_vm8, %v7096_v47  ;;  %6012 = vst.msk [vmem:[#allocation2 + $0xd8] sm:$0xff] %vm2056_vm8, %v7107_v15  ;;  %v5026_v22 = vpop.f32.mrb[41].mxu1  ;;  %v5778_v10 = vpop.f32.mrb[39].mxu0  ;;  %v6031_v2 = vld [vmem:[#allocation2 + $0x30] sm:$0xff] }
 0x9c3   : > { %5057 = vst.msk [vmem:[#allocation2 + $0x130] sm:$0xff] %vm2056_vm8, %v5026_v22  ;;  %6011 = vst.msk [vmem:[#allocation2 + $0x98] sm:$0xff] %vm2056_vm8, %v5778_v10  ;;  %v6083_v47 = vld [vmem:[#allocation2 + $0x1d0] sm:$0xff] }
 0x9c4   : > { %v6075_v15 = vld [vmem:[#allocation2 + $0x190] sm:$0xff] }
 0x9c5   : > { %v7099_v63 = vpop.f32.mrb[42].mxu1  ;;  %v7110_v53 = vpop.f32.mrb[40].mxu0  ;;  %v6036_v48 = vld [vmem:[#allocation2 + $0x58] sm:$0xff]  ;;  %v6055_v43 = vld [vmem:[#allocation2 + $0xf0] sm:$0xff] }
 0x9c6   : > { %5060 = vst.msk [vmem:[#allocation2 + $0x1f0] sm:$0xff] %vm2056_vm8, %v7099_v63  ;;  %6014 = vst.msk [vmem:[#allocation2 + $0x158] sm:$0xff] %vm2056_vm8, %v7110_v53  ;;  %6124 = vxpose.xlu1.b32.cont [4/8] (short) (narrow) %v6036_v48, 8  ;;  %v5036_v17 = vpop.f32.mrb[43].mxu1  ;;  %v5788_v49 = vpop.f32.mrb[41].mxu0  ;;  %v6028_v40 = vld [vmem:[#allocation2 + $0x18] sm:$0xff] }
 0x9c7   : > { %5059 = vst.msk [vmem:[#allocation2 + $0x1b0] sm:$0xff] %vm2056_vm8, %v5036_v17  ;;  %6013 = vst.msk [vmem:[#allocation2 + $0x118] sm:$0xff] %vm2056_vm8, %v5788_v49  ;;  %6092 = vxpose.xlu0.b32.cont [4/8] (short) (narrow) %v6028_v40, 8  ;;  %v6047_v12 = vld [vmem:[#allocation2 + $0xb0] sm:$0xff]  ;;  %v6085_v63 = vld [vmem:[#allocation2 + $0x1e0] sm:$0xff] }
 0x9c8   : > { %v6077_v53 = vld [vmem:[#allocation2 + $0x1a0] sm:$0xff]  ;;  %v6086_v48 = vld [vmem:[#allocation2 + $0x1e8] sm:$0xff] }
 0x9c9   : > { %v7113_v56 = vpop.f32.mrb[42].mxu0  ;;  %v6052_v52 = vld [vmem:[#allocation2 + $0xd8] sm:$0xff]  ;;  %v6071_v19 = vld [vmem:[#allocation2 + $0x170] sm:$0xff]  ;;  %v6078_v17 = vld [vmem:[#allocation2 + $0x1a8] sm:$0xff] }
 0x9ca   : > { %6016 = vst.msk [vmem:[#allocation2 + $0x1d8] sm:$0xff] %vm2056_vm8, %v7113_v56  ;;  %v5798_v39 = vpop.f32.mrb[43].mxu0  ;;  %6125 = vxpose.xlu1.b32.cont [5/8] (short) (narrow) %v6037_v35, 8  ;;  %v6044_v5 = vld [vmem:[#allocation2 + $0x98] sm:$0xff]  ;;  %v6063_v9 = vld [vmem:[#allocation2 + $0x130] sm:$0xff] }
 0x9cb   : > { %6015 = vst.msk [vmem:[#allocation2 + $0x198] sm:$0xff] %vm2056_vm8, %v5798_v39  ;;  %6093 = vxpose.xlu0.b32.cont [5/8] (short) (narrow) %v6029_v54, 8 }
 0x9cd   : > { %v7118_v18 = vpop.f32.mrb[44].mxu1  ;;  %v6068_v14 = vld [vmem:[#allocation2 + $0x158] sm:$0xff]  ;;  %v6087_v49 = vld [vmem:[#allocation2 + $0x1f0] sm:$0xff] }
 0x9ce   : > { %6018 = vst.msk [vmem:[#allocation2 + $0x78] sm:$0xff] %vm2056_vm8, %v7118_v18  ;;  %6126 = vxpose.xlu1.b32.cont [6/8] (short) (narrow) %v6038_v60, 8  ;;  %v5970_v34 = vpop.f32.mrb[45].mxu1  ;;  %v6060_v55 = vld [vmem:[#allocation2 + $0x118] sm:$0xff]  ;;  %v6079_v40 = vld [vmem:[#allocation2 + $0x1b0] sm:$0xff] }
 0x9cf   : > { %6017 = vst.msk [vmem:[#allocation2 + $0x38] sm:$0xff] %vm2056_vm8, %v5970_v34  ;;  %6094 = vxpose.xlu0.b32.cont [6/8] (short) (narrow) %v6030_v11, 8 }
 0x9d1   : > { %v7121_v62 = vpop.f32.mrb[46].mxu1  ;;  %v6084_v22 = vld [vmem:[#allocation2 + $0x1d8] sm:$0xff] }
 0x9d2   : > { %6020 = vst.msk [vmem:[#allocation2 + $0xf8] sm:$0xff] %vm2056_vm8, %v7121_v62  ;;  %6127 = vxpose.xlu1.b32.cont [7/8] (short) (narrow) %v6039_v58, 8  ;;  %v5980_v38 = vpop.f32.mrb[47].mxu1  ;;  %v6076_v10 = vld [vmem:[#allocation2 + $0x198] sm:$0xff] }
 0x9d3   : > { %6019 = vst.msk [vmem:[#allocation2 + $0xb8] sm:$0xff] %vm2056_vm8, %v5980_v38  ;;  %6095 = vxpose.xlu0.b32.cont [7/8] (short) (narrow) %v6031_v2, 8  ;;  %v6783_v38 = vld [vmem:[%s11016_s16] ss:$0 sm:$0xff] }
 0x9d5   : > { %v7124_v50 = vpop.f32.mrb[48].mxu1  ;;  %v6040_v8 = vld [vmem:[#allocation2 + $0x78] sm:$0xff] }
 0x9d6   : > { %6022 = vst.msk [vmem:[#allocation2 + $0x178] sm:$0xff] %vm2056_vm8, %v7124_v50  ;;  %6128 = vxpose.xlu1.b32.end [8/8] (short) (narrow) %v6040_v8, 8  ;;  %v5990_v31 = vpop.f32.mrb[49].mxu1  ;;  %v6032_v6 = vld [vmem:[#allocation2 + $0x38] sm:$0xff] }
 0x9d7   : > { %6021 = vst.msk [vmem:[#allocation2 + $0x138] sm:$0xff] %vm2056_vm8, %v5990_v31  ;;  %6096 = vxpose.xlu0.b32.end [8/8] (short) (narrow) %v6032_v6, 8 }
 0x9d9   : > { %v7127_v33 = vpop.f32.mrb[50].mxu1  ;;  %v6056_v24 = vld [vmem:[#allocation2 + $0xf8] sm:$0xff] }
 0x9da   : > { %6024 = vst.msk [vmem:[#allocation2 + $0x1f8] sm:$0xff] %vm2056_vm8, %v7127_v33  ;;  %6185 = vxpose.xlu1.b32.start [1/8] (short) (narrow) %v6049_v46, 8  ;;  %v6000_v7 = vpop.f32.mrb[51].mxu1  ;;  %v6048_v59 = vld [vmem:[#allocation2 + $0xb8] sm:$0xff] }
 0x9db   : > { %6023 = vst.msk [vmem:[#allocation2 + $0x1b8] sm:$0xff] %vm2056_vm8, %v6000_v7  ;;  %6153 = vxpose.xlu0.b32.start [1/8] (short) (narrow) %v6041_v51, 8 }
 0x9dd   : > { %v6072_v3 = vld [vmem:[#allocation2 + $0x178] sm:$0xff] }
 0x9de   : > { %6186 = vxpose.xlu1.b32.cont [2/8] (short) (narrow) %v6050_v23, 8  ;;  %v6064_v4 = vld [vmem:[#allocation2 + $0x138] sm:$0xff] }
 0x9df   : > { %6154 = vxpose.xlu0.b32.cont [2/8] (short) (narrow) %v6042_v37, 8 }
 0x9e1   : > { %v6088_v56 = vld [vmem:[#allocation2 + $0x1f8] sm:$0xff] }
 0x9e2   : > { %6187 = vxpose.xlu1.b32.cont [3/8] (short) (narrow) %v6051_v13, 8  ;;  %v6080_v35 = vld [vmem:[#allocation2 + $0x1b8] sm:$0xff] }
 0x9e3   : > { %6155 = vxpose.xlu0.b32.cont [3/8] (short) (narrow) %v6043_v27, 8 }
 0x9e6   : > { %6188 = vxpose.xlu1.b32.cont [4/8] (short) (narrow) %v6052_v52, 8 }
 0x9e7   : > { %6156 = vxpose.xlu0.b32.cont [4/8] (short) (narrow) %v6044_v5, 8 }
 0x9ea   : > { %6189 = vxpose.xlu1.b32.cont [5/8] (short) (narrow) %v6053_v0, 8 }
 0x9eb   : > { %6157 = vxpose.xlu0.b32.cont [5/8] (short) (narrow) %v6045_v16, 8 }
 0x9ee   : > { %6190 = vxpose.xlu1.b32.cont [6/8] (short) (narrow) %v6054_v29, 8 }
 0x9ef   : > { %6158 = vxpose.xlu0.b32.cont [6/8] (short) (narrow) %v6046_v57, 8 }
 0x9f2   : > { %6191 = vxpose.xlu1.b32.cont [7/8] (short) (narrow) %v6055_v43, 8 }
 0x9f3   : > { %6159 = vxpose.xlu0.b32.cont [7/8] (short) (narrow) %v6047_v12, 8 }
 0x9f6   : > { %6192 = vxpose.xlu1.b32.end [8/8] (short) (narrow) %v6056_v24, 8 }
 0x9f7   : > { %6160 = vxpose.xlu0.b32.end [8/8] (short) (narrow) %v6048_v59, 8 }
 0x9fa   : > { %6249 = vxpose.xlu1.b32.start [1/8] (short) (narrow) %v6065_v21, 8 }
 0x9fb   : > { %6217 = vxpose.xlu0.b32.start [1/8] (short) (narrow) %v6057_v61, 8 }
 0x9fe   : > { %6250 = vxpose.xlu1.b32.cont [2/8] (short) (narrow) %v6066_v41, 8 }
 0x9ff   : > { %6218 = vxpose.xlu0.b32.cont [2/8] (short) (narrow) %v6058_v36, 8 }
 0xa02   : > { %6251 = vxpose.xlu1.b32.cont [3/8] (short) (narrow) %v6067_v26, 8 }
 0xa03   : > { %6219 = vxpose.xlu0.b32.cont [3/8] (short) (narrow) %v6059_v20, 8 }
 0xa06   : > { %6252 = vxpose.xlu1.b32.cont [4/8] (short) (narrow) %v6068_v14, 8 }
 0xa07   : > { %6220 = vxpose.xlu0.b32.cont [4/8] (short) (narrow) %v6060_v55, 8 }
 0xa0a   : > { %6253 = vxpose.xlu1.b32.cont [5/8] (short) (narrow) %v6069_v45, 8 }
 0xa0b   : > { %6221 = vxpose.xlu0.b32.cont [5/8] (short) (narrow) %v6061_v28, 8 }
 0xa0e   : > { %6254 = vxpose.xlu1.b32.cont [6/8] (short) (narrow) %v6070_v42, 8 }
 0xa0f   : > { %6222 = vxpose.xlu0.b32.cont [6/8] (short) (narrow) %v6062_v1, 8 }
 0xa12   : > { %6255 = vxpose.xlu1.b32.cont [7/8] (short) (narrow) %v6071_v19, 8 }
 0xa13   : > { %6223 = vxpose.xlu0.b32.cont [7/8] (short) (narrow) %v6063_v9, 8 }
 0xa16   : > { %6256 = vxpose.xlu1.b32.end [8/8] (short) (narrow) %v6072_v3, 8 }
 0xa17   : > { %6224 = vxpose.xlu0.b32.end [8/8] (short) (narrow) %v6064_v4, 8 }
 0xa1a   : > { %6313 = vxpose.xlu1.b32.start [1/8] (short) (narrow) %v6081_v32, 8 }
 0xa1b   : > { %6281 = vxpose.xlu0.b32.start [1/8] (short) (narrow) %v6073_v44, 8 }
 0xa1e   : > { %6314 = vxpose.xlu1.b32.cont [2/8] (short) (narrow) %v6082_v30, 8 }
 0xa1f   : > { %6282 = vxpose.xlu0.b32.cont [2/8] (short) (narrow) %v6074_v25, 8 }
 0xa22   : > { %6315 = vxpose.xlu1.b32.cont [3/8] (short) (narrow) %v6083_v47, 8 }
 0xa23   : > { %6283 = vxpose.xlu0.b32.cont [3/8] (short) (narrow) %v6075_v15, 8 }
 0xa26   : > { %6316 = vxpose.xlu1.b32.cont [4/8] (short) (narrow) %v6084_v22, 8 }
 0xa27   : > { %6284 = vxpose.xlu0.b32.cont [4/8] (short) (narrow) %v6076_v10, 8 }
 0xa2a   : > { %6317 = vxpose.xlu1.b32.cont [5/8] (short) (narrow) %v6085_v63, 8 }
 0xa2b   : > { %6285 = vxpose.xlu0.b32.cont [5/8] (short) (narrow) %v6077_v53, 8 }
 0xa2e   : > { %6318 = vxpose.xlu1.b32.cont [6/8] (short) (narrow) %v6086_v48, 8 }
 0xa2f   : > { %6286 = vxpose.xlu0.b32.cont [6/8] (short) (narrow) %v6078_v17, 8 }
 0xa32   : > { %6319 = vxpose.xlu1.b32.cont [7/8] (short) (narrow) %v6087_v49, 8 }
 0xa33   : > { %6287 = vxpose.xlu0.b32.cont [7/8] (short) (narrow) %v6079_v40, 8 }
 0xa36   : > { %6320 = vxpose.xlu1.b32.end [8/8] (short) (narrow) %v6088_v56, 8 }
 0xa37   : > { %6288 = vxpose.xlu0.b32.end [8/8] (short) (narrow) %v6080_v35, 8 }
 0xa3a   : > { %v6137_v39 = vpop.trf.xlu1 }
 0xa3b   : > { %v6105_v54 = vpop.trf.xlu0 }
 0xa3c   : > { %7144 = vmatprep.mubr.msk.f32.mxu0 %vm6360_vm9, %v6105_v54 }
 0xa3d   : > { %7145 = vmatmul.mubr.msk.f32.vlgmr.msra.gmra.mrb[44].mxu0 %vm6360_vm9, %v6137_v39 }
 0xa5a   : > { %v6201_v18 = vpop.trf.xlu1 }
 0xa5b   : > { %v6169_v60 = vpop.trf.xlu0 }
 0xa5c   : > { %7147 = vmatprep.mubr.msk.f32.mxu0 %vm6360_vm9, %v6169_v60 }
 0xa5d   : > { %7148 = vmatmul.mubr.msk.f32.gmra.mrb[46].mxu0 %vm6360_vm9, %v6201_v18 }
 0xa7a   : > { %v6265_v34 = vpop.trf.xlu1 }
 0xa7b   : > { %v6233_v11 = vpop.trf.xlu0 }
 0xa7c   : > { %7150 = vmatprep.mubr.msk.f32.mxu0 %vm6360_vm9, %v6233_v11 }
 0xa7d   : > { %7151 = vmatmul.mubr.msk.f32.gmra.mrb[48].mxu0 %vm6360_vm9, %v6265_v34 }
 0xa9a   : > { %v6329_v62 = vpop.trf.xlu1 }
 0xa9b   : > { %v6297_v58 = vpop.trf.xlu0 }
 0xa9c   : > { %7153 = vmatprep.mubr.msk.f32.mxu0 %vm6360_vm9, %v6297_v58 }
 0xa9d   : > { %7154 = vmatmul.mubr.msk.f32.gmra.mrb[50].mxu0 %vm6360_vm9, %v6329_v62 }
 0xb10   : > { %v7146_v2 = vpop.f32.mrb[44].mxu0 }
 0xb11   : > { %v6457_v50 = vadd.f32 %v7146_v2, %v6783_v38  ;;  %v6451_v8 = vpop.f32.mrb[45].mxu0 }
 0xb12   : > { %v6452_v31 = vadd.f32 %v6783_v38, %v6451_v8 }
 0xb13   : > { %6491 = vst.msk [vmem:[%s591_s27 + $0x8] sm:$0xff] %vm607_vm0, %v6457_v50 }
 0xb14   : > { %6490 = vst.msk [vmem:[%s591_s27] sm:$0xff] %vm607_vm0, %v6452_v31 }
 0xb30   : > { %v7149_v6 = vpop.f32.mrb[46].mxu0 }
 0xb31   : > { %v6467_v33 = vadd.f32 %v7149_v6, %v6783_v38  ;;  %v6461_v46 = vpop.f32.mrb[47].mxu0 }
 0xb32   : > { %v6462_v7 = vadd.f32 %v6783_v38, %v6461_v46 }
 0xb33   : > { %6493 = vst.msk [vmem:[%s591_s27 + $0x18] sm:$0xff] %vm607_vm0, %v6467_v33 }
 0xb34   : > { %6492 = vst.msk [vmem:[%s591_s27 + $0x10] sm:$0xff] %vm607_vm0, %v6462_v7 }
 0xb50   : > { %v7152_v51 = vpop.f32.mrb[48].mxu0 }
 0xb51   : > { %v6477_v23 = vadd.f32 %v7152_v51, %v6783_v38  ;;  %v6471_v37 = vpop.f32.mrb[49].mxu0 }
 0xb52   : > { %v6472_v13 = vadd.f32 %v6783_v38, %v6471_v37 }
 0xb53   : > { %6495 = vst.msk [vmem:[%s591_s27 + $0x28] sm:$0xff] %vm607_vm0, %v6477_v23 }
 0xb54   : > { %6494 = vst.msk [vmem:[%s591_s27 + $0x20] sm:$0xff] %vm607_vm0, %v6472_v13 }
 0xb70   : > { %v7155_v27 = vpop.f32.mrb[50].mxu0 }
 0xb71   : > { %v6487_v52 = vadd.f32 %v7155_v27, %v6783_v38  ;;  %v6481_v5 = vpop.f32.mrb[51].mxu0 }
 0xb72   : > { %v6482_v0 = vadd.f32 %v6783_v38, %v6481_v5 }
 0xb73   : > { %6497 = vst.msk [vmem:[%s591_s27 + $0x38] sm:$0xff] %vm607_vm0, %v6487_v52 }
 0xb74   : > { %6496 = vst.msk [vmem:[%s591_s27 + $0x30] sm:$0xff] %vm607_vm0, %v6482_v0 }
 0xb75   : > { %7856 = shalt.err (!%p7853_p8)
}
 0xb76   : > { %s7857_s6 = scalar_lea.hbm %s10560_s20, 1024  ;;  %s7861_s18 = scalar_lea.hbm %s11018_s29, 2048 }
 0xb77   : > { %p7858_p6 = scmp.ne.s32.totalorder %s10560_s20, %s7857_s6  ;;  %p7862_p2 = scmp.lt.u32.totalorder %s10560_s20, %s11018_s29 }
 0xb78   : > { %p7863_p0 = scmp.lt.u32.totalorder %s7861_s18, %s7857_s6  ;;  %p7865_p11 = scmp.lt.u32.totalorder %s7857_s6, %s10560_s20 }
 0xb79   : > { %p7859_p7 = pnand %p7858_p6, %p11019_p13 }
 0xb7a   : > { %p7864_p9 = por %p7863_p0, %p7862_p2 }
 0xb7b   : > { %p7860_p10 = pneg %p7859_p7 }
 0xb7c   : > { %p7866_p1 = por %p7865_p11, %p7864_p9 }
 0xb7e   : > { %p7867_p12 = pnand %p7866_p1, %p7860_p10 }
 0xb80   : > { %7870 = shalt.err (!%p7867_p12)
}
 0xb81   : > { %s7935_s25 = smov 128   ;;  %s7936_s24 = smov 8  }
 0xb82   : > { %7220 = dma.vmem_to_hbm [thread:$0]  (%p11019_p13), %s10562_s28, 1024, %s10560_s20, %s6499_s22, %s7935_s25, %s7935_s25, %s7936_s24  }
 0xb83 PF: > { %s11020_s23 = sld [smem:[#allocation17_spill]]  ;;  %s11021_s15 = sld [smem:[#allocation22_spill]] }
 0xb84   : > { %p11023_p4 = scmp.ge.s32.totalorder %s7921_s21, 2 }
 0xb89   : > { %s6527_s8 = sand.u32 1, %s11020_s23   ;;  %p11022_p3 = scmp.ne.s32.totalorder %s11021_s15, 0 }
 0xb8a   : > { %s6528_s12 = scalar_lea.sflag [#allocation5], %s6527_s8 }
 0xb8b   : > { %p7237_p5 = pnand %p11023_p4, %p11022_p3 }
 0xb8d   : > { %7904 = dma.done.wait (!%p7237_p5), %s6528_s12, 1024  }
 0xb8e   : > { %7906 = vsyncadd (!%p7237_p5), %s6528_s12, 4294966272  ;;  %s11024_s21 = sld [smem:[#allocation19_spill]]  ;;  %s11025_s14 = sld [smem:[#allocation18_spill]] }
 0xb8f   : > { %s11026_s20 = sld [smem:[#allocation20_spill]]  ;;  %s11027_s18 = smov %s7913_s19 }
 0xb94   : > { %p32_p8 = scmp.ge.s32.totalorder %s11024_s21, 4   ;;  %s11028_s19 = smov %s11025_s14 }
 0xb96   :  { %34 = sbr.rel (!%p32_p8) target bundleno = 16 (0x10), region = 149 }
 0xb9d   :  { %6533 = vsyncpa [#allocation4], 1 }
 0xb9e   :  { %6535 = vsyncpa [#allocation4 + $0x1], 1 }
 0xb9f   :  { %6536 = vsyncpa [#allocation7], 1 }
 0xba0   :  { %6538 = vsyncpa [#allocation7 + $0x1], 1 }
 0xba1   :  { %6539 = vsyncpa [#allocation10], 1 }
 0xba2   :  { %6540 = vsyncpa [#allocation5], 1 }
 0xba3   :  { %6542 = vsyncpa [#allocation5 + $0x1], 1 }

</bundles_post_ra>
